<compile_context>
chip_gen: v5e
topology: v5e:2x2
jax: 0.10.0
libtpu: 0.0.40
codegen_flags: <defaults>
</compile_context>

<pallas_src>
import math
import functools

import jax
import jax.numpy as jnp
from jax.experimental import pallas as pl
from jax.experimental.pallas import tpu as pltpu


# Rows of the packed (L, 6, E) bias/LayerNorm slab.
_ROW_BO, _ROW_B2, _ROW_LN1W, _ROW_LN1B, _ROW_LN2W, _ROW_LN2B = 0, 1, 2, 3, 4, 5

# Matmul operand dtype for the big weight slabs.  float32 keeps bit-faithful
# semantics at this toy size; switch to jnp.bfloat16 for realistic MAE widths.
MATMUL_DTYPE = jnp.float32


# -----------------------------------------------------------------------------
# Fused Pallas kernel: full decoder stack + output projection, whole batch.
# -----------------------------------------------------------------------------
def _mae_decoder_kernel(x_ref,      # (B*T, E)   activations, batch folded
                        wqkv_ref,   # (L, E, 3E) fused QKV weights
                        wo_ref,     # (L, H, dh, E) attention output proj (per head)
                        w1_ref,     # (L, E, M)
                        w2_ref,     # (L, M, E)
                        bqkv_ref,   # (L, 1, 3E)
                        b1_ref,     # (L, 1, M)
                        be_ref,     # (L, 6, E)  rows: bo, b2, ln1w, ln1b, ln2w, ln2b
                        outw_ref,   # (E, Ppad)  128-padded output projection
                        outb_ref,   # (1, Ppad)
                        out_ref,    # (B*T, Ppad) lane-dense output slab
                        *, batch, num_layers, num_heads):
    BT, E = x_ref.shape
    B = batch
    T = BT // B
    H = num_heads
    dh = E // H
    scale = 1.0 / math.sqrt(dh)
    f32 = jnp.float32
    wdt = wqkv_ref.dtype                      # matmul operand dtype (f32 / bf16)

    def layer_norm(y, w, b):                  # f32 VPU/EUP math on all chips
        mu = jnp.mean(y, axis=-1, keepdims=True)
        var = jnp.mean((y - mu) ** 2, axis=-1, keepdims=True)
        return (y - mu) * jax.lax.rsqrt(var + 1e-5) * w + b

    x = x_ref[...].astype(f32)                # (BT, E), one dense grid step

    for l in range(num_layers):               # static unroll (small L)
        wqkv = wqkv_ref[l]                    # (E, 3E)
        wol = wo_ref[l]                       # (H, dh, E)
        w1 = w1_ref[l]                        # (E, M)
        w2 = w2_ref[l]                        # (M, E)
        bqkv = bqkv_ref[l]                    # (1, 3E)
        b1 = b1_ref[l]                        # (1, M)
        be = be_ref[l]                        # (6, E) -- row slices only
        bo = be[_ROW_BO:_ROW_BO + 1]
        b2 = be[_ROW_B2:_ROW_B2 + 1]
        ln1w = be[_ROW_LN1W:_ROW_LN1W + 1]
        ln1b = be[_ROW_LN1B:_ROW_LN1B + 1]
        ln2w = be[_ROW_LN2W:_ROW_LN2W + 1]
        ln2b = be[_ROW_LN2B:_ROW_LN2B + 1]

        # ---- fused QKV projection: one (B*T, E) @ (E, 3E) MXU push ----
        qkv = jnp.dot(x.astype(wdt), wqkv, preferred_element_type=f32) + bqkv
        qkv3 = qkv.reshape(B, T, 3 * E)       # leading-dim split only (T % 8 == 0)

        # ---- multi-head attention: batched 3-D einsums per head; output
        #      projection accumulated per head (no H-way lane concat) ----
        attn = jnp.zeros((BT, E), f32)
        for h in range(H):
            qh = qkv3[:, :, h * dh:(h + 1) * dh]                     # (B, T, dh)
            kh = qkv3[:, :, E + h * dh:E + (h + 1) * dh]
            vh = qkv3[:, :, 2 * E + h * dh:2 * E + (h + 1) * dh]
            s = jnp.einsum('bqd,bkd->bqk', qh, kh,
                           preferred_element_type=f32) * scale       # (B, T, T)
            s = s - jnp.max(s, axis=-1, keepdims=True)
            p = jnp.exp(s)
            p = p * pl.reciprocal(jnp.sum(p, axis=-1, keepdims=True), approx=True)
            oh = jnp.einsum('bqk,bkd->bqd', p, vh,
                            preferred_element_type=f32)              # (B, T, dh)
            attn = attn + jnp.dot(oh.reshape(BT, dh).astype(wdt), wol[h],
                                  preferred_element_type=f32)        # (BT, E)
        attn = attn + bo

        # ---- post-LN #1, feed-forward (ReLU), post-LN #2 ----
        h1 = layer_norm(x + attn, ln1w, ln1b)
        ff = jnp.maximum(
            jnp.dot(h1.astype(wdt), w1, preferred_element_type=f32) + b1, 0.0)
        ff = jnp.dot(ff.astype(wdt), w2, preferred_element_type=f32) + b2
        x = layer_norm(h1 + ff, ln2w, ln2b)

    # ---- final output projection into a lane-dense (128-padded) slab ----
    out_ref[...] = (jnp.dot(x.astype(wdt), outw_ref[...],
                            preferred_element_type=f32)
                    + outb_ref[...]).astype(out_ref.dtype)


# -----------------------------------------------------------------------------
# pallas_call wrapper
# -----------------------------------------------------------------------------
def mae_decoder_pallas(x, packed, *, num_heads):
    """x: (B, T, E) float32 -> (B, T, P) float32, whole decoder in one kernel."""
    B, T, E = x.shape
    L = packed['wqkv'].shape[0]
    PADP = packed['out_w'].shape[1]
    P = packed['out_dim']
    BT = B * T
    assert BT % 8 == 0, "batch*seq must be a sublane multiple (pad T if needed)"

    weights = (packed['wqkv'], packed['wo'], packed['w1'], packed['w2'],
               packed['bqkv'], packed['b1'], packed['bias_e'],
               packed['out_w'], packed['out_b'])

    # Fold the batch into the GEMM row dimension outside the kernel.
    x_flat = x.reshape(BT, E)

    def const_spec(arr):
        n = arr.ndim
        return pl.BlockSpec(arr.shape, lambda i, n=n: (0,) * n)

    in_specs = [pl.BlockSpec((BT, E), lambda i: (0, 0))]
    in_specs += [const_spec(w) for w in weights]

    def padded_bytes(a):
        s = list(a.shape)
        s[-1] = -(-s[-1] // 128) * 128
        if len(s) >= 2:
            s[-2] = -(-s[-2] // 8) * 8
        n = 1
        for d in s:
            n *= d
        return n * a.dtype.itemsize

    need = sum(padded_bytes(a) for a in (x_flat,) + weights) + BT * PADP * 4
    # Generation-safe cap: <= 48 MiB fits v5e/v6e/v7x physical VMEM with
    # headroom; >= 32 MiB so compiler scratch is never under-provisioned.
    vmem_limit = int(min(48 << 20, max(32 << 20, 2 * need + (8 << 20))))

    kernel = functools.partial(_mae_decoder_kernel, batch=B,
                               num_layers=L, num_heads=num_heads)
    out = pl.pallas_call(
        kernel,
        out_shape=jax.ShapeDtypeStruct((BT, PADP), jnp.float32),
        grid=(1,),                       # single dense step: weights DMA'd once
        in_specs=in_specs,
        out_specs=pl.BlockSpec((BT, PADP), lambda i: (0, 0)),
        compiler_params=pltpu.CompilerParams(
            dimension_semantics=("arbitrary",),
            vmem_limit_bytes=vmem_limit),
    )(x_flat, *weights)
    return out.reshape(B, T, PADP)[:, :, :P]


# -----------------------------------------------------------------------------
# Parameters / packing / glue
# -----------------------------------------------------------------------------
def make_positional_encoding(d_model, max_len):
    position = jnp.arange(max_len, dtype=jnp.float32)[:, None]
    div_term = jnp.exp(jnp.arange(0, d_model, 2, dtype=jnp.float32)
                       * (-math.log(10000.0) / d_model))
    pe = jnp.zeros((max_len, d_model), jnp.float32)
    pe = pe.at[:, 0::2].set(jnp.sin(position * div_term))
    pe = pe.at[:, 1::2].set(jnp.cos(position * div_term))
    return pe                                                    # (max_len, d_model)


def init_params(key, embed_dim, num_heads, num_layers, mlp_dim,
                output_patch_dim, max_total_patches):
    del num_heads
    keys = jax.random.split(key, 2 + num_layers)
    params = {
        'mask_token': jax.random.normal(keys[0], (1, 1, embed_dim), jnp.float32),
        'pe': make_positional_encoding(embed_dim, max_total_patches),
        'layers': [],
    }
    scale = 0.05
    for l in range(num_layers):
        lk = jax.random.split(keys[2 + l], 10)
        layer = {
            # projection weights stored already transposed: (in, out)
            'wq': jax.random.normal(lk[0], (embed_dim, embed_dim), jnp.float32) * scale,
            'wk': jax.random.normal(lk[1], (embed_dim, embed_dim), jnp.float32) * scale,
            'wv': jax.random.normal(lk[2], (embed_dim, embed_dim), jnp.float32) * scale,
            'bq': jax.random.normal(lk[3], (1, embed_dim), jnp.float32) * scale,
            'bk': jax.random.normal(lk[4], (1, embed_dim), jnp.float32) * scale,
            'bv': jax.random.normal(lk[5], (1, embed_dim), jnp.float32) * scale,
            'wo': jax.random.normal(lk[6], (embed_dim, embed_dim), jnp.float32) * scale,
            'bo': jnp.zeros((1, embed_dim), jnp.float32),
            'w1': jax.random.normal(lk[7], (embed_dim, mlp_dim), jnp.float32) * scale,
            'b1': jnp.zeros((1, mlp_dim), jnp.float32),
            'w2': jax.random.normal(lk[8], (mlp_dim, embed_dim), jnp.float32) * scale,
            'b2': jnp.zeros((1, embed_dim), jnp.float32),
            'ln1_w': jnp.ones((1, embed_dim), jnp.float32),
            'ln1_b': jnp.zeros((1, embed_dim), jnp.float32),
            'ln2_w': jnp.ones((1, embed_dim), jnp.float32),
            'ln2_b': jnp.zeros((1, embed_dim), jnp.float32),
        }
        params['layers'].append(layer)
    ok = jax.random.split(keys[1], 2)
    params['out_w'] = jax.random.normal(ok[0], (embed_dim, output_patch_dim),
                                        jnp.float32) * scale
    params['out_b'] = jax.random.normal(ok[1], (1, output_patch_dim),
                                        jnp.float32) * scale
    return params


def pack_decoder_params(params, embed_dim, mlp_dim, num_heads, output_patch_dim,
                        matmul_dtype=MATMUL_DTYPE):
    """Pack per-layer params into a few stacked slabs for the fused kernel."""
    E, M, H, P = embed_dim, mlp_dim, num_heads, output_patch_dim
    dh = E // H
    padp = ((P + 127) // 128) * 128                # lane-dense output slab

    wqkv, wo_h, w1, w2 = [], [], [], []
    bqkv, b1, bias_e = [], [], []
    for p in params['layers']:
        wqkv.append(jnp.concatenate([p['wq'], p['wk'], p['wv']], axis=1))  # (E, 3E)
        wo_h.append(p['wo'].reshape(H, dh, E))                             # (H, dh, E)
        w1.append(p['w1'])
        w2.append(p['w2'])
        bqkv.append(jnp.concatenate([p['bq'], p['bk'], p['bv']], axis=1))  # (1, 3E)
        b1.append(p['b1'])                                                 # (1, M)
        bias_e.append(jnp.stack([p['bo'][0], p['b2'][0],
                                 p['ln1_w'][0], p['ln1_b'][0],
                                 p['ln2_w'][0], p['ln2_b'][0]], axis=0))   # (6, E)

    out_w = jnp.pad(params['out_w'], ((0, 0), (0, padp - P)))
    out_b = jnp.pad(params['out_b'], ((0, 0), (0, padp - P)))

    return {
        'wqkv': jnp.stack(wqkv).astype(matmul_dtype),   # (L, E, 3E)
        'wo': jnp.stack(wo_h).astype(matmul_dtype),     # (L, H, dh, E)
        'w1': jnp.stack(w1).astype(matmul_dtype),       # (L, E, M)
        'w2': jnp.stack(w2).astype(matmul_dtype),       # (L, M, E)
        'bqkv': jnp.stack(bqkv),                        # (L, 1, 3E)
        'b1': jnp.stack(b1),                            # (L, 1, M)
        'bias_e': jnp.stack(bias_e),                    # (L, 6, E)
        'out_w': out_w.astype(matmul_dtype),            # (E, padp)
        'out_b': out_b,                                 # (1, padp)
        'out_dim': P,
    }


def mae_decoder_forward(params, unmasked_features, unmasked_indices, masked_indices,
                        total_patches, num_heads, num_layers):
    """Pallas-backed forward pass of MAEDecoder (eval mode)."""
    B, num_unmasked, E = unmasked_features.shape
    num_masked = masked_indices.shape[1]
    assert num_unmasked + num_masked == total_patches
    assert total_patches <= params['pe'].shape[0]
    del num_layers  # encoded in the packed slabs

    # full_sequence_embed = mask_token everywhere, scatter unmasked features (glue).
    mask_tok = params['mask_token'][0, 0]                         # (E,)

    def scatter_one(idx, feat):
        base = jnp.broadcast_to(mask_tok, (total_patches, E))
        return base.at[idx].set(feat)

    full = jax.vmap(scatter_one)(unmasked_indices, unmasked_features)   # (B, T, E)

    # Positional encoding add; dropout is identity in eval mode.
    x = (full + params['pe'][:total_patches][None, :, :]).astype(jnp.float32)

    # Fused transformer stack + output projection: a single Pallas kernel.
    return mae_decoder_pallas(x, params['packed'], num_heads=num_heads)


# -----------------------------------------------------------------------------
# Pure-JAX reference (numerical sanity check)
# -----------------------------------------------------------------------------
def _ref_layer(x, p, num_heads):
    E = x.shape[-1]
    dh = E // num_heads
    q = x @ p['wq'] + p['bq']
    k = x @ p['wk'] + p['bk']
    v = x @ p['wv'] + p['bv']
    heads = []
    for h in range(num_heads):
        qh = q[..., h * dh:(h + 1) * dh]
        kh = k[..., h * dh:(h + 1) * dh]
        vh = v[..., h * dh:(h + 1) * dh]
        s = jnp.einsum('btd,bsd->bts', qh, kh) / math.sqrt(dh)
        a = jax.nn.softmax(s, axis=-1)
        heads.append(jnp.einsum('bts,bsd->btd', a, vh))
    attn = jnp.concatenate(heads, axis=-1) @ p['wo'] + p['bo']

    def ln(y, w, b):
        mu = y.mean(-1, keepdims=True)
        var = ((y - mu) ** 2).mean(-1, keepdims=True)
        return (y - mu) / jnp.sqrt(var + 1e-5) * w + b

    h1 = ln(x + attn, p['ln1_w'], p['ln1_b'])
    ff = jnp.maximum(h1 @ p['w1'] + p['b1'], 0.0) @ p['w2'] + p['b2']
    return ln(h1 + ff, p['ln2_w'], p['ln2_b'])


def reference_forward(params, unmasked_features, unmasked_indices, masked_indices,
                      total_patches, num_heads, num_layers):
    B, _, E = unmasked_features.shape
    mask_tok = params['mask_token'][0, 0]

    def scatter_one(idx, feat):
        return jnp.broadcast_to(mask_tok, (total_patches, E)).at[idx].set(feat)

    x = jax.vmap(scatter_one)(unmasked_indices, unmasked_features)
    x = x + params['pe'][:total_patches][None, :, :]
    for l in range(num_layers):
        x = _ref_layer(x, params['layers'][l], num_heads)
    return x @ params['out_w'] + params['out_b']


# -----------------------------------------------------------------------------
# main
# -----------------------------------------------------------------------------
if __name__ == "__main__":
    # Small config consistent with the module's constructor.
    embed_dim = 32
    num_heads = 4
    num_decoder_layers = 2
    mlp_dim = 64
    output_patch_dim = 48
    max_total_patches = 64

    batch = 2
    total_patches = 16
    num_unmasked = 6
    num_masked = total_patches - num_unmasked

    root = jax.random.PRNGKey(0)
    k_params, k_feat, k_idx = jax.random.split(root, 3)

    params = init_params(k_params, embed_dim, num_heads, num_decoder_layers,
                         mlp_dim, output_patch_dim, max_total_patches)
    params['packed'] = pack_decoder_params(params, embed_dim, mlp_dim,
                                           num_heads, output_patch_dim)

    unmasked_features = jax.random.normal(
        k_feat, (batch, num_unmasked, embed_dim), jnp.float32)

    perms = jnp.stack([jax.random.permutation(k, total_patches)
                       for k in jax.random.split(k_idx, batch)]).astype(jnp.int32)
    unmasked_indices = perms[:, :num_unmasked]
    masked_indices = perms[:, num_unmasked:]

    out = mae_decoder_forward(params, unmasked_features, unmasked_indices,
                              masked_indices, total_patches, num_heads,
                              num_decoder_layers)
    out = jax.block_until_ready(out)
    assert out.shape == (batch, total_patches, output_patch_dim), out.shape

    ref = reference_forward(params, unmasked_features, unmasked_indices,
                            masked_indices, total_patches, num_heads,
                            num_decoder_layers)
    ref = jax.block_until_ready(ref)
    # Tolerance covers the EUP approximate reciprocal in the softmax (all
    # matmuls are f32 with f32 accumulation otherwise).
    err = float(jnp.max(jnp.abs(out - ref)))
    assert err < 2e-2, err

    print("KERNEL_OK")
</pallas_src>

<mosaic_0001>
module attributes {stable_mosaic.version = 11 : i64} {
  func.func @_mae_decoder_kernel(%arg0: i32, %arg1: memref<32x32xf32, #tpu.memory_space<vmem>>, %arg2: memref<2x32x96xf32, #tpu.memory_space<vmem>>, %arg3: memref<2x4x8x32xf32, #tpu.memory_space<vmem>>, %arg4: memref<2x32x64xf32, #tpu.memory_space<vmem>>, %arg5: memref<2x64x32xf32, #tpu.memory_space<vmem>>, %arg6: memref<2x1x96xf32, #tpu.memory_space<vmem>>, %arg7: memref<2x1x64xf32, #tpu.memory_space<vmem>>, %arg8: memref<2x6x32xf32, #tpu.memory_space<vmem>>, %arg9: memref<32x128xf32, #tpu.memory_space<vmem>>, %arg10: memref<1x128xf32, #tpu.memory_space<vmem>>, %arg11: memref<32x128xf32, #tpu.memory_space<vmem>>) attributes {dimension_semantics = [#tpu.dimension_semantics<arbitrary>], iteration_bounds = array<i64: 1>, scalar_prefetch = 0 : i64, scratch_operands = 0 : i64, tpu.core_type = #tpu.core_type<tc>, window_params = [{pipeline_mode = #tpu.pipeline_mode<synchronous>, transform_indices = @transform_0, window_bounds = array<i64: 32, 32>}, {pipeline_mode = #tpu.pipeline_mode<synchronous>, transform_indices = @transform_1, window_bounds = array<i64: 2, 32, 96>}, {pipeline_mode = #tpu.pipeline_mode<synchronous>, transform_indices = @transform_2, window_bounds = array<i64: 2, 4, 8, 32>}, {pipeline_mode = #tpu.pipeline_mode<synchronous>, transform_indices = @transform_3, window_bounds = array<i64: 2, 32, 64>}, {pipeline_mode = #tpu.pipeline_mode<synchronous>, transform_indices = @transform_4, window_bounds = array<i64: 2, 64, 32>}, {pipeline_mode = #tpu.pipeline_mode<synchronous>, transform_indices = @transform_5, window_bounds = array<i64: 2, 1, 96>}, {pipeline_mode = #tpu.pipeline_mode<synchronous>, transform_indices = @transform_6, window_bounds = array<i64: 2, 1, 64>}, {pipeline_mode = #tpu.pipeline_mode<synchronous>, transform_indices = @transform_7, window_bounds = array<i64: 2, 6, 32>}, {pipeline_mode = #tpu.pipeline_mode<synchronous>, transform_indices = @transform_8, window_bounds = array<i64: 32, 128>}, {pipeline_mode = #tpu.pipeline_mode<synchronous>, transform_indices = @transform_9, window_bounds = array<i64: 1, 128>}, {pipeline_mode = #tpu.pipeline_mode<synchronous>, transform_indices = @transform_10, window_bounds = array<i64: 32, 128>}]} {
    %c0 = arith.constant 0 : index
    %c0_0 = arith.constant 0 : index
    %0 = vector.load %arg1[%c0, %c0_0] : memref<32x32xf32, #tpu.memory_space<vmem>>, vector<32x32xf32>
    %c0_1 = arith.constant 0 : index
    %c0_2 = arith.constant 0 : index
    %c0_3 = arith.constant 0 : index
    %1 = vector.load %arg2[%c0_1, %c0_2, %c0_3] : memref<2x32x96xf32, #tpu.memory_space<vmem>>, vector<1x32x96xf32>
    %2 = vector.shape_cast %1 : vector<1x32x96xf32> to vector<32x96xf32>
    %c0_4 = arith.constant 0 : index
    %c0_5 = arith.constant 0 : index
    %c0_6 = arith.constant 0 : index
    %c0_7 = arith.constant 0 : index
    %3 = vector.load %arg3[%c0_4, %c0_5, %c0_6, %c0_7] : memref<2x4x8x32xf32, #tpu.memory_space<vmem>>, vector<1x4x8x32xf32>
    %4 = vector.shape_cast %3 : vector<1x4x8x32xf32> to vector<4x8x32xf32>
    %c0_8 = arith.constant 0 : index
    %c0_9 = arith.constant 0 : index
    %c0_10 = arith.constant 0 : index
    %5 = vector.load %arg4[%c0_8, %c0_9, %c0_10] : memref<2x32x64xf32, #tpu.memory_space<vmem>>, vector<1x32x64xf32>
    %6 = vector.shape_cast %5 : vector<1x32x64xf32> to vector<32x64xf32>
    %c0_11 = arith.constant 0 : index
    %c0_12 = arith.constant 0 : index
    %c0_13 = arith.constant 0 : index
    %7 = vector.load %arg5[%c0_11, %c0_12, %c0_13] : memref<2x64x32xf32, #tpu.memory_space<vmem>>, vector<1x64x32xf32>
    %8 = vector.shape_cast %7 : vector<1x64x32xf32> to vector<64x32xf32>
    %c0_14 = arith.constant 0 : index
    %c0_15 = arith.constant 0 : index
    %c0_16 = arith.constant 0 : index
    %9 = vector.load %arg6[%c0_14, %c0_15, %c0_16] : memref<2x1x96xf32, #tpu.memory_space<vmem>>, vector<1x1x96xf32>
    %10 = vector.shape_cast %9 : vector<1x1x96xf32> to vector<1x96xf32>
    %c0_17 = arith.constant 0 : index
    %c0_18 = arith.constant 0 : index
    %c0_19 = arith.constant 0 : index
    %11 = vector.load %arg7[%c0_17, %c0_18, %c0_19] : memref<2x1x64xf32, #tpu.memory_space<vmem>>, vector<1x1x64xf32>
    %12 = vector.shape_cast %11 : vector<1x1x64xf32> to vector<1x64xf32>
    %c0_20 = arith.constant 0 : index
    %c0_21 = arith.constant 0 : index
    %c0_22 = arith.constant 0 : index
    %13 = vector.load %arg8[%c0_20, %c0_21, %c0_22] : memref<2x6x32xf32, #tpu.memory_space<vmem>>, vector<1x6x32xf32>
    %14 = vector.shape_cast %13 : vector<1x6x32xf32> to vector<6x32xf32>
    %15 = vector.extract_strided_slice %14 {offsets = [0, 0], sizes = [1, 32], strides = [1, 1]} : vector<6x32xf32> to vector<1x32xf32>
    %16 = vector.extract_strided_slice %14 {offsets = [1, 0], sizes = [1, 32], strides = [1, 1]} : vector<6x32xf32> to vector<1x32xf32>
    %17 = vector.extract_strided_slice %14 {offsets = [2, 0], sizes = [1, 32], strides = [1, 1]} : vector<6x32xf32> to vector<1x32xf32>
    %18 = vector.extract_strided_slice %14 {offsets = [3, 0], sizes = [1, 32], strides = [1, 1]} : vector<6x32xf32> to vector<1x32xf32>
    %19 = vector.extract_strided_slice %14 {offsets = [4, 0], sizes = [1, 32], strides = [1, 1]} : vector<6x32xf32> to vector<1x32xf32>
    %20 = vector.extract_strided_slice %14 {offsets = [5, 0], sizes = [1, 32], strides = [1, 1]} : vector<6x32xf32> to vector<1x32xf32>
    %cst = arith.constant dense<0.000000e+00> : vector<32x96xf32>
    %21 = tpu.matmul %0, %2, %cst {dimension_numbers = #tpu.dot_dimension_numbers<[1], [0], [0], [1], [0, 0, 1, 1], [], []>} : vector<32x32xf32>, vector<32x96xf32>, vector<32x96xf32> -> vector<32x96xf32>
    %22 = vector.broadcast %10 : vector<1x96xf32> to vector<32x96xf32>
    %23 = arith.addf %21, %22 : vector<32x96xf32>
    %24 = vector.shape_cast %23 : vector<32x96xf32> to vector<2x16x96xf32>
    %cst_23 = arith.constant 0.000000e+00 : f32
    %25 = vector.broadcast %cst_23 : f32 to vector<32x32xf32>
    %26 = vector.extract_strided_slice %24 {offsets = [0, 0, 0], sizes = [2, 16, 8], strides = [1, 1, 1]} : vector<2x16x96xf32> to vector<2x16x8xf32>
    %27 = vector.extract_strided_slice %24 {offsets = [0, 0, 32], sizes = [2, 16, 8], strides = [1, 1, 1]} : vector<2x16x96xf32> to vector<2x16x8xf32>
    %28 = vector.extract_strided_slice %24 {offsets = [0, 0, 64], sizes = [2, 16, 8], strides = [1, 1, 1]} : vector<2x16x96xf32> to vector<2x16x8xf32>
    "tpu.trace_start"() <{level = 10 : i32, message = "bqd,bkd->bqk"}> : () -> ()
    %cst_24 = arith.constant dense<0.000000e+00> : vector<2x16x16xf32>
    %29 = tpu.matmul %26, %27, %cst_24 {dimension_numbers = #tpu.dot_dimension_numbers<[2], [2], [1], [1], [0, 0, 0, 1, 1, 1], [0], [0]>} : vector<2x16x8xf32>, vector<2x16x8xf32>, vector<2x16x16xf32> -> vector<2x16x16xf32>
    "tpu.trace_stop"() : () -> ()
    %cst_25 = arith.constant 0.353553385 : f32
    %30 = vector.broadcast %cst_25 : f32 to vector<2x16x16xf32>
    %31 = arith.mulf %29, %30 : vector<2x16x16xf32>
    %cst_26 = arith.constant dense<0xFF800000> : vector<2x16xf32>
    %32 = vector.multi_reduction <maximumf>, %31, %cst_26 [2] : vector<2x16x16xf32> to vector<2x16xf32>
    %33 = vector.shape_cast %32 : vector<2x16xf32> to vector<2x16x1xf32>
    %34 = vector.broadcast %33 : vector<2x16x1xf32> to vector<2x16x16xf32>
    %35 = arith.subf %31, %34 : vector<2x16x16xf32>
    %36 = math.exp %35 : vector<2x16x16xf32>
    %cst_27 = arith.constant dense<0.000000e+00> : vector<2x16xf32>
    %37 = vector.multi_reduction <add>, %36, %cst_27 [2] : vector<2x16x16xf32> to vector<2x16xf32>
    %38 = vector.shape_cast %37 : vector<2x16xf32> to vector<2x16x1xf32>
    %39 = tpu.reciprocal %38 {approx = true} : vector<2x16x1xf32> -> vector<2x16x1xf32>
    %40 = vector.broadcast %39 : vector<2x16x1xf32> to vector<2x16x16xf32>
    %41 = arith.mulf %36, %40 : vector<2x16x16xf32>
    "tpu.trace_start"() <{level = 10 : i32, message = "bqk,bkd->bqd"}> : () -> ()
    %cst_28 = arith.constant dense<0.000000e+00> : vector<2x16x8xf32>
    %42 = tpu.matmul %41, %28, %cst_28 {dimension_numbers = #tpu.dot_dimension_numbers<[2], [1], [1], [2], [0, 0, 0, 1, 1, 2], [0], [0]>} : vector<2x16x16xf32>, vector<2x16x8xf32>, vector<2x16x8xf32> -> vector<2x16x8xf32>
    "tpu.trace_stop"() : () -> ()
    %43 = vector.shape_cast %42 : vector<2x16x8xf32> to vector<32x8xf32>
    %44 = vector.extract_strided_slice %4 {offsets = [0, 0, 0], sizes = [1, 8, 32], strides = [1, 1, 1]} : vector<4x8x32xf32> to vector<1x8x32xf32>
    %45 = vector.shape_cast %44 : vector<1x8x32xf32> to vector<8x32xf32>
    %cst_29 = arith.constant dense<0.000000e+00> : vector<32x32xf32>
    %46 = tpu.matmul %43, %45, %cst_29 {dimension_numbers = #tpu.dot_dimension_numbers<[1], [0], [0], [1], [0, 0, 1, 1], [], []>} : vector<32x8xf32>, vector<8x32xf32>, vector<32x32xf32> -> vector<32x32xf32>
    %47 = arith.addf %25, %46 : vector<32x32xf32>
    %48 = vector.extract_strided_slice %24 {offsets = [0, 0, 8], sizes = [2, 16, 8], strides = [1, 1, 1]} : vector<2x16x96xf32> to vector<2x16x8xf32>
    %49 = vector.extract_strided_slice %24 {offsets = [0, 0, 40], sizes = [2, 16, 8], strides = [1, 1, 1]} : vector<2x16x96xf32> to vector<2x16x8xf32>
    %50 = vector.extract_strided_slice %24 {offsets = [0, 0, 72], sizes = [2, 16, 8], strides = [1, 1, 1]} : vector<2x16x96xf32> to vector<2x16x8xf32>
    "tpu.trace_start"() <{level = 10 : i32, message = "bqd,bkd->bqk"}> : () -> ()
    %cst_30 = arith.constant dense<0.000000e+00> : vector<2x16x16xf32>
    %51 = tpu.matmul %48, %49, %cst_30 {dimension_numbers = #tpu.dot_dimension_numbers<[2], [2], [1], [1], [0, 0, 0, 1, 1, 1], [0], [0]>} : vector<2x16x8xf32>, vector<2x16x8xf32>, vector<2x16x16xf32> -> vector<2x16x16xf32>
    "tpu.trace_stop"() : () -> ()
    %cst_31 = arith.constant 0.353553385 : f32
    %52 = vector.broadcast %cst_31 : f32 to vector<2x16x16xf32>
    %53 = arith.mulf %51, %52 : vector<2x16x16xf32>
    %cst_32 = arith.constant dense<0xFF800000> : vector<2x16xf32>
    %54 = vector.multi_reduction <maximumf>, %53, %cst_32 [2] : vector<2x16x16xf32> to vector<2x16xf32>
    %55 = vector.shape_cast %54 : vector<2x16xf32> to vector<2x16x1xf32>
    %56 = vector.broadcast %55 : vector<2x16x1xf32> to vector<2x16x16xf32>
    %57 = arith.subf %53, %56 : vector<2x16x16xf32>
    %58 = math.exp %57 : vector<2x16x16xf32>
    %cst_33 = arith.constant dense<0.000000e+00> : vector<2x16xf32>
    %59 = vector.multi_reduction <add>, %58, %cst_33 [2] : vector<2x16x16xf32> to vector<2x16xf32>
    %60 = vector.shape_cast %59 : vector<2x16xf32> to vector<2x16x1xf32>
    %61 = tpu.reciprocal %60 {approx = true} : vector<2x16x1xf32> -> vector<2x16x1xf32>
    %62 = vector.broadcast %61 : vector<2x16x1xf32> to vector<2x16x16xf32>
    %63 = arith.mulf %58, %62 : vector<2x16x16xf32>
    "tpu.trace_start"() <{level = 10 : i32, message = "bqk,bkd->bqd"}> : () -> ()
    %cst_34 = arith.constant dense<0.000000e+00> : vector<2x16x8xf32>
    %64 = tpu.matmul %63, %50, %cst_34 {dimension_numbers = #tpu.dot_dimension_numbers<[2], [1], [1], [2], [0, 0, 0, 1, 1, 2], [0], [0]>} : vector<2x16x16xf32>, vector<2x16x8xf32>, vector<2x16x8xf32> -> vector<2x16x8xf32>
    "tpu.trace_stop"() : () -> ()
    %65 = vector.shape_cast %64 : vector<2x16x8xf32> to vector<32x8xf32>
    %66 = vector.extract_strided_slice %4 {offsets = [1, 0, 0], sizes = [1, 8, 32], strides = [1, 1, 1]} : vector<4x8x32xf32> to vector<1x8x32xf32>
    %67 = vector.shape_cast %66 : vector<1x8x32xf32> to vector<8x32xf32>
    %cst_35 = arith.constant dense<0.000000e+00> : vector<32x32xf32>
    %68 = tpu.matmul %65, %67, %cst_35 {dimension_numbers = #tpu.dot_dimension_numbers<[1], [0], [0], [1], [0, 0, 1, 1], [], []>} : vector<32x8xf32>, vector<8x32xf32>, vector<32x32xf32> -> vector<32x32xf32>
    %69 = arith.addf %47, %68 : vector<32x32xf32>
    %70 = vector.extract_strided_slice %24 {offsets = [0, 0, 16], sizes = [2, 16, 8], strides = [1, 1, 1]} : vector<2x16x96xf32> to vector<2x16x8xf32>
    %71 = vector.extract_strided_slice %24 {offsets = [0, 0, 48], sizes = [2, 16, 8], strides = [1, 1, 1]} : vector<2x16x96xf32> to vector<2x16x8xf32>
    %72 = vector.extract_strided_slice %24 {offsets = [0, 0, 80], sizes = [2, 16, 8], strides = [1, 1, 1]} : vector<2x16x96xf32> to vector<2x16x8xf32>
    "tpu.trace_start"() <{level = 10 : i32, message = "bqd,bkd->bqk"}> : () -> ()
    %cst_36 = arith.constant dense<0.000000e+00> : vector<2x16x16xf32>
    %73 = tpu.matmul %70, %71, %cst_36 {dimension_numbers = #tpu.dot_dimension_numbers<[2], [2], [1], [1], [0, 0, 0, 1, 1, 1], [0], [0]>} : vector<2x16x8xf32>, vector<2x16x8xf32>, vector<2x16x16xf32> -> vector<2x16x16xf32>
    "tpu.trace_stop"() : () -> ()
    %cst_37 = arith.constant 0.353553385 : f32
    %74 = vector.broadcast %cst_37 : f32 to vector<2x16x16xf32>
    %75 = arith.mulf %73, %74 : vector<2x16x16xf32>
    %cst_38 = arith.constant dense<0xFF800000> : vector<2x16xf32>
    %76 = vector.multi_reduction <maximumf>, %75, %cst_38 [2] : vector<2x16x16xf32> to vector<2x16xf32>
    %77 = vector.shape_cast %76 : vector<2x16xf32> to vector<2x16x1xf32>
    %78 = vector.broadcast %77 : vector<2x16x1xf32> to vector<2x16x16xf32>
    %79 = arith.subf %75, %78 : vector<2x16x16xf32>
    %80 = math.exp %79 : vector<2x16x16xf32>
    %cst_39 = arith.constant dense<0.000000e+00> : vector<2x16xf32>
    %81 = vector.multi_reduction <add>, %80, %cst_39 [2] : vector<2x16x16xf32> to vector<2x16xf32>
    %82 = vector.shape_cast %81 : vector<2x16xf32> to vector<2x16x1xf32>
    %83 = tpu.reciprocal %82 {approx = true} : vector<2x16x1xf32> -> vector<2x16x1xf32>
    %84 = vector.broadcast %83 : vector<2x16x1xf32> to vector<2x16x16xf32>
    %85 = arith.mulf %80, %84 : vector<2x16x16xf32>
    "tpu.trace_start"() <{level = 10 : i32, message = "bqk,bkd->bqd"}> : () -> ()
    %cst_40 = arith.constant dense<0.000000e+00> : vector<2x16x8xf32>
    %86 = tpu.matmul %85, %72, %cst_40 {dimension_numbers = #tpu.dot_dimension_numbers<[2], [1], [1], [2], [0, 0, 0, 1, 1, 2], [0], [0]>} : vector<2x16x16xf32>, vector<2x16x8xf32>, vector<2x16x8xf32> -> vector<2x16x8xf32>
    "tpu.trace_stop"() : () -> ()
    %87 = vector.shape_cast %86 : vector<2x16x8xf32> to vector<32x8xf32>
    %88 = vector.extract_strided_slice %4 {offsets = [2, 0, 0], sizes = [1, 8, 32], strides = [1, 1, 1]} : vector<4x8x32xf32> to vector<1x8x32xf32>
    %89 = vector.shape_cast %88 : vector<1x8x32xf32> to vector<8x32xf32>
    %cst_41 = arith.constant dense<0.000000e+00> : vector<32x32xf32>
    %90 = tpu.matmul %87, %89, %cst_41 {dimension_numbers = #tpu.dot_dimension_numbers<[1], [0], [0], [1], [0, 0, 1, 1], [], []>} : vector<32x8xf32>, vector<8x32xf32>, vector<32x32xf32> -> vector<32x32xf32>
    %91 = arith.addf %69, %90 : vector<32x32xf32>
    %92 = vector.extract_strided_slice %24 {offsets = [0, 0, 24], sizes = [2, 16, 8], strides = [1, 1, 1]} : vector<2x16x96xf32> to vector<2x16x8xf32>
    %93 = vector.extract_strided_slice %24 {offsets = [0, 0, 56], sizes = [2, 16, 8], strides = [1, 1, 1]} : vector<2x16x96xf32> to vector<2x16x8xf32>
    %94 = vector.extract_strided_slice %24 {offsets = [0, 0, 88], sizes = [2, 16, 8], strides = [1, 1, 1]} : vector<2x16x96xf32> to vector<2x16x8xf32>
    "tpu.trace_start"() <{level = 10 : i32, message = "bqd,bkd->bqk"}> : () -> ()
    %cst_42 = arith.constant dense<0.000000e+00> : vector<2x16x16xf32>
    %95 = tpu.matmul %92, %93, %cst_42 {dimension_numbers = #tpu.dot_dimension_numbers<[2], [2], [1], [1], [0, 0, 0, 1, 1, 1], [0], [0]>} : vector<2x16x8xf32>, vector<2x16x8xf32>, vector<2x16x16xf32> -> vector<2x16x16xf32>
    "tpu.trace_stop"() : () -> ()
    %cst_43 = arith.constant 0.353553385 : f32
    %96 = vector.broadcast %cst_43 : f32 to vector<2x16x16xf32>
    %97 = arith.mulf %95, %96 : vector<2x16x16xf32>
    %cst_44 = arith.constant dense<0xFF800000> : vector<2x16xf32>
    %98 = vector.multi_reduction <maximumf>, %97, %cst_44 [2] : vector<2x16x16xf32> to vector<2x16xf32>
    %99 = vector.shape_cast %98 : vector<2x16xf32> to vector<2x16x1xf32>
    %100 = vector.broadcast %99 : vector<2x16x1xf32> to vector<2x16x16xf32>
    %101 = arith.subf %97, %100 : vector<2x16x16xf32>
    %102 = math.exp %101 : vector<2x16x16xf32>
    %cst_45 = arith.constant dense<0.000000e+00> : vector<2x16xf32>
    %103 = vector.multi_reduction <add>, %102, %cst_45 [2] : vector<2x16x16xf32> to vector<2x16xf32>
    %104 = vector.shape_cast %103 : vector<2x16xf32> to vector<2x16x1xf32>
    %105 = tpu.reciprocal %104 {approx = true} : vector<2x16x1xf32> -> vector<2x16x1xf32>
    %106 = vector.broadcast %105 : vector<2x16x1xf32> to vector<2x16x16xf32>
    %107 = arith.mulf %102, %106 : vector<2x16x16xf32>
    "tpu.trace_start"() <{level = 10 : i32, message = "bqk,bkd->bqd"}> : () -> ()
    %cst_46 = arith.constant dense<0.000000e+00> : vector<2x16x8xf32>
    %108 = tpu.matmul %107, %94, %cst_46 {dimension_numbers = #tpu.dot_dimension_numbers<[2], [1], [1], [2], [0, 0, 0, 1, 1, 2], [0], [0]>} : vector<2x16x16xf32>, vector<2x16x8xf32>, vector<2x16x8xf32> -> vector<2x16x8xf32>
    "tpu.trace_stop"() : () -> ()
    %109 = vector.shape_cast %108 : vector<2x16x8xf32> to vector<32x8xf32>
    %110 = vector.extract_strided_slice %4 {offsets = [3, 0, 0], sizes = [1, 8, 32], strides = [1, 1, 1]} : vector<4x8x32xf32> to vector<1x8x32xf32>
    %111 = vector.shape_cast %110 : vector<1x8x32xf32> to vector<8x32xf32>
    %cst_47 = arith.constant dense<0.000000e+00> : vector<32x32xf32>
    %112 = tpu.matmul %109, %111, %cst_47 {dimension_numbers = #tpu.dot_dimension_numbers<[1], [0], [0], [1], [0, 0, 1, 1], [], []>} : vector<32x8xf32>, vector<8x32xf32>, vector<32x32xf32> -> vector<32x32xf32>
    %113 = arith.addf %91, %112 : vector<32x32xf32>
    %114 = vector.broadcast %15 : vector<1x32xf32> to vector<32x32xf32>
    %115 = arith.addf %113, %114 : vector<32x32xf32>
    %116 = arith.addf %0, %115 : vector<32x32xf32>
    %cst_48 = arith.constant dense<0.000000e+00> : vector<32xf32>
    %117 = vector.multi_reduction <add>, %116, %cst_48 [1] : vector<32x32xf32> to vector<32xf32>
    %118 = vector.shape_cast %117 : vector<32xf32> to vector<32x1xf32>
    %cst_49 = arith.constant 3.200000e+01 : f32
    %119 = vector.broadcast %cst_49 : f32 to vector<32x1xf32>
    %120 = arith.divf %118, %119 : vector<32x1xf32>
    %121 = vector.broadcast %120 : vector<32x1xf32> to vector<32x32xf32>
    %122 = arith.subf %116, %121 : vector<32x32xf32>
    %123 = arith.mulf %122, %122 : vector<32x32xf32>
    %cst_50 = arith.constant dense<0.000000e+00> : vector<32xf32>
    %124 = vector.multi_reduction <add>, %123, %cst_50 [1] : vector<32x32xf32> to vector<32xf32>
    %125 = vector.shape_cast %124 : vector<32xf32> to vector<32x1xf32>
    %cst_51 = arith.constant 3.200000e+01 : f32
    %126 = vector.broadcast %cst_51 : f32 to vector<32x1xf32>
    %127 = arith.divf %125, %126 : vector<32x1xf32>
    %128 = vector.broadcast %120 : vector<32x1xf32> to vector<32x32xf32>
    %129 = arith.subf %116, %128 : vector<32x32xf32>
    %cst_52 = arith.constant 9.99999974E-6 : f32
    %130 = vector.broadcast %cst_52 : f32 to vector<32x1xf32>
    %131 = arith.addf %127, %130 : vector<32x1xf32>
    %132 = math.rsqrt %131 : vector<32x1xf32>
    %133 = vector.broadcast %132 : vector<32x1xf32> to vector<32x32xf32>
    %134 = arith.mulf %129, %133 : vector<32x32xf32>
    %135 = vector.broadcast %17 : vector<1x32xf32> to vector<32x32xf32>
    %136 = arith.mulf %134, %135 : vector<32x32xf32>
    %137 = vector.broadcast %18 : vector<1x32xf32> to vector<32x32xf32>
    %138 = arith.addf %136, %137 : vector<32x32xf32>
    %cst_53 = arith.constant dense<0.000000e+00> : vector<32x64xf32>
    %139 = tpu.matmul %138, %6, %cst_53 {dimension_numbers = #tpu.dot_dimension_numbers<[1], [0], [0], [1], [0, 0, 1, 1], [], []>} : vector<32x32xf32>, vector<32x64xf32>, vector<32x64xf32> -> vector<32x64xf32>
    %140 = vector.broadcast %12 : vector<1x64xf32> to vector<32x64xf32>
    %141 = arith.addf %139, %140 : vector<32x64xf32>
    %cst_54 = arith.constant 0.000000e+00 : f32
    %142 = vector.broadcast %cst_54 : f32 to vector<32x64xf32>
    %143 = arith.maximumf %141, %142 : vector<32x64xf32>
    %cst_55 = arith.constant dense<0.000000e+00> : vector<32x32xf32>
    %144 = tpu.matmul %143, %8, %cst_55 {dimension_numbers = #tpu.dot_dimension_numbers<[1], [0], [0], [1], [0, 0, 1, 1], [], []>} : vector<32x64xf32>, vector<64x32xf32>, vector<32x32xf32> -> vector<32x32xf32>
    %145 = vector.broadcast %16 : vector<1x32xf32> to vector<32x32xf32>
    %146 = arith.addf %144, %145 : vector<32x32xf32>
    %147 = arith.addf %138, %146 : vector<32x32xf32>
    %cst_56 = arith.constant dense<0.000000e+00> : vector<32xf32>
    %148 = vector.multi_reduction <add>, %147, %cst_56 [1] : vector<32x32xf32> to vector<32xf32>
    %149 = vector.shape_cast %148 : vector<32xf32> to vector<32x1xf32>
    %cst_57 = arith.constant 3.200000e+01 : f32
    %150 = vector.broadcast %cst_57 : f32 to vector<32x1xf32>
    %151 = arith.divf %149, %150 : vector<32x1xf32>
    %152 = vector.broadcast %151 : vector<32x1xf32> to vector<32x32xf32>
    %153 = arith.subf %147, %152 : vector<32x32xf32>
    %154 = arith.mulf %153, %153 : vector<32x32xf32>
    %cst_58 = arith.constant dense<0.000000e+00> : vector<32xf32>
    %155 = vector.multi_reduction <add>, %154, %cst_58 [1] : vector<32x32xf32> to vector<32xf32>
    %156 = vector.shape_cast %155 : vector<32xf32> to vector<32x1xf32>
    %cst_59 = arith.constant 3.200000e+01 : f32
    %157 = vector.broadcast %cst_59 : f32 to vector<32x1xf32>
    %158 = arith.divf %156, %157 : vector<32x1xf32>
    %159 = vector.broadcast %151 : vector<32x1xf32> to vector<32x32xf32>
    %160 = arith.subf %147, %159 : vector<32x32xf32>
    %cst_60 = arith.constant 9.99999974E-6 : f32
    %161 = vector.broadcast %cst_60 : f32 to vector<32x1xf32>
    %162 = arith.addf %158, %161 : vector<32x1xf32>
    %163 = math.rsqrt %162 : vector<32x1xf32>
    %164 = vector.broadcast %163 : vector<32x1xf32> to vector<32x32xf32>
    %165 = arith.mulf %160, %164 : vector<32x32xf32>
    %166 = vector.broadcast %19 : vector<1x32xf32> to vector<32x32xf32>
    %167 = arith.mulf %165, %166 : vector<32x32xf32>
    %168 = vector.broadcast %20 : vector<1x32xf32> to vector<32x32xf32>
    %169 = arith.addf %167, %168 : vector<32x32xf32>
    %c1 = arith.constant 1 : index
    %c0_61 = arith.constant 0 : index
    %c0_62 = arith.constant 0 : index
    %170 = vector.load %arg2[%c1, %c0_61, %c0_62] : memref<2x32x96xf32, #tpu.memory_space<vmem>>, vector<1x32x96xf32>
    %171 = vector.shape_cast %170 : vector<1x32x96xf32> to vector<32x96xf32>
    %c1_63 = arith.constant 1 : index
    %c0_64 = arith.constant 0 : index
    %c0_65 = arith.constant 0 : index
    %c0_66 = arith.constant 0 : index
    %172 = vector.load %arg3[%c1_63, %c0_64, %c0_65, %c0_66] : memref<2x4x8x32xf32, #tpu.memory_space<vmem>>, vector<1x4x8x32xf32>
    %173 = vector.shape_cast %172 : vector<1x4x8x32xf32> to vector<4x8x32xf32>
    %c1_67 = arith.constant 1 : index
    %c0_68 = arith.constant 0 : index
    %c0_69 = arith.constant 0 : index
    %174 = vector.load %arg4[%c1_67, %c0_68, %c0_69] : memref<2x32x64xf32, #tpu.memory_space<vmem>>, vector<1x32x64xf32>
    %175 = vector.shape_cast %174 : vector<1x32x64xf32> to vector<32x64xf32>
    %c1_70 = arith.constant 1 : index
    %c0_71 = arith.constant 0 : index
    %c0_72 = arith.constant 0 : index
    %176 = vector.load %arg5[%c1_70, %c0_71, %c0_72] : memref<2x64x32xf32, #tpu.memory_space<vmem>>, vector<1x64x32xf32>
    %177 = vector.shape_cast %176 : vector<1x64x32xf32> to vector<64x32xf32>
    %c1_73 = arith.constant 1 : index
    %c0_74 = arith.constant 0 : index
    %c0_75 = arith.constant 0 : index
    %178 = vector.load %arg6[%c1_73, %c0_74, %c0_75] : memref<2x1x96xf32, #tpu.memory_space<vmem>>, vector<1x1x96xf32>
    %179 = vector.shape_cast %178 : vector<1x1x96xf32> to vector<1x96xf32>
    %c1_76 = arith.constant 1 : index
    %c0_77 = arith.constant 0 : index
    %c0_78 = arith.constant 0 : index
    %180 = vector.load %arg7[%c1_76, %c0_77, %c0_78] : memref<2x1x64xf32, #tpu.memory_space<vmem>>, vector<1x1x64xf32>
    %181 = vector.shape_cast %180 : vector<1x1x64xf32> to vector<1x64xf32>
    %c1_79 = arith.constant 1 : index
    %c0_80 = arith.constant 0 : index
    %c0_81 = arith.constant 0 : index
    %182 = vector.load %arg8[%c1_79, %c0_80, %c0_81] : memref<2x6x32xf32, #tpu.memory_space<vmem>>, vector<1x6x32xf32>
    %183 = vector.shape_cast %182 : vector<1x6x32xf32> to vector<6x32xf32>
    %184 = vector.extract_strided_slice %183 {offsets = [0, 0], sizes = [1, 32], strides = [1, 1]} : vector<6x32xf32> to vector<1x32xf32>
    %185 = vector.extract_strided_slice %183 {offsets = [1, 0], sizes = [1, 32], strides = [1, 1]} : vector<6x32xf32> to vector<1x32xf32>
    %186 = vector.extract_strided_slice %183 {offsets = [2, 0], sizes = [1, 32], strides = [1, 1]} : vector<6x32xf32> to vector<1x32xf32>
    %187 = vector.extract_strided_slice %183 {offsets = [3, 0], sizes = [1, 32], strides = [1, 1]} : vector<6x32xf32> to vector<1x32xf32>
    %188 = vector.extract_strided_slice %183 {offsets = [4, 0], sizes = [1, 32], strides = [1, 1]} : vector<6x32xf32> to vector<1x32xf32>
    %189 = vector.extract_strided_slice %183 {offsets = [5, 0], sizes = [1, 32], strides = [1, 1]} : vector<6x32xf32> to vector<1x32xf32>
    %cst_82 = arith.constant dense<0.000000e+00> : vector<32x96xf32>
    %190 = tpu.matmul %169, %171, %cst_82 {dimension_numbers = #tpu.dot_dimension_numbers<[1], [0], [0], [1], [0, 0, 1, 1], [], []>} : vector<32x32xf32>, vector<32x96xf32>, vector<32x96xf32> -> vector<32x96xf32>
    %191 = vector.broadcast %179 : vector<1x96xf32> to vector<32x96xf32>
    %192 = arith.addf %190, %191 : vector<32x96xf32>
    %193 = vector.shape_cast %192 : vector<32x96xf32> to vector<2x16x96xf32>
    %cst_83 = arith.constant 0.000000e+00 : f32
    %194 = vector.broadcast %cst_83 : f32 to vector<32x32xf32>
    %195 = vector.extract_strided_slice %193 {offsets = [0, 0, 0], sizes = [2, 16, 8], strides = [1, 1, 1]} : vector<2x16x96xf32> to vector<2x16x8xf32>
    %196 = vector.extract_strided_slice %193 {offsets = [0, 0, 32], sizes = [2, 16, 8], strides = [1, 1, 1]} : vector<2x16x96xf32> to vector<2x16x8xf32>
    %197 = vector.extract_strided_slice %193 {offsets = [0, 0, 64], sizes = [2, 16, 8], strides = [1, 1, 1]} : vector<2x16x96xf32> to vector<2x16x8xf32>
    "tpu.trace_start"() <{level = 10 : i32, message = "bqd,bkd->bqk"}> : () -> ()
    %cst_84 = arith.constant dense<0.000000e+00> : vector<2x16x16xf32>
    %198 = tpu.matmul %195, %196, %cst_84 {dimension_numbers = #tpu.dot_dimension_numbers<[2], [2], [1], [1], [0, 0, 0, 1, 1, 1], [0], [0]>} : vector<2x16x8xf32>, vector<2x16x8xf32>, vector<2x16x16xf32> -> vector<2x16x16xf32>
    "tpu.trace_stop"() : () -> ()
    %cst_85 = arith.constant 0.353553385 : f32
    %199 = vector.broadcast %cst_85 : f32 to vector<2x16x16xf32>
    %200 = arith.mulf %198, %199 : vector<2x16x16xf32>
    %cst_86 = arith.constant dense<0xFF800000> : vector<2x16xf32>
    %201 = vector.multi_reduction <maximumf>, %200, %cst_86 [2] : vector<2x16x16xf32> to vector<2x16xf32>
    %202 = vector.shape_cast %201 : vector<2x16xf32> to vector<2x16x1xf32>
    %203 = vector.broadcast %202 : vector<2x16x1xf32> to vector<2x16x16xf32>
    %204 = arith.subf %200, %203 : vector<2x16x16xf32>
    %205 = math.exp %204 : vector<2x16x16xf32>
    %cst_87 = arith.constant dense<0.000000e+00> : vector<2x16xf32>
    %206 = vector.multi_reduction <add>, %205, %cst_87 [2] : vector<2x16x16xf32> to vector<2x16xf32>
    %207 = vector.shape_cast %206 : vector<2x16xf32> to vector<2x16x1xf32>
    %208 = tpu.reciprocal %207 {approx = true} : vector<2x16x1xf32> -> vector<2x16x1xf32>
    %209 = vector.broadcast %208 : vector<2x16x1xf32> to vector<2x16x16xf32>
    %210 = arith.mulf %205, %209 : vector<2x16x16xf32>
    "tpu.trace_start"() <{level = 10 : i32, message = "bqk,bkd->bqd"}> : () -> ()
    %cst_88 = arith.constant dense<0.000000e+00> : vector<2x16x8xf32>
    %211 = tpu.matmul %210, %197, %cst_88 {dimension_numbers = #tpu.dot_dimension_numbers<[2], [1], [1], [2], [0, 0, 0, 1, 1, 2], [0], [0]>} : vector<2x16x16xf32>, vector<2x16x8xf32>, vector<2x16x8xf32> -> vector<2x16x8xf32>
    "tpu.trace_stop"() : () -> ()
    %212 = vector.shape_cast %211 : vector<2x16x8xf32> to vector<32x8xf32>
    %213 = vector.extract_strided_slice %173 {offsets = [0, 0, 0], sizes = [1, 8, 32], strides = [1, 1, 1]} : vector<4x8x32xf32> to vector<1x8x32xf32>
    %214 = vector.shape_cast %213 : vector<1x8x32xf32> to vector<8x32xf32>
    %cst_89 = arith.constant dense<0.000000e+00> : vector<32x32xf32>
    %215 = tpu.matmul %212, %214, %cst_89 {dimension_numbers = #tpu.dot_dimension_numbers<[1], [0], [0], [1], [0, 0, 1, 1], [], []>} : vector<32x8xf32>, vector<8x32xf32>, vector<32x32xf32> -> vector<32x32xf32>
    %216 = arith.addf %194, %215 : vector<32x32xf32>
    %217 = vector.extract_strided_slice %193 {offsets = [0, 0, 8], sizes = [2, 16, 8], strides = [1, 1, 1]} : vector<2x16x96xf32> to vector<2x16x8xf32>
    %218 = vector.extract_strided_slice %193 {offsets = [0, 0, 40], sizes = [2, 16, 8], strides = [1, 1, 1]} : vector<2x16x96xf32> to vector<2x16x8xf32>
    %219 = vector.extract_strided_slice %193 {offsets = [0, 0, 72], sizes = [2, 16, 8], strides = [1, 1, 1]} : vector<2x16x96xf32> to vector<2x16x8xf32>
    "tpu.trace_start"() <{level = 10 : i32, message = "bqd,bkd->bqk"}> : () -> ()
    %cst_90 = arith.constant dense<0.000000e+00> : vector<2x16x16xf32>
    %220 = tpu.matmul %217, %218, %cst_90 {dimension_numbers = #tpu.dot_dimension_numbers<[2], [2], [1], [1], [0, 0, 0, 1, 1, 1], [0], [0]>} : vector<2x16x8xf32>, vector<2x16x8xf32>, vector<2x16x16xf32> -> vector<2x16x16xf32>
    "tpu.trace_stop"() : () -> ()
    %cst_91 = arith.constant 0.353553385 : f32
    %221 = vector.broadcast %cst_91 : f32 to vector<2x16x16xf32>
    %222 = arith.mulf %220, %221 : vector<2x16x16xf32>
    %cst_92 = arith.constant dense<0xFF800000> : vector<2x16xf32>
    %223 = vector.multi_reduction <maximumf>, %222, %cst_92 [2] : vector<2x16x16xf32> to vector<2x16xf32>
    %224 = vector.shape_cast %223 : vector<2x16xf32> to vector<2x16x1xf32>
    %225 = vector.broadcast %224 : vector<2x16x1xf32> to vector<2x16x16xf32>
    %226 = arith.subf %222, %225 : vector<2x16x16xf32>
    %227 = math.exp %226 : vector<2x16x16xf32>
    %cst_93 = arith.constant dense<0.000000e+00> : vector<2x16xf32>
    %228 = vector.multi_reduction <add>, %227, %cst_93 [2] : vector<2x16x16xf32> to vector<2x16xf32>
    %229 = vector.shape_cast %228 : vector<2x16xf32> to vector<2x16x1xf32>
    %230 = tpu.reciprocal %229 {approx = true} : vector<2x16x1xf32> -> vector<2x16x1xf32>
    %231 = vector.broadcast %230 : vector<2x16x1xf32> to vector<2x16x16xf32>
    %232 = arith.mulf %227, %231 : vector<2x16x16xf32>
    "tpu.trace_start"() <{level = 10 : i32, message = "bqk,bkd->bqd"}> : () -> ()
    %cst_94 = arith.constant dense<0.000000e+00> : vector<2x16x8xf32>
    %233 = tpu.matmul %232, %219, %cst_94 {dimension_numbers = #tpu.dot_dimension_numbers<[2], [1], [1], [2], [0, 0, 0, 1, 1, 2], [0], [0]>} : vector<2x16x16xf32>, vector<2x16x8xf32>, vector<2x16x8xf32> -> vector<2x16x8xf32>
    "tpu.trace_stop"() : () -> ()
    %234 = vector.shape_cast %233 : vector<2x16x8xf32> to vector<32x8xf32>
    %235 = vector.extract_strided_slice %173 {offsets = [1, 0, 0], sizes = [1, 8, 32], strides = [1, 1, 1]} : vector<4x8x32xf32> to vector<1x8x32xf32>
    %236 = vector.shape_cast %235 : vector<1x8x32xf32> to vector<8x32xf32>
    %cst_95 = arith.constant dense<0.000000e+00> : vector<32x32xf32>
    %237 = tpu.matmul %234, %236, %cst_95 {dimension_numbers = #tpu.dot_dimension_numbers<[1], [0], [0], [1], [0, 0, 1, 1], [], []>} : vector<32x8xf32>, vector<8x32xf32>, vector<32x32xf32> -> vector<32x32xf32>
    %238 = arith.addf %216, %237 : vector<32x32xf32>
    %239 = vector.extract_strided_slice %193 {offsets = [0, 0, 16], sizes = [2, 16, 8], strides = [1, 1, 1]} : vector<2x16x96xf32> to vector<2x16x8xf32>
    %240 = vector.extract_strided_slice %193 {offsets = [0, 0, 48], sizes = [2, 16, 8], strides = [1, 1, 1]} : vector<2x16x96xf32> to vector<2x16x8xf32>
    %241 = vector.extract_strided_slice %193 {offsets = [0, 0, 80], sizes = [2, 16, 8], strides = [1, 1, 1]} : vector<2x16x96xf32> to vector<2x16x8xf32>
    "tpu.trace_start"() <{level = 10 : i32, message = "bqd,bkd->bqk"}> : () -> ()
    %cst_96 = arith.constant dense<0.000000e+00> : vector<2x16x16xf32>
    %242 = tpu.matmul %239, %240, %cst_96 {dimension_numbers = #tpu.dot_dimension_numbers<[2], [2], [1], [1], [0, 0, 0, 1, 1, 1], [0], [0]>} : vector<2x16x8xf32>, vector<2x16x8xf32>, vector<2x16x16xf32> -> vector<2x16x16xf32>
    "tpu.trace_stop"() : () -> ()
    %cst_97 = arith.constant 0.353553385 : f32
    %243 = vector.broadcast %cst_97 : f32 to vector<2x16x16xf32>
    %244 = arith.mulf %242, %243 : vector<2x16x16xf32>
    %cst_98 = arith.constant dense<0xFF800000> : vector<2x16xf32>
    %245 = vector.multi_reduction <maximumf>, %244, %cst_98 [2] : vector<2x16x16xf32> to vector<2x16xf32>
    %246 = vector.shape_cast %245 : vector<2x16xf32> to vector<2x16x1xf32>
    %247 = vector.broadcast %246 : vector<2x16x1xf32> to vector<2x16x16xf32>
    %248 = arith.subf %244, %247 : vector<2x16x16xf32>
    %249 = math.exp %248 : vector<2x16x16xf32>
    %cst_99 = arith.constant dense<0.000000e+00> : vector<2x16xf32>
    %250 = vector.multi_reduction <add>, %249, %cst_99 [2] : vector<2x16x16xf32> to vector<2x16xf32>
    %251 = vector.shape_cast %250 : vector<2x16xf32> to vector<2x16x1xf32>
    %252 = tpu.reciprocal %251 {approx = true} : vector<2x16x1xf32> -> vector<2x16x1xf32>
    %253 = vector.broadcast %252 : vector<2x16x1xf32> to vector<2x16x16xf32>
    %254 = arith.mulf %249, %253 : vector<2x16x16xf32>
    "tpu.trace_start"() <{level = 10 : i32, message = "bqk,bkd->bqd"}> : () -> ()
    %cst_100 = arith.constant dense<0.000000e+00> : vector<2x16x8xf32>
    %255 = tpu.matmul %254, %241, %cst_100 {dimension_numbers = #tpu.dot_dimension_numbers<[2], [1], [1], [2], [0, 0, 0, 1, 1, 2], [0], [0]>} : vector<2x16x16xf32>, vector<2x16x8xf32>, vector<2x16x8xf32> -> vector<2x16x8xf32>
    "tpu.trace_stop"() : () -> ()
    %256 = vector.shape_cast %255 : vector<2x16x8xf32> to vector<32x8xf32>
    %257 = vector.extract_strided_slice %173 {offsets = [2, 0, 0], sizes = [1, 8, 32], strides = [1, 1, 1]} : vector<4x8x32xf32> to vector<1x8x32xf32>
    %258 = vector.shape_cast %257 : vector<1x8x32xf32> to vector<8x32xf32>
    %cst_101 = arith.constant dense<0.000000e+00> : vector<32x32xf32>
    %259 = tpu.matmul %256, %258, %cst_101 {dimension_numbers = #tpu.dot_dimension_numbers<[1], [0], [0], [1], [0, 0, 1, 1], [], []>} : vector<32x8xf32>, vector<8x32xf32>, vector<32x32xf32> -> vector<32x32xf32>
    %260 = arith.addf %238, %259 : vector<32x32xf32>
    %261 = vector.extract_strided_slice %193 {offsets = [0, 0, 24], sizes = [2, 16, 8], strides = [1, 1, 1]} : vector<2x16x96xf32> to vector<2x16x8xf32>
    %262 = vector.extract_strided_slice %193 {offsets = [0, 0, 56], sizes = [2, 16, 8], strides = [1, 1, 1]} : vector<2x16x96xf32> to vector<2x16x8xf32>
    %263 = vector.extract_strided_slice %193 {offsets = [0, 0, 88], sizes = [2, 16, 8], strides = [1, 1, 1]} : vector<2x16x96xf32> to vector<2x16x8xf32>
    "tpu.trace_start"() <{level = 10 : i32, message = "bqd,bkd->bqk"}> : () -> ()
    %cst_102 = arith.constant dense<0.000000e+00> : vector<2x16x16xf32>
    %264 = tpu.matmul %261, %262, %cst_102 {dimension_numbers = #tpu.dot_dimension_numbers<[2], [2], [1], [1], [0, 0, 0, 1, 1, 1], [0], [0]>} : vector<2x16x8xf32>, vector<2x16x8xf32>, vector<2x16x16xf32> -> vector<2x16x16xf32>
    "tpu.trace_stop"() : () -> ()
    %cst_103 = arith.constant 0.353553385 : f32
    %265 = vector.broadcast %cst_103 : f32 to vector<2x16x16xf32>
    %266 = arith.mulf %264, %265 : vector<2x16x16xf32>
    %cst_104 = arith.constant dense<0xFF800000> : vector<2x16xf32>
    %267 = vector.multi_reduction <maximumf>, %266, %cst_104 [2] : vector<2x16x16xf32> to vector<2x16xf32>
    %268 = vector.shape_cast %267 : vector<2x16xf32> to vector<2x16x1xf32>
    %269 = vector.broadcast %268 : vector<2x16x1xf32> to vector<2x16x16xf32>
    %270 = arith.subf %266, %269 : vector<2x16x16xf32>
    %271 = math.exp %270 : vector<2x16x16xf32>
    %cst_105 = arith.constant dense<0.000000e+00> : vector<2x16xf32>
    %272 = vector.multi_reduction <add>, %271, %cst_105 [2] : vector<2x16x16xf32> to vector<2x16xf32>
    %273 = vector.shape_cast %272 : vector<2x16xf32> to vector<2x16x1xf32>
    %274 = tpu.reciprocal %273 {approx = true} : vector<2x16x1xf32> -> vector<2x16x1xf32>
    %275 = vector.broadcast %274 : vector<2x16x1xf32> to vector<2x16x16xf32>
    %276 = arith.mulf %271, %275 : vector<2x16x16xf32>
    "tpu.trace_start"() <{level = 10 : i32, message = "bqk,bkd->bqd"}> : () -> ()
    %cst_106 = arith.constant dense<0.000000e+00> : vector<2x16x8xf32>
    %277 = tpu.matmul %276, %263, %cst_106 {dimension_numbers = #tpu.dot_dimension_numbers<[2], [1], [1], [2], [0, 0, 0, 1, 1, 2], [0], [0]>} : vector<2x16x16xf32>, vector<2x16x8xf32>, vector<2x16x8xf32> -> vector<2x16x8xf32>
    "tpu.trace_stop"() : () -> ()
    %278 = vector.shape_cast %277 : vector<2x16x8xf32> to vector<32x8xf32>
    %279 = vector.extract_strided_slice %173 {offsets = [3, 0, 0], sizes = [1, 8, 32], strides = [1, 1, 1]} : vector<4x8x32xf32> to vector<1x8x32xf32>
    %280 = vector.shape_cast %279 : vector<1x8x32xf32> to vector<8x32xf32>
    %cst_107 = arith.constant dense<0.000000e+00> : vector<32x32xf32>
    %281 = tpu.matmul %278, %280, %cst_107 {dimension_numbers = #tpu.dot_dimension_numbers<[1], [0], [0], [1], [0, 0, 1, 1], [], []>} : vector<32x8xf32>, vector<8x32xf32>, vector<32x32xf32> -> vector<32x32xf32>
    %282 = arith.addf %260, %281 : vector<32x32xf32>
    %283 = vector.broadcast %184 : vector<1x32xf32> to vector<32x32xf32>
    %284 = arith.addf %282, %283 : vector<32x32xf32>
    %285 = arith.addf %169, %284 : vector<32x32xf32>
    %cst_108 = arith.constant dense<0.000000e+00> : vector<32xf32>
    %286 = vector.multi_reduction <add>, %285, %cst_108 [1] : vector<32x32xf32> to vector<32xf32>
    %287 = vector.shape_cast %286 : vector<32xf32> to vector<32x1xf32>
    %cst_109 = arith.constant 3.200000e+01 : f32
    %288 = vector.broadcast %cst_109 : f32 to vector<32x1xf32>
    %289 = arith.divf %287, %288 : vector<32x1xf32>
    %290 = vector.broadcast %289 : vector<32x1xf32> to vector<32x32xf32>
    %291 = arith.subf %285, %290 : vector<32x32xf32>
    %292 = arith.mulf %291, %291 : vector<32x32xf32>
    %cst_110 = arith.constant dense<0.000000e+00> : vector<32xf32>
    %293 = vector.multi_reduction <add>, %292, %cst_110 [1] : vector<32x32xf32> to vector<32xf32>
    %294 = vector.shape_cast %293 : vector<32xf32> to vector<32x1xf32>
    %cst_111 = arith.constant 3.200000e+01 : f32
    %295 = vector.broadcast %cst_111 : f32 to vector<32x1xf32>
    %296 = arith.divf %294, %295 : vector<32x1xf32>
    %297 = vector.broadcast %289 : vector<32x1xf32> to vector<32x32xf32>
    %298 = arith.subf %285, %297 : vector<32x32xf32>
    %cst_112 = arith.constant 9.99999974E-6 : f32
    %299 = vector.broadcast %cst_112 : f32 to vector<32x1xf32>
    %300 = arith.addf %296, %299 : vector<32x1xf32>
    %301 = math.rsqrt %300 : vector<32x1xf32>
    %302 = vector.broadcast %301 : vector<32x1xf32> to vector<32x32xf32>
    %303 = arith.mulf %298, %302 : vector<32x32xf32>
    %304 = vector.broadcast %186 : vector<1x32xf32> to vector<32x32xf32>
    %305 = arith.mulf %303, %304 : vector<32x32xf32>
    %306 = vector.broadcast %187 : vector<1x32xf32> to vector<32x32xf32>
    %307 = arith.addf %305, %306 : vector<32x32xf32>
    %cst_113 = arith.constant dense<0.000000e+00> : vector<32x64xf32>
    %308 = tpu.matmul %307, %175, %cst_113 {dimension_numbers = #tpu.dot_dimension_numbers<[1], [0], [0], [1], [0, 0, 1, 1], [], []>} : vector<32x32xf32>, vector<32x64xf32>, vector<32x64xf32> -> vector<32x64xf32>
    %309 = vector.broadcast %181 : vector<1x64xf32> to vector<32x64xf32>
    %310 = arith.addf %308, %309 : vector<32x64xf32>
    %cst_114 = arith.constant 0.000000e+00 : f32
    %311 = vector.broadcast %cst_114 : f32 to vector<32x64xf32>
    %312 = arith.maximumf %310, %311 : vector<32x64xf32>
    %cst_115 = arith.constant dense<0.000000e+00> : vector<32x32xf32>
    %313 = tpu.matmul %312, %177, %cst_115 {dimension_numbers = #tpu.dot_dimension_numbers<[1], [0], [0], [1], [0, 0, 1, 1], [], []>} : vector<32x64xf32>, vector<64x32xf32>, vector<32x32xf32> -> vector<32x32xf32>
    %314 = vector.broadcast %185 : vector<1x32xf32> to vector<32x32xf32>
    %315 = arith.addf %313, %314 : vector<32x32xf32>
    %316 = arith.addf %307, %315 : vector<32x32xf32>
    %cst_116 = arith.constant dense<0.000000e+00> : vector<32xf32>
    %317 = vector.multi_reduction <add>, %316, %cst_116 [1] : vector<32x32xf32> to vector<32xf32>
    %318 = vector.shape_cast %317 : vector<32xf32> to vector<32x1xf32>
    %cst_117 = arith.constant 3.200000e+01 : f32
    %319 = vector.broadcast %cst_117 : f32 to vector<32x1xf32>
    %320 = arith.divf %318, %319 : vector<32x1xf32>
    %321 = vector.broadcast %320 : vector<32x1xf32> to vector<32x32xf32>
    %322 = arith.subf %316, %321 : vector<32x32xf32>
    %323 = arith.mulf %322, %322 : vector<32x32xf32>
    %cst_118 = arith.constant dense<0.000000e+00> : vector<32xf32>
    %324 = vector.multi_reduction <add>, %323, %cst_118 [1] : vector<32x32xf32> to vector<32xf32>
    %325 = vector.shape_cast %324 : vector<32xf32> to vector<32x1xf32>
    %cst_119 = arith.constant 3.200000e+01 : f32
    %326 = vector.broadcast %cst_119 : f32 to vector<32x1xf32>
    %327 = arith.divf %325, %326 : vector<32x1xf32>
    %328 = vector.broadcast %320 : vector<32x1xf32> to vector<32x32xf32>
    %329 = arith.subf %316, %328 : vector<32x32xf32>
    %cst_120 = arith.constant 9.99999974E-6 : f32
    %330 = vector.broadcast %cst_120 : f32 to vector<32x1xf32>
    %331 = arith.addf %327, %330 : vector<32x1xf32>
    %332 = math.rsqrt %331 : vector<32x1xf32>
    %333 = vector.broadcast %332 : vector<32x1xf32> to vector<32x32xf32>
    %334 = arith.mulf %329, %333 : vector<32x32xf32>
    %335 = vector.broadcast %188 : vector<1x32xf32> to vector<32x32xf32>
    %336 = arith.mulf %334, %335 : vector<32x32xf32>
    %337 = vector.broadcast %189 : vector<1x32xf32> to vector<32x32xf32>
    %338 = arith.addf %336, %337 : vector<32x32xf32>
    %c0_121 = arith.constant 0 : index
    %c0_122 = arith.constant 0 : index
    %339 = vector.load %arg9[%c0_121, %c0_122] : memref<32x128xf32, #tpu.memory_space<vmem>>, vector<32x128xf32>
    %cst_123 = arith.constant dense<0.000000e+00> : vector<32x128xf32>
    %340 = tpu.matmul %338, %339, %cst_123 {dimension_numbers = #tpu.dot_dimension_numbers<[1], [0], [0], [1], [0, 0, 1, 1], [], []>} : vector<32x32xf32>, vector<32x128xf32>, vector<32x128xf32> -> vector<32x128xf32>
    %c0_124 = arith.constant 0 : index
    %c0_125 = arith.constant 0 : index
    %341 = vector.load %arg10[%c0_124, %c0_125] : memref<1x128xf32, #tpu.memory_space<vmem>>, vector<1x128xf32>
    %342 = vector.broadcast %341 : vector<1x128xf32> to vector<32x128xf32>
    %343 = arith.addf %340, %342 : vector<32x128xf32>
    %c0_126 = arith.constant 0 : index
    %c0_127 = arith.constant 0 : index
    %344 = vector.load %arg11[%c0_126, %c0_127] : memref<32x128xf32, #tpu.memory_space<vmem>>, vector<32x128xf32>
    tpu.vector_store %arg11[%c0_126, %c0_127], %343 {strides = array<i32>} : memref<32x128xf32, #tpu.memory_space<vmem>>, vector<32x128xf32>,
    return
  }
  func.func @transform_0(%arg0: i32) -> (i32, i32) {
    %c0_i32 = arith.constant 0 : i32
    %c0_i32_0 = arith.constant 0 : i32
    %c0_i32_1 = arith.constant 0 : i32
    return %c0_i32, %c0_i32_0 : i32, i32
  }
  func.func @transform_1(%arg0: i32) -> (i32, i32, i32) {
    %c0_i32 = arith.constant 0 : i32
    %c0_i32_0 = arith.constant 0 : i32
    %c0_i32_1 = arith.constant 0 : i32
    %c0_i32_2 = arith.constant 0 : i32
    return %c0_i32, %c0_i32_0, %c0_i32_1 : i32, i32, i32
  }
  func.func @transform_2(%arg0: i32) -> (i32, i32, i32, i32) {
    %c0_i32 = arith.constant 0 : i32
    %c0_i32_0 = arith.constant 0 : i32
    %c0_i32_1 = arith.constant 0 : i32
    %c0_i32_2 = arith.constant 0 : i32
    %c0_i32_3 = arith.constant 0 : i32
    return %c0_i32, %c0_i32_0, %c0_i32_1, %c0_i32_2 : i32, i32, i32, i32
  }
  func.func @transform_3(%arg0: i32) -> (i32, i32, i32) {
    %c0_i32 = arith.constant 0 : i32
    %c0_i32_0 = arith.constant 0 : i32
    %c0_i32_1 = arith.constant 0 : i32
    %c0_i32_2 = arith.constant 0 : i32
    return %c0_i32, %c0_i32_0, %c0_i32_1 : i32, i32, i32
  }
  func.func @transform_4(%arg0: i32) -> (i32, i32, i32) {
    %c0_i32 = arith.constant 0 : i32
    %c0_i32_0 = arith.constant 0 : i32
    %c0_i32_1 = arith.constant 0 : i32
    %c0_i32_2 = arith.constant 0 : i32
    return %c0_i32, %c0_i32_0, %c0_i32_1 : i32, i32, i32
  }
  func.func @transform_5(%arg0: i32) -> (i32, i32, i32) {
    %c0_i32 = arith.constant 0 : i32
    %c0_i32_0 = arith.constant 0 : i32
    %c0_i32_1 = arith.constant 0 : i32
    %c0_i32_2 = arith.constant 0 : i32
    return %c0_i32, %c0_i32_0, %c0_i32_1 : i32, i32, i32
  }
  func.func @transform_6(%arg0: i32) -> (i32, i32, i32) {
    %c0_i32 = arith.constant 0 : i32
    %c0_i32_0 = arith.constant 0 : i32
    %c0_i32_1 = arith.constant 0 : i32
    %c0_i32_2 = arith.constant 0 : i32
    return %c0_i32, %c0_i32_0, %c0_i32_1 : i32, i32, i32
  }
  func.func @transform_7(%arg0: i32) -> (i32, i32, i32) {
    %c0_i32 = arith.constant 0 : i32
    %c0_i32_0 = arith.constant 0 : i32
    %c0_i32_1 = arith.constant 0 : i32
    %c0_i32_2 = arith.constant 0 : i32
    return %c0_i32, %c0_i32_0, %c0_i32_1 : i32, i32, i32
  }
  func.func @transform_8(%arg0: i32) -> (i32, i32) {
    %c0_i32 = arith.constant 0 : i32
    %c0_i32_0 = arith.constant 0 : i32
    %c0_i32_1 = arith.constant 0 : i32
    return %c0_i32, %c0_i32_0 : i32, i32
  }
  func.func @transform_9(%arg0: i32) -> (i32, i32) {
    %c0_i32 = arith.constant 0 : i32
    %c0_i32_0 = arith.constant 0 : i32
    %c0_i32_1 = arith.constant 0 : i32
    return %c0_i32, %c0_i32_0 : i32, i32
  }
  func.func @transform_10(%arg0: i32) -> (i32, i32) {
    %c0_i32 = arith.constant 0 : i32
    %c0_i32_0 = arith.constant 0 : i32
    %c0_i32_1 = arith.constant 0 : i32
    return %c0_i32, %c0_i32_0 : i32, i32
  }
}

</mosaic_0001>

<bundles_post_ra>
// kernel: tpu_custom_call.1
= control target key start
LH: loop header
LB: loop body
LE: loop exit
PB: predicated region body
PF: predicated region fallthrough
CT: control target
= control target key end

     0   :  { %15 = vsyncpa [#allocation3], 0  ;;  %s4229_s0 = inlined_call_operand.hbm [shape: f32[32,32], index: 0, kind: input, shape index: {}]   ;;  %s4230_s1 = inlined_call_operand.vmem [shape: f32[2,32,96], index: 1, kind: input, shape index: {}]   ;;  %s4231_s2 = inlined_call_operand.vmem [shape: f32[2,4,8,32], index: 2, kind: input, shape index: {}]   ;;  %s4232_s3 = inlined_call_operand.vmem [shape: f32[2,32,64], index: 3, kind: input, shape index: {}]   ;;  %s4233_s4 = inlined_call_operand.vmem [shape: f32[2,64,32], index: 4, kind: input, shape index: {}]   ;;  %s4234_s5 = inlined_call_operand.hbm [shape: f32[2,1,96], index: 5, kind: input, shape index: {}]   ;;  %s4235_s6 = inlined_call_operand.hbm [shape: f32[2,1,64], index: 6, kind: input, shape index: {}]   ;;  %s4236_s7 = inlined_call_operand.vmem [shape: f32[2,6,32], index: 7, kind: input, shape index: {}]   ;;  %s4237_s8 = inlined_call_operand.vmem [shape: f32[32,128], index: 8, kind: input, shape index: {}]   ;;  %s4238_s9 = inlined_call_operand.vmem [shape: f32[1,128], index: 9, kind: input, shape index: {}]   ;;  %s4239_s10 = inlined_call_operand.hbm [shape: f32[32,128], index: 10, kind: output, shape index: {}]  }
   0x1   :  { %16 = vsyncpa [#allocation6], 0  ;;  %s43_s15 = sshll.u32 %s4234_s5, 4  ;;  %s44_s15 = int_to_ptr.hbm [resolvable:$true] %s43_s15 }
   0x2   :  { %17 = vsyncpa [#allocation4], 0  ;;  %s3368_s16 = smov [#allocation5]   ;;  %s22_s20 = sshll.u32 %s4229_s0, 4  ;;  %s23_s20 = int_to_ptr.hbm [resolvable:$true] %s22_s20 }
   0x3   :  { %s45_s17 = sshll.u32 %s3368_s16, 4  ;;  %s3369_s21 = smov 16   ;;  %s46_s17 = int_to_ptr.vmem [resolvable:$true] %s45_s17 }
   0x4   :  { %s3370_s22 = smov 1   ;;  %s3371_s23 = smov [#allocation2]  }
   0x5   :  { %51 = dma.hbm_to_vmem [thread:$0]  %s44_s15, 32, %s46_s17, [#allocation6], %s3369_s21, %s3369_s21, %s3370_s22  }
   0x6   :  { %s24_s24 = sshll.u32 %s3371_s23, 4  ;;  %s3372_s25 = smov 128   ;;  %s25_s24 = int_to_ptr.vmem [resolvable:$true] %s24_s24 }
   0x7   :  { %s3373_s26 = smov 8   ;;  %s56_s28 = sshll.u32 %s4235_s6, 4  ;;  %s57_s28 = int_to_ptr.hbm [resolvable:$true] %s56_s28 }
   0x8   :  { %30 = dma.hbm_to_vmem [thread:$0]  %s23_s20, 512, %s25_s24, [#allocation3], %s3372_s25, %s3372_s25, %s3373_s26  }
   0x9   :  { %s3374_s29 = smov [#allocation7]  }
   0xa   :  { %s58_s0 = sshll.u32 %s3374_s29, 4  ;;  %s59_s0 = int_to_ptr.vmem [resolvable:$true] %s58_s0 }
   0xb   :  { %64 = dma.hbm_to_vmem [thread:$0]  %s57_s28, 32, %s59_s0, [#allocation6], %s3369_s21, %s3369_s21, %s3370_s22  }
   0xc   :  { %3362 = dma.done.wait [#allocation3], 512  }
   0xd   :  { %3363 = vsyncadd [#allocation3], 4294966784 }
   0xe   :  { %3364 = dma.done.wait [#allocation6], 64  }
   0xf   :  { %3365 = vsyncadd [#allocation6], 4294967232  ;;  %v90_v0 = vld [vmem:[%s4230_s1 + $0x18] sm:$0xff]  ;;  %v89_v1 = vld [vmem:[%s4230_s1 + $0x10] sm:$0xff]  ;;  %vm113_vm0 = vcmask 261120   ;;  %s3375_s17 = smov 96  }
  0x10   :  { %138 = vmatpush.msra.mxu0 %v90_v0  ;;  %2991 = vmatpush.msra.mxu1 %v90_v0  ;;  %v88_v2 = vld [vmem:[%s4230_s1 + $0x8] sm:$0xff]  ;;  %v87_v3 = vld [vmem:[%s4230_s1] sm:$0xff]  ;;  %v86_v5 = vld [vmem:[#allocation2 + $0x18] sm:$0xff]  ;;  %s3376_s18 = smov 88   ;;  %s3377_s19 = smov 120   ;;  %vm161_vm1 = vcmask 64512  }
  0x11   :  { %v3467_v4 = vld [vmem:[#allocation2] sm:$0xff]  ;;  %v3472_v6 = vld [vmem:[#allocation2 + $0x8] sm:$0xff]  ;;  %v85_v7 = vld [vmem:[#allocation2 + $0x10] sm:$0xff]  ;;  %s3378_s20 = smov 64   ;;  %vm234_vm2 = vcmask 130048   ;;  %s3379_s21 = smov 80  }
  0x12   :  { %139 = vmatpush.msra.mxu0 %v89_v1  ;;  %2992 = vmatpush.msra.mxu1 %v89_v1  ;;  %v3097_v8 = vld [vmem:[#allocation5] ss:$0 sm:$0xff]  ;;  %s3380_s22 = smov 56   ;;  %s3381_s23 = smov 112   ;;  %vm1272_vm10 = vcmask 523264  }
  0x13   :  { %s3382_s27 = smov 72   ;;  %s3383_s0 = smov 104  }
  0x14   :  { %140 = vmatpush.msra.mxu0 %v88_v2  ;;  %2993 = vmatpush.msra.mxu1 %v88_v2  ;;  %s3384_s30 = smov 48   ;;  %s3385_s13 = smov 40  }
  0x15   :  { %s3387_s12 = smov [#allocation8]   ;;  %s2800_s15 = sshll.u32 %s4239_s10, 4  ;;  %s2801_s15 = int_to_ptr.hbm [resolvable:$true] %s2800_s15 }
  0x16   :  { %141 = vmatpush.msra.mxu0 %v87_v3  ;;  %2994 = vmatpush.msra.mxu1 %v87_v3 }
  0x17   :  { %2814 = vmatmul.msk.f32.vlgmr.msra.gmra.mxu0 %vm113_vm0, %v3467_v4  ;;  %2817 = vmatmul.msk.f32.vlgmr.msra.gmra.mxu1 %vm113_vm0, %v86_v5 }
  0x1f   :  { %2815 = vmatmul.msk.f32.gmra.mxu0 %vm113_vm0, %v3472_v6 }
  0x27   :  { %2816 = vmatmul.msk.f32.gmra.mxu0 %vm113_vm0, %v85_v7 }
  0x94   :  { %v143_v9 = vpop.f32.mrf.mxu0  ;;  %v152_v10 = vpop.f32.mrf.mxu1 }
  0x95   :  { %v3477_v11 = vadd.f32 %v3097_v8, %v152_v10  ;;  %v3487_v15 = vadd.f32 %v3097_v8, %v143_v9 }
  0x97   :  { %197 = vrot.lane.b32.xlu1 %v3477_v11, %s3375_s17 }
  0x9c   :  { %v146_v12 = vpop.f32.mrf.mxu0 }
  0x9d   :  { %v3481_v13 = vadd.f32 %v3097_v8, %v146_v12 }
  0x9f   :  { %355 = vrot.lane.b32.xlu2 %v3481_v13, %s3376_s18  ;;  %159 = vrot.lane.b32.xlu0 %v3481_v13, %s3375_s17  ;;  %v3503_v17 = vpack.i.bf16 %v3487_v15, %v3481_v13 }
  0xa4   :  { %v149_v14 = vpop.f32.mrf.mxu0 }
  0xa5   :  { %v3489_v16 = vadd.f32 %v3097_v8, %v149_v14 }
  0xa7   :  { %195 = vrot.lane.b32.xlu1 %v3489_v16, %s3375_s17  ;;  %353 = vrot.lane.b32.xlu2 %v3487_v15, %s3376_s18  ;;  %v3548_v61 = vpack.i.bf16 %v3489_v16, %v3477_v11 }
  0xa8   :  { %157 = vrot.lane.b32.xlu0 %v3487_v15, %s3375_s17 }
  0xaf   :  { %351 = vrot.lane.b32.xlu1 %v3481_v13, %s3377_s19 }
  0xb0   :  { %349 = vrot.lane.b32.xlu0 %v3487_v15, %s3377_s19 }
  0xb7   :  { %3018 = vrot.lane.b32.xlu1 %v3503_v17, %s3378_s20 }
  0xbf   :  { %394 = vrot.lane.b32.xlu1 %v3477_v11, %s3376_s18 }
  0xc7   :  { %392 = vrot.lane.b32.xlu1 %v3489_v16, %s3376_s18 }
  0xcf   :  { %388 = vrot.lane.b32.xlu1 %v3489_v16, %s3377_s19 }
  0xd7   :  { %390 = vrot.lane.b32.xlu1 %v3477_v11, %s3377_s19 }
  0xf9   :  { %v356_v20 = vpop.permute.xlu2 %355 }
 0x101   :  { %v354_v23 = vpop.permute.xlu2 %353 }
 0x109   :  { %v198_v18 = vpop.permute.xlu1 %197 }
 0x10a   :  { %2822 = vmatpush.xpose.msk.msra.mxu2 %vm161_vm1, %v198_v18 }
 0x111   :  { %v160_v19 = vpop.permute.xlu0 %159 }
 0x112   :  { %2818 = vmatpush.xpose.msk.msrb.mxu1 %vm161_vm1, %v160_v19 }
 0x119   :  { %v196_v21 = vpop.permute.xlu1 %195 }
 0x11a   :  { %v158_v22 = vpop.permute.xlu0 %157  ;;  %2823 = vmatpush.xpose.msk.msra.mxu2 %vm161_vm1, %v196_v21 }
 0x11b   :  { %2819 = vmatpush.xpose.msk.msrb.mxu1 %vm161_vm1, %v158_v22 }
 0x11d   :  { %2824 = vmatmul.msk.f32.vlgmr.msra.gmra.mxu2 %vm161_vm1, %v3489_v16 }
 0x11e   :  { %2820 = vmatmul.msk.f32.vlgmr.msrb.gmra.mxu1 %vm161_vm1, %v3487_v15 }
 0x11f   :  { %2830 = vmatpush.xpose.msk.msra.mxu1 %vm161_vm1, %v356_v20 }
 0x121   :  { %v352_v24 = vpop.permute.xlu1 %351 }
 0x122   :  { %v350_v28 = vpop.permute.xlu0 %349 }
 0x123   :  { %2831 = vmatpush.xpose.msk.msra.mxu1 %vm161_vm1, %v354_v23 }
 0x125   :  { %2825 = vmatmul.msk.f32.gmra.mxu2 %vm161_vm1, %v3477_v11 }
 0x126   :  { %2821 = vmatmul.msk.f32.gmra.mxu1 %vm161_vm1, %v3481_v13 }
 0x129   :  { %v3019_v25 = vpop.permute.xlu1 %3018 }
 0x12a   :  { %v3020_v26 = vunpack.i.l.bf16 %v3019_v25  ;;  %v3021_v27 = vunpack.i.h.bf16 %v3019_v25 }
 0x12c   :  { %305 = vmatpush.msrb.mxu2 %v3020_v26  ;;  %2995 = vmatpush.msra.mxu3 %v3020_v26 }
 0x12e   :  { %2832 = vmatmul.msk.f32.vlgmr.msra.gmra.mxu1 %vm161_vm1, %v350_v28  ;;  %306 = vmatpush.msrb.mxu2 %v3021_v27 }
 0x12f   :  { %2996 = vmatpush.msra.mxu3 %v3021_v27 }
 0x131   :  { %v395_v29 = vpop.permute.xlu1 %394 }
 0x132   :  { %2834 = vmatpush.xpose.msk.msra.mxu2 %vm161_vm1, %v395_v29 }
 0x136   :  { %2833 = vmatmul.msk.f32.gmra.mxu1 %vm161_vm1, %v352_v24 }
 0x139   :  { %v393_v30 = vpop.permute.xlu1 %392 }
 0x13a   :  { %2835 = vmatpush.xpose.msk.msra.mxu2 %vm161_vm1, %v393_v30 }
 0x141   :  { %v389_v47 = vpop.permute.xlu1 %388 }
 0x149   :  { %v391_v48 = vpop.permute.xlu1 %390 }
 0x19b   :  { %v187_v31 = vpop.f32.mrf.mxu1 }
 0x19c   :  { %v230_v32 = vmul.f32 0.35355338, %v187_v31 }
 0x19e   :  { %v235_v33 = vsel %vm234_vm2, %v230_v32, -inf }
 0x19f   :  { %236 = vmax.xlane.f32.xlu2 %v235_v33 }
 0x1a0   :  { %v224_v34 = vpop.f32.mrf.mxu2 }
 0x1a1   :  { %v232_v35 = vmul.f32 0.35355338, %v224_v34 }
 0x1a3   :  { %v190_v36 = vpop.f32.mrf.mxu1  ;;  %v241_v37 = vsel %vm234_vm2, %v232_v35, -inf }
 0x1a4   :  { %v231_v38 = vmul.f32 0.35355338, %v190_v36  ;;  %242 = vmax.xlane.f32.xlu1 %v241_v37 }
 0x1a6   :  { %v238_v39 = vsel %vm234_vm2, %v231_v38, -inf }
 0x1a7   :  { %239 = vmax.xlane.f32.xlu2 %v238_v39 }
 0x1a8   :  { %v227_v40 = vpop.f32.mrf.mxu2 }
 0x1a9   :  { %v233_v41 = vmul.f32 0.35355338, %v227_v40 }
 0x1ab   :  { %v382_v42 = vpop.f32.mrf.mxu1  ;;  %v244_v43 = vsel %vm234_vm2, %v233_v41, -inf }
 0x1ac   :  { %v427_v58 = vmul.f32 0.35355338, %v382_v42  ;;  %v91_v42 = vld [vmem:[%s4231_s2] sm:$0xff] }
 0x1ae   :  { %v431_v60 = vsel %vm234_vm2, %v427_v58, -inf }
 0x1af   :  { %245 = vmax.xlane.f32.xlu2 %v244_v43 }
 0x1b3   :  { %v385_v44 = vpop.f32.mrf.mxu1 }
 0x1b4   :  { %v428_v45 = vmul.f32 0.35355338, %v385_v44 }
 0x1b6   :  { %v434_v46 = vsel %vm234_vm2, %v428_v45, -inf }
 0x1b7   :  { %435 = vmax.xlane.f32.xlu2 %v434_v46 }
 0x1bd   :  { %633 = vrot.lane.b32.xlu1 %v3481_v13, %s3379_s21 }
 0x212   :  { %v237_v49 = vpop.xlane.xlu2 %236 }
 0x213   :  { %v247_v50 = vsub.f32 %v230_v32, %v237_v49 }
 0x215   :  { %v251_v51 = vmul.f32 1.442695, %v247_v50 }
 0x217   :  { %3102 = vpow2.f32 %v251_v51  ;;  %v243_v52 = vpop.xlane.xlu1 %242 }
 0x218   :  { %v249_v53 = vsub.f32 %v232_v35, %v243_v52 }
 0x21a   :  { %v255_v54 = vmul.f32 1.442695, %v249_v53  ;;  %v240_v62 = vpop.xlane.xlu2 %239 }
 0x21b   :  { %v248_v63 = vsub.f32 %v231_v38, %v240_v62 }
 0x21c   :  { %3104 = vpow2.f32 %v255_v54 }
 0x21d   :  { %v3103_v55 = vpop.eup %3102  ;;  %v253_v0 = vmul.f32 1.442695, %v248_v63 }
 0x21e   :  { %v259_v56 = vsel %vm234_vm2, %v3103_v55, 0.0 }
 0x21f   :  { %260 = vadd.xlane.f32.xlu0 %v259_v56  ;;  %3106 = vpow2.f32 %v253_v0  ;;  %v92_v0 = vld [vmem:[%s4231_s2 + $0x8] sm:$0xff] }
 0x220   :  { %572 = vmatpush.msrb.mxu1 %v92_v0 }
 0x222   :  { %v3541_v57 = vpop.eup %3104  ;;  %v246_v5 = vpop.xlane.xlu2 %245 }
 0x223   :  { %v265_v59 = vsel %vm234_vm2, %v3541_v57, 0.0  ;;  %v250_v12 = vsub.f32 %v233_v41, %v246_v5 }
 0x224   :  { %266 = vadd.xlane.f32.xlu2 %v265_v59 }
 0x225   :  { %v3107_v1 = vpop.eup %3106  ;;  %v257_v18 = vmul.f32 1.442695, %v250_v12 }
 0x226   :  { %v262_v2 = vsel %vm234_vm2, %v3107_v1, 0.0 }
 0x227   :  { %432 = vmax.xlane.f32.xlu0 %v431_v60 }
 0x22a   :  { %v436_v19 = vpop.xlane.xlu2 %435 }
 0x22b   :  { %v444_v21 = vsub.f32 %v428_v45, %v436_v19 }
 0x22d   :  { %v449_v23 = vmul.f32 1.442695, %v444_v21 }
 0x22f   :  { %v634_v40 = vpop.permute.xlu1 %633 }
 0x23b   :  { %3023 = vrot.lane.b32.xlu0 %v3548_v61, %s3378_s20 }
 0x265   :  { %263 = vadd.xlane.f32.xlu0 %v262_v2 }
 0x279   :  { %3028 = vrot.lane.b32.xlu0 %v3503_v17, %s3380_s22 }
 0x281   :  { %631 = vrot.lane.b32.xlu0 %v3487_v15, %s3379_s21 }
 0x289   :  { %629 = vrot.lane.b32.xlu0 %v3481_v13, %s3381_s23 }
 0x292   :  { %v261_v3 = vpop.xlane.xlu0 %260 }
 0x293   :  { %3108 = vrcp.f32 %v261_v3 }
 0x297   :  { %v267_v32 = vpop.xlane.xlu2 %266 }
 0x299   :  { %v3109_v7 = vpop.eup %3108 }
 0x29a   :  { %v433_v8 = vpop.xlane.xlu0 %432  ;;  %v275_v9 = vmul.f32 %v3109_v7, %v3103_v55 }
 0x29b   :  { %v443_v10 = vsub.f32 %v427_v58, %v433_v8 }
 0x29c   :  { %2826 = vmatmul.msk.f32.vlgmr.msrb.gmra.mxu2 %vm234_vm2, %v275_v9 }
 0x29d   :  { %v447_v14 = vmul.f32 1.442695, %v443_v10  ;;  %613 = vmatpush.msrb.mxu2 %v91_v42 }
 0x29f   :  { %3110 = vpow2.f32 %v447_v14 }
 0x2a0   :  { %3112 = vpow2.f32 %v257_v18 }
 0x2a1   :  { %3114 = vpow2.f32 %v449_v23 }
 0x2a4   :  { %2836 = vmatmul.msk.f32.vlgmr.msra.gmra.mxu2 %vm161_vm1, %v389_v47 }
 0x2a5   :  { %v3111_v20 = vpop.eup %3110 }
 0x2a6   :  { %v455_v22 = vsel %vm234_vm2, %v3111_v20, 0.0  ;;  %v3113_v24 = vpop.eup %3112 }
 0x2a7   :  { %456 = vadd.xlane.f32.xlu2 %v455_v22  ;;  %v268_v26 = vsel %vm234_vm2, %v3113_v24, 0.0  ;;  %v3115_v29 = vpop.eup %3114 }
 0x2a8   :  { %v458_v30 = vsel %vm234_vm2, %v3115_v29, 0.0 }
 0x2ac   :  { %2837 = vmatmul.msk.f32.gmra.mxu2 %vm161_vm1, %v391_v48 }
 0x2ad   :  { %v3024_v25 = vpop.permute.xlu0 %3023 }
 0x2ae   :  { %v3025_v27 = vunpack.i.l.bf16 %v3024_v25  ;;  %v3026_v28 = vunpack.i.h.bf16 %v3024_v25 }
 0x2af   :  { %269 = vadd.xlane.f32.xlu2 %v268_v26 }
 0x2b0   :  { %340 = vmatpush.msrb.mxu3 %v3025_v27 }
 0x2b2   :  { %341 = vmatpush.msrb.mxu3 %v3026_v28 }
 0x2b7   :  { %459 = vadd.xlane.f32.xlu2 %v458_v30 }
 0x2cf   :  { %627 = vrot.lane.b32.xlu2 %v3487_v15, %s3381_s23 }
 0x2d7   :  { %672 = vrot.lane.b32.xlu2 %v3477_v11, %s3379_s21 }
 0x2d8   :  { %v264_v31 = vpop.xlane.xlu0 %263 }
 0x2d9   :  { %3116 = vrcp.f32 %v264_v31 }
 0x2da   :  { %3118 = vrcp.f32 %v267_v32 }
 0x2df   :  { %v3117_v33 = vpop.eup %3116 }
 0x2e0   :  { %v276_v34 = vmul.f32 %v3117_v33, %v3107_v1  ;;  %v3119_v35 = vpop.eup %3118 }
 0x2e1   :  { %v277_v36 = vmul.f32 %v3119_v35, %v3541_v57 }
 0x2e2   :  { %2827 = vmatmul.msk.f32.vlgmr.msra.gmra.mxu3 %vm234_vm2, %v276_v34 }
 0x2ea   :  { %2828 = vmatmul.msk.f32.vlgmr.msrb.gmra.mxu3 %vm234_vm2, %v277_v36 }
 0x2eb   :  { %v3029_v37 = vpop.permute.xlu0 %3028 }
 0x2ec   :  { %v3030_v38 = vunpack.i.l.bf16 %v3029_v37  ;;  %v3031_v39 = vunpack.i.h.bf16 %v3029_v37 }
 0x2ee   :  { %501 = vmatpush.msra.mxu3 %v3030_v38 }
 0x2f0   :  { %502 = vmatpush.msra.mxu3 %v3031_v39 }
 0x2f2   :  { %2850 = vmatpush.xpose.msk.msrb.mxu3 %vm161_vm1, %v634_v40 }
 0x2f3   :  { %v632_v41 = vpop.permute.xlu0 %631 }
 0x2f6   :  { %2851 = vmatpush.xpose.msk.msrb.mxu3 %vm161_vm1, %v632_v41 }
 0x2fb   :  { %v630_v60 = vpop.permute.xlu0 %629 }
 0x31a   :  { %v457_v43 = vpop.xlane.xlu2 %456 }
 0x31f   :  { %v308_v44 = vpop.f32.mrf.mxu2 }
 0x320   :  { %2846 = vmatmul.msk.f32.vlgmr.msrb.gmra.mxu2 %vm161_vm1, %v308_v44 }
 0x322   :  { %v270_v45 = vpop.xlane.xlu2 %269 }
 0x323   :  { %3120 = vrcp.f32 %v270_v45 }
 0x324   :  { %3122 = vrcp.f32 %v457_v43 }
 0x327   :  { %v421_v46 = vpop.f32.mrf.mxu2 }
 0x328   :  { %v429_v47 = vmul.f32 0.35355338, %v421_v46 }
 0x329   :  { %v3121_v48 = vpop.eup %3120 }
 0x32a   :  { %v437_v49 = vsel %vm234_vm2, %v429_v47, -inf  ;;  %v278_v50 = vmul.f32 %v3121_v48, %v3113_v24  ;;  %v460_v51 = vpop.xlane.xlu2 %459  ;;  %v3123_v52 = vpop.eup %3122 }
 0x32b   :  { %438 = vmax.xlane.f32.xlu0 %v437_v49  ;;  %3124 = vrcp.f32 %v460_v51  ;;  %v471_v55 = vmul.f32 %v3123_v52, %v3111_v20 }
 0x32c   :  { %2829 = vmatmul.msk.f32.gmra.mxu3 %vm234_vm2, %v278_v50 }
 0x32f   :  { %v424_v53 = vpop.f32.mrf.mxu2 }
 0x330   :  { %v430_v54 = vmul.f32 0.35355338, %v424_v53 }
 0x331   :  { %v3125_v57 = vpop.eup %3124 }
 0x332   :  { %v440_v56 = vsel %vm234_vm2, %v430_v54, -inf  ;;  %v472_v58 = vmul.f32 %v3125_v57, %v3115_v29  ;;  %v628_v59 = vpop.permute.xlu2 %627 }
 0x333   :  { %441 = vmax.xlane.f32.xlu1 %v440_v56 }
 0x334   :  { %2838 = vmatmul.msk.f32.vlgmr.msra.gmra.mxu3 %vm234_vm2, %v471_v55 }
 0x33a   :  { %v673_v22 = vpop.permute.xlu2 %672 }
 0x33c   :  { %2839 = vmatmul.msk.f32.gmra.mxu3 %vm234_vm2, %v472_v58 }
 0x33f   :  { %3033 = vrot.lane.b32.xlu0 %v3548_v61, %s3380_s22 }
 0x344   :  { %2852 = vmatmul.msk.f32.vlgmr.msrb.gmra.mxu3 %vm161_vm1, %v628_v59 }
 0x347   :  { %666 = vrot.lane.b32.xlu0 %v3489_v16, %s3381_s23 }
 0x34c   :  { %670 = vrot.lane.b32.xlu1 %v3489_v16, %s3379_s21  ;;  %2853 = vmatmul.msk.f32.gmra.mxu3 %vm161_vm1, %v630_v60 }
 0x34f   :  { %874 = vrot.lane.b32.xlu0 %v3481_v13, %s3382_s27 }
 0x357   :  { %668 = vrot.lane.b32.xlu0 %v3477_v11, %s3381_s23 }
 0x365   :  { %v311_v62 = vpop.f32.mrf.mxu3 }
 0x366   :  { %2847 = vmatmul.msk.f32.gmra.mxu2 %vm161_vm1, %v311_v62 }
 0x36d   :  { %v343_v63 = vpop.f32.mrf.mxu3 }
 0x36e   :  { %2848 = vmatmul.msk.f32.gmra.mxu2 %vm161_vm1, %v343_v63 }
 0x39e   :  { %v439_v1 = vpop.xlane.xlu0 %438 }
 0x39f   :  { %v445_v2 = vsub.f32 %v429_v47, %v439_v1 }
 0x3a1   :  { %v451_v3 = vmul.f32 1.442695, %v445_v2 }
 0x3a3   :  { %3126 = vpow2.f32 %v451_v3  ;;  %v3635_v55 = vpop.f32.mrf.mxu2 }
 0x3a6   :  { %v442_v5 = vpop.xlane.xlu1 %441 }
 0x3a7   :  { %v446_v7 = vsub.f32 %v430_v54, %v442_v5 }
 0x3a9   :  { %v3127_v8 = vpop.eup %3126  ;;  %v453_v9 = vmul.f32 1.442695, %v446_v7 }
 0x3aa   :  { %v461_v10 = vsel %vm234_vm2, %v3127_v8, 0.0 }
 0x3ab   :  { %3128 = vpow2.f32 %v453_v9  ;;  %462 = vadd.xlane.f32.xlu2 %v461_v10 }
 0x3af   :  { %v346_v12 = vpop.f32.mrf.mxu3 }
 0x3b0   :  { %2849 = vmatmul.msk.f32.gmra.mxu2 %vm161_vm1, %v346_v12 }
 0x3b1   :  { %v3129_v14 = vpop.eup %3128  ;;  %v3034_v18 = vpop.permute.xlu0 %3033 }
 0x3b2   :  { %v464_v19 = vsel %vm234_vm2, %v3129_v14, 0.0  ;;  %v3035_v20 = vunpack.i.l.bf16 %v3034_v18  ;;  %v3036_v21 = vunpack.i.h.bf16 %v3034_v18 }
 0x3b3   :  { %465 = vadd.xlane.f32.xlu1 %v464_v19 }
 0x3b4   :  { %536 = vmatpush.msrb.mxu0 %v3035_v20 }
 0x3b6   :  { %537 = vmatpush.msrb.mxu0 %v3036_v21 }
 0x3b7   :  { %v504_v23 = vpop.f32.mrf.mxu3 }
 0x3b8   :  { %2854 = vmatpush.xpose.msk.msra.mxu0 %vm161_vm1, %v673_v22  ;;  %2842 = vmatmul.msk.f32.vlgmr.msrb.gmra.mxu1 %vm161_vm1, %v504_v23 }
 0x3b9   :  { %v667_v24 = vpop.permute.xlu0 %666 }
 0x3be   :  { %v671_v25 = vpop.permute.xlu1 %670 }
 0x3bf   :  { %v507_v26 = vpop.f32.mrf.mxu3  ;;  %2855 = vmatpush.xpose.msk.msra.mxu0 %vm161_vm1, %v671_v25  ;;  %v93_v25 = vld [vmem:[%s4231_s2 + $0x10] sm:$0xff] }
 0x3c0   :  { %2843 = vmatmul.msk.f32.gmra.mxu1 %vm161_vm1, %v507_v26 }
 0x3c1   :  { %v875_v27 = vpop.permute.xlu0 %874  ;;  %850 = vmatpush.msra.mxu1 %v93_v25 }
 0x3c2   :  { %2866 = vmatpush.xpose.msk.msra.mxu2 %vm161_vm1, %v875_v27 }
 0x3c3   :  { %872 = vrot.lane.b32.xlu2 %v3487_v15, %s3382_s27 }
 0x3c7   :  { %v660_v28 = vpop.f32.mrf.mxu3 }
 0x3c8   :  { %v705_v29 = vmul.f32 0.35355338, %v660_v28 }
 0x3c9   :  { %v669_v39 = vpop.permute.xlu0 %668 }
 0x3ca   :  { %v709_v30 = vsel %vm234_vm2, %v705_v29, -inf }
 0x3cb   :  { %870 = vrot.lane.b32.xlu2 %v3481_v13, %s3383_s0  ;;  %710 = vmax.xlane.f32.xlu0 %v709_v30 }
 0x3cc   :  { %868 = vrot.lane.b32.xlu1 %v3487_v15, %s3383_s0 }
 0x3cf   :  { %v663_v31 = vpop.f32.mrf.mxu3 }
 0x3d0   :  { %v706_v32 = vmul.f32 0.35355338, %v663_v31 }
 0x3d2   :  { %v712_v33 = vsel %vm234_vm2, %v706_v32, -inf }
 0x3df   :  { %3038 = vrot.lane.b32.xlu0 %v3503_v17, %s3384_s30 }
 0x3e7   :  { %907 = vrot.lane.b32.xlu0 %v3489_v16, %s3383_s0 }
 0x3e9   :  { %v3638_v57 = vpop.f32.mrf.mxu2 }
 0x3ef   :  { %909 = vrot.lane.b32.xlu0 %v3477_v11, %s3383_s0 }
 0x3f6   :  { %713 = vmax.xlane.f32.xlu1 %v712_v33 }
 0x41e   :  { %v463_v13 = vpop.xlane.xlu2 %462 }
 0x41f   :  { %3130 = vrcp.f32 %v463_v13 }
 0x425   :  { %v3131_v34 = vpop.eup %3130 }
 0x426   :  { %v466_v35 = vpop.xlane.xlu1 %465  ;;  %v873_v15 = vpop.permute.xlu2 %872  ;;  %v473_v36 = vmul.f32 %v3131_v34, %v3127_v8 }
 0x427   :  { %3132 = vrcp.f32 %v466_v35  ;;  %2867 = vmatpush.xpose.msk.msra.mxu2 %vm161_vm1, %v873_v15 }
 0x428   :  { %2840 = vmatmul.msk.f32.vlgmr.msrb.gmra.mxu0 %vm234_vm2, %v473_v36 }
 0x42d   :  { %v3133_v37 = vpop.eup %3132 }
 0x42e   :  { %v474_v38 = vmul.f32 %v3133_v37, %v3129_v14  ;;  %v871_v44 = vpop.permute.xlu2 %870 }
 0x430   :  { %2841 = vmatmul.msk.f32.gmra.mxu0 %vm234_vm2, %v474_v38 }
 0x438   :  { %2856 = vmatmul.msk.f32.vlgmr.msra.gmra.mxu0 %vm161_vm1, %v667_v24 }
 0x43e   :  { %v869_v40 = vpop.permute.xlu1 %868  ;;  %v711_v41 = vpop.xlane.xlu0 %710 }
 0x43f   :  { %v721_v42 = vsub.f32 %v705_v29, %v711_v41  ;;  %2868 = vmatmul.msk.f32.vlgmr.msra.gmra.mxu2 %vm161_vm1, %v869_v40 }
 0x440   :  { %2857 = vmatmul.msk.f32.gmra.mxu0 %vm161_vm1, %v669_v39 }
 0x441   :  { %v725_v43 = vmul.f32 1.442695, %v721_v42 }
 0x443   :  { %3134 = vpow2.f32 %v725_v43 }
 0x447   :  { %2869 = vmatmul.msk.f32.gmra.mxu2 %vm161_vm1, %v871_v44 }
 0x449   :  { %v3135_v45 = vpop.eup %3134 }
 0x44a   :  { %v733_v46 = vsel %vm234_vm2, %v3135_v45, 0.0 }
 0x44b   :  { %734 = vadd.xlane.f32.xlu2 %v733_v46 }
 0x451   :  { %v3039_v47 = vpop.permute.xlu0 %3038 }
 0x452   :  { %v3040_v48 = vunpack.i.l.bf16 %v3039_v47  ;;  %v3041_v49 = vunpack.i.h.bf16 %v3039_v47 }
 0x454   :  { %779 = vmatpush.msra.mxu3 %v3040_v48 }
 0x456   :  { %780 = vmatpush.msra.mxu3 %v3041_v49 }
 0x459   :  { %v908_v23 = vpop.permute.xlu0 %907 }
 0x461   :  { %v910_v24 = vpop.permute.xlu0 %909 }
 0x463   :  { %913 = vrot.lane.b32.xlu2 %v3477_v11, %s3382_s27  ;;  %v3641_v11 = vpop.f32.mrf.mxu2 }
 0x469   :  { %v714_v50 = vpop.xlane.xlu1 %713 }
 0x46a   :  { %v722_v51 = vsub.f32 %v706_v32, %v714_v50 }
 0x46b   :  { %v3644_v63 = vpop.f32.mrf.mxu2 }
 0x46c   :  { %v727_v52 = vmul.f32 1.442695, %v722_v51 }
 0x46e   :  { %3136 = vpow2.f32 %v727_v52 }
 0x474   :  { %v3137_v53 = vpop.eup %3136 }
 0x475   :  { %v736_v54 = vsel %vm234_vm2, %v3137_v53, 0.0 }
 0x476   :  { %737 = vadd.xlane.f32.xlu1 %v736_v54 }
 0x48f   :  { %911 = vrot.lane.b32.xlu1 %v3489_v16, %s3382_s27 }
 0x4a5   :  { %v539_v56 = vpop.f32.mrf.mxu0 }
 0x4a6   :  { %2844 = vmatmul.msk.f32.gmra.mxu1 %vm161_vm1, %v539_v56 }
 0x4ad   :  { %v542_v58 = vpop.f32.mrf.mxu0 }
 0x4ae   :  { %2845 = vmatmul.msk.f32.gmra.mxu1 %vm161_vm1, %v542_v58 }
 0x4b5   :  { %v699_v59 = vpop.f32.mrf.mxu0 }
 0x4b6   :  { %v707_v60 = vmul.f32 0.35355338, %v699_v59 }
 0x4b8   :  { %v715_v62 = vsel %vm234_vm2, %v707_v60, -inf }
 0x4b9   :  { %716 = vmax.xlane.f32.xlu2 %v715_v62 }
 0x4bd   :  { %v702_v16 = vpop.f32.mrf.mxu0 }
 0x4be   :  { %v708_v0 = vmul.f32 0.35355338, %v702_v16  ;;  %v735_v1 = vpop.xlane.xlu2 %734 }
 0x4bf   :  { %3138 = vrcp.f32 %v735_v1 }
 0x4c0   :  { %v718_v2 = vsel %vm234_vm2, %v708_v0, -inf }
 0x4c1   :  { %719 = vmax.xlane.f32.xlu1 %v718_v2 }
 0x4c2   :  { %v901_v3 = vpop.f32.mrf.mxu2 }
 0x4c3   :  { %v946_v5 = vmul.f32 0.35355338, %v901_v3 }
 0x4c5   :  { %v3139_v7 = vpop.eup %3138  ;;  %v950_v8 = vsel %vm234_vm2, %v946_v5, -inf }
 0x4c6   :  { %v749_v9 = vmul.f32 %v3139_v7, %v3135_v45  ;;  %951 = vmax.xlane.f32.xlu0 %v950_v8  ;;  %v914_v10 = vpop.permute.xlu2 %913 }
 0x4c7   :  { %2870 = vmatpush.xpose.msk.msrb.mxu3 %vm161_vm1, %v914_v10 }
 0x4c8   :  { %2858 = vmatmul.msk.f32.vlgmr.msra.gmra.mxu3 %vm234_vm2, %v749_v9 }
 0x4ca   :  { %v904_v12 = vpop.f32.mrf.mxu2 }
 0x4cb   :  { %v947_v14 = vmul.f32 0.35355338, %v904_v12 }
 0x4cd   :  { %v953_v18 = vsel %vm234_vm2, %v947_v14, -inf }
 0x4ce   :  { %954 = vmax.xlane.f32.xlu2 %v953_v18 }
 0x4da   :  { %3043 = vrot.lane.b32.xlu0 %v3548_v61, %s3384_s30 }
 0x4e9   :  { %v738_v19 = vpop.xlane.xlu1 %737 }
 0x4ea   :  { %3140 = vrcp.f32 %v738_v19 }
 0x4f0   :  { %v3141_v20 = vpop.eup %3140 }
 0x4f1   :  { %v750_v21 = vmul.f32 %v3141_v20, %v3137_v53 }
 0x4f3   :  { %2859 = vmatmul.msk.f32.gmra.mxu3 %vm234_vm2, %v750_v21 }
 0x501   :  { %v912_v22 = vpop.permute.xlu1 %911 }
 0x502   :  { %2871 = vmatpush.xpose.msk.msrb.mxu3 %vm161_vm1, %v912_v22 }
 0x505   :  { %2872 = vmatmul.msk.f32.vlgmr.msrb.gmra.mxu3 %vm161_vm1, %v908_v23 }
 0x50d   :  { %2873 = vmatmul.msk.f32.gmra.mxu3 %vm161_vm1, %v910_v24 }
 0x52c   :  { %v717_v26 = vpop.xlane.xlu2 %716 }
 0x52d   :  { %v723_v27 = vsub.f32 %v707_v60, %v717_v26 }
 0x52f   :  { %v729_v28 = vmul.f32 1.442695, %v723_v27  ;;  %v94_v27 = vld [vmem:[%s4231_s2 + $0x18] sm:$0xff] }
 0x530   :  { %1091 = vmatpush.msra.mxu3 %v94_v27 }
 0x531   :  { %3142 = vpow2.f32 %v729_v28 }
 0x534   :  { %v720_v29 = vpop.xlane.xlu1 %719 }
 0x535   :  { %v724_v30 = vsub.f32 %v708_v0, %v720_v29 }
 0x537   :  { %v3143_v31 = vpop.eup %3142  ;;  %v731_v32 = vmul.f32 1.442695, %v724_v30 }
 0x538   :  { %v739_v33 = vsel %vm234_vm2, %v3143_v31, 0.0 }
 0x539   :  { %3144 = vpow2.f32 %v731_v32  ;;  %v952_v13 = vpop.xlane.xlu0 %951  ;;  %740 = vadd.xlane.f32.xlu1 %v739_v33 }
 0x53a   :  { %v962_v34 = vsub.f32 %v946_v5, %v952_v13 }
 0x53c   :  { %v966_v35 = vmul.f32 1.442695, %v962_v34 }
 0x53e   :  { %3146 = vpow2.f32 %v966_v35 }
 0x53f   :  { %v3145_v15 = vpop.eup %3144 }
 0x540   :  { %v742_v36 = vsel %vm234_vm2, %v3145_v15, 0.0 }
 0x541   :  { %v955_v37 = vpop.xlane.xlu2 %954  ;;  %743 = vadd.xlane.f32.xlu2 %v742_v36  ;;  %v574_v36 = vpop.f32.mrf.mxu1 }
 0x542   :  { %v963_v38 = vsub.f32 %v947_v14, %v955_v37 }
 0x544   :  { %v3147_v39 = vpop.eup %3146  ;;  %v968_v40 = vmul.f32 1.442695, %v963_v38 }
 0x545   :  { %v974_v41 = vsel %vm234_vm2, %v3147_v39, 0.0 }
 0x546   :  { %3148 = vpow2.f32 %v968_v40  ;;  %975 = vadd.xlane.f32.xlu1 %v974_v41  ;;  %v3690_v41 = vld [vmem:[%s4236_s7] sm:$0x3f] }
 0x549   :  { %v577_v37 = vpop.f32.mrf.mxu1 }
 0x54b   :  { %v782_v42 = vpop.f32.mrf.mxu3 }
 0x54c   :  { %v3149_v43 = vpop.eup %3148  ;;  %v3044_v44 = vpop.permute.xlu0 %3043  ;;  %2862 = vmatmul.msk.f32.vlgmr.msra.gmra.mxu1 %vm161_vm1, %v782_v42  ;;  %v616_v42 = vadd.f32 %v3635_v55, %v574_v36 }
 0x54d   :  { %v3045_v45 = vunpack.i.l.bf16 %v3044_v44  ;;  %v977_v46 = vsel %vm234_vm2, %v3149_v43, 0.0  ;;  %v3046_v47 = vunpack.i.h.bf16 %v3044_v44  ;;  %v1109_v44 = vperm.slane %v3690_v41, 0 }
 0x54e   :  { %978 = vadd.xlane.f32.xlu1 %v977_v46 }
 0x54f   :  { %814 = vmatpush.msrb.mxu0 %v3045_v45 }
 0x551   :  { %815 = vmatpush.msrb.mxu0 %v3046_v47  ;;  %v580_v38 = vpop.f32.mrf.mxu1 }
 0x559   :  { %3048 = vrot.lane.b32.xlu2 %v3503_v17, %s3385_s13 }
 0x561   :  { %3053 = vrot.lane.b32.xlu2 %v3548_v61, %s3385_s13 }
 0x576   :  { %v785_v48 = vpop.f32.mrf.mxu3 }
 0x577   :  { %2863 = vmatmul.msk.f32.gmra.mxu1 %vm161_vm1, %v785_v48 }
 0x588   :  { %v940_v49 = vpop.f32.mrf.mxu3 }
 0x589   :  { %v948_v50 = vmul.f32 0.35355338, %v940_v49  ;;  %v619_v49 = vadd.f32 %v3638_v57, %v577_v37  ;;  %v3386_v57 = vmov 32.0  }
 0x58b   :  { %v956_v51 = vsel %vm234_vm2, %v948_v50, -inf }
 0x58c   :  { %957 = vmax.xlane.f32.xlu0 %v956_v51 }
 0x590   :  { %v943_v52 = vpop.f32.mrf.mxu3 }
 0x591   :  { %v949_v53 = vmul.f32 0.35355338, %v943_v52 }
 0x593   :  { %v959_v54 = vsel %vm234_vm2, %v949_v53, -inf }
 0x594   :  { %960 = vmax.xlane.f32.xlu1 %v959_v54 }
 0x5ac   :  { %v741_v56 = vpop.xlane.xlu1 %740 }
 0x5ad   :  { %3150 = vrcp.f32 %v741_v56 }
 0x5b3   :  { %v3151_v58 = vpop.eup %3150 }
 0x5b4   :  { %v751_v17 = vmul.f32 %v3151_v58, %v3143_v31  ;;  %v744_v59 = vpop.xlane.xlu2 %743 }
 0x5b5   :  { %3152 = vrcp.f32 %v744_v59 }
 0x5b6   :  { %2860 = vmatmul.msk.f32.vlgmr.msrb.gmra.mxu0 %vm234_vm2, %v751_v17 }
 0x5b9   :  { %v976_v61 = vpop.xlane.xlu1 %975 }
 0x5ba   :  { %3154 = vrcp.f32 %v976_v61 }
 0x5bb   :  { %v3153_v60 = vpop.eup %3152 }
 0x5bc   :  { %v3049_v62 = vpop.permute.xlu2 %3048  ;;  %v752_v16 = vmul.f32 %v3153_v60, %v3145_v15 }
 0x5bd   :  { %v3050_v0 = vunpack.i.l.bf16 %v3049_v62  ;;  %v3051_v1 = vunpack.i.h.bf16 %v3049_v62 }
 0x5be   :  { %2861 = vmatmul.msk.f32.gmra.mxu0 %vm234_vm2, %v752_v16 }
 0x5bf   :  { %1020 = vmatpush.msra.mxu0 %v3050_v0 }
 0x5c0   :  { %v3155_v2 = vpop.eup %3154 }
 0x5c1   :  { %1021 = vmatpush.msra.mxu0 %v3051_v1  ;;  %v979_v3 = vpop.xlane.xlu1 %978  ;;  %v990_v5 = vmul.f32 %v3155_v2, %v3147_v39  ;;  %v583_v39 = vpop.f32.mrf.mxu1 }
 0x5c2   :  { %3156 = vrcp.f32 %v979_v3 }
 0x5c4   :  { %v3054_v7 = vpop.permute.xlu2 %3053 }
 0x5c5   :  { %v3055_v8 = vunpack.i.l.bf16 %v3054_v7  ;;  %v3056_v9 = vunpack.i.h.bf16 %v3054_v7 }
 0x5c6   :  { %2874 = vmatmul.msk.f32.vlgmr.msra.gmra.mxu0 %vm234_vm2, %v990_v5 }
 0x5c7   :  { %1055 = vmatpush.msrb.mxu2 %v3055_v8 }
 0x5c8   :  { %v3157_v10 = vpop.eup %3156 }
 0x5c9   :  { %1056 = vmatpush.msrb.mxu2 %v3056_v9  ;;  %v991_v12 = vmul.f32 %v3157_v10, %v3149_v43  ;;  %v852_v40 = vpop.f32.mrf.mxu1 }
 0x5ca   :  { %v864_v43 = vadd.f32 %v852_v40, %v616_v42 }
 0x5ce   :  { %2875 = vmatmul.msk.f32.gmra.mxu0 %vm234_vm2, %v991_v12 }
 0x5f4   :  { %v855_v48 = vpop.f32.mrf.mxu1 }
 0x5f5   :  { %v865_v51 = vadd.f32 %v855_v48, %v619_v49 }
 0x5ff   :  { %v958_v14 = vpop.xlane.xlu0 %957 }
 0x600   :  { %v964_v18 = vsub.f32 %v948_v50, %v958_v14 }
 0x602   :  { %v970_v19 = vmul.f32 1.442695, %v964_v18  ;;  %v622_v18 = vadd.f32 %v3641_v11, %v580_v38 }
 0x604   :  { %3158 = vpow2.f32 %v970_v19 }
 0x607   :  { %v961_v20 = vpop.xlane.xlu1 %960 }
 0x608   :  { %v965_v21 = vsub.f32 %v949_v53, %v961_v20 }
 0x60a   :  { %v3159_v22 = vpop.eup %3158  ;;  %v972_v23 = vmul.f32 1.442695, %v965_v21 }
 0x60b   :  { %v980_v24 = vsel %vm234_vm2, %v3159_v22, 0.0 }
 0x60c   :  { %3160 = vpow2.f32 %v972_v23  ;;  %981 = vadd.xlane.f32.xlu1 %v980_v24  ;;  %v625_v24 = vadd.f32 %v3644_v63, %v583_v39  ;;  %v98_v63 = vld [vmem:[%s4232_s3 + $0x18] sm:$0xff] }
 0x60d   :  { %1250 = vmatpush.msrb.mxu0 %v98_v63 }
 0x612   :  { %v3161_v25 = vpop.eup %3160 }
 0x613   :  { %v983_v26 = vsel %vm234_vm2, %v3161_v25, 0.0 }
 0x614   :  { %984 = vadd.xlane.f32.xlu1 %v983_v26 }
 0x633   :  { %v817_v28 = vpop.f32.mrf.mxu0 }
 0x634   :  { %2864 = vmatmul.msk.f32.gmra.mxu1 %vm161_vm1, %v817_v28 }
 0x63b   :  { %v820_v29 = vpop.f32.mrf.mxu0 }
 0x63c   :  { %2865 = vmatmul.msk.f32.gmra.mxu1 %vm161_vm1, %v820_v29 }
 0x643   :  { %v1023_v30 = vpop.f32.mrf.mxu0 }
 0x644   :  { %2878 = vmatmul.msk.f32.vlgmr.msra.gmra.mxu3 %vm161_vm1, %v1023_v30 }
 0x64b   :  { %v1026_v31 = vpop.f32.mrf.mxu0 }
 0x64c   :  { %2879 = vmatmul.msk.f32.gmra.mxu3 %vm161_vm1, %v1026_v31 }
 0x67f   :  { %v982_v32 = vpop.xlane.xlu1 %981 }
 0x680   :  { %3162 = vrcp.f32 %v982_v32  ;;  %v3265_v32 = vld [vmem:[#allocation2 + $0x18] sm:$0xff] }
 0x686   :  { %v3163_v33 = vpop.eup %3162 }
 0x687   :  { %v992_v13 = vmul.f32 %v3163_v33, %v3159_v22  ;;  %v985_v34 = vpop.xlane.xlu1 %984 }
 0x688   :  { %3164 = vrcp.f32 %v985_v34  ;;  %v96_v34 = vld [vmem:[%s4232_s3 + $0x8] sm:$0xff] }
 0x689   :  { %2876 = vmatmul.msk.f32.vlgmr.msrb.gmra.mxu2 %vm234_vm2, %v992_v13  ;;  %3166 = vrcp.f32 %v3386_v57  ;;  %v97_v13 = vld [vmem:[%s4232_s3 + $0x10] sm:$0xff] }
 0x68a   :  { %1251 = vmatpush.msrb.mxu0 %v97_v13 }
 0x68c   :  { %1252 = vmatpush.msrb.mxu0 %v96_v34 }
 0x68e   :  { %v3165_v35 = vpop.eup %3164 }
 0x68f   :  { %v993_v15 = vmul.f32 %v3165_v35, %v3161_v25  ;;  %v3264_v25 = vld [vmem:[#allocation2 + $0x10] sm:$0xff]  ;;  %v95_v35 = vld [vmem:[%s4232_s3] sm:$0xff] }
 0x690   :  { %1253 = vmatpush.msrb.mxu0 %v95_v35 }
 0x691   :  { %2877 = vmatmul.msk.f32.gmra.mxu2 %vm234_vm2, %v993_v15 }
 0x6b1   :  { %v858_v14 = vpop.f32.mrf.mxu1 }
 0x6b2   :  { %v866_v19 = vadd.f32 %v858_v14, %v622_v18 }
 0x6b9   :  { %v861_v23 = vpop.f32.mrf.mxu1 }
 0x6ba   :  { %v867_v27 = vadd.f32 %v861_v23, %v625_v24  ;;  %v3098_v23 = vld [vmem:[#allocation7] ss:$0 sm:$0xff] }
 0x6c7   :  { %v1093_v45 = vpop.f32.mrf.mxu3 }
 0x6c8   :  { %v1105_v46 = vadd.f32 %v1093_v45, %v864_v43 }
 0x6ca   :  { %v1110_v47 = vadd.f32 %v1109_v44, %v1105_v46 }
 0x6cc   :  { %v1114_v50 = vadd.f32 %v1110_v47, %v3467_v4  ;;  %v3167_v4 = vpop.eup %3166 }
 0x6cd   :  { %v1131_v61 = vmul.f32 32.0, %v3167_v4  ;;  %vm1135_vm3 = vweird.f32 %v3167_v4 }
 0x6ce   :  { %v1118_v52 = vsel %vm113_vm0, %v1114_v50, 0.0 }
 0x6cf   :  { %v1096_v53 = vpop.f32.mrf.mxu3  ;;  %1119 = vadd.xlane.f32.xlu2 %v1118_v52  ;;  %v1132_v60 = vsub.f32 1.0, %v1131_v61 }
 0x6d0   :  { %v1106_v54 = vadd.f32 %v1096_v53, %v865_v51 }
 0x6d1   :  { %v1133_v62 = vmul.f32 %v3167_v4, %v1132_v60 }
 0x6d2   :  { %v1111_v56 = vadd.f32 %v1109_v44, %v1106_v54  ;;  %v3739_v54 = vperm.slane %v3690_v41, 3 }
 0x6d3   :  { %v1134_v16 = vadd.f32 %v3167_v4, %v1133_v62  ;;  %v106_v62 = vld [vmem:[%s4233_s4 + $0x38] sm:$0xff] }
 0x6d4   :  { %v1115_v55 = vadd.f32 %v1111_v56, %v3472_v6  ;;  %1293 = vmatpush.msrb.mxu1 %v106_v62 }
 0x6d5   :  { %v3701_v0 = vsel %vm1135_vm3, %v3167_v4, %v1134_v16  ;;  %v105_v16 = vld [vmem:[%s4233_s4 + $0x30] sm:$0xff] }
 0x6d6   :  { %v1121_v58 = vsel %vm113_vm0, %v1115_v55, 0.0  ;;  %1294 = vmatpush.msrb.mxu1 %v105_v16 }
 0x6d7   :  { %1122 = vadd.xlane.f32.xlu1 %v1121_v58 }
 0x70c   :  { %v1058_v17 = vpop.f32.mrf.mxu2 }
 0x70d   :  { %2880 = vmatmul.msk.f32.gmra.mxu3 %vm161_vm1, %v1058_v17 }
 0x714   :  { %v1061_v59 = vpop.f32.mrf.mxu2 }
 0x715   :  { %2881 = vmatmul.msk.f32.gmra.mxu3 %vm161_vm1, %v1061_v59 }
 0x742   :  { %v1120_v6 = vpop.xlane.xlu2 %1119 }
 0x743   :  { %v1137_v1 = vmul.f32 %v3701_v0, %v1120_v6  ;;  %v104_v6 = vld [vmem:[%s4233_s4 + $0x28] sm:$0xff] }
 0x744   :  { %1295 = vmatpush.msrb.mxu1 %v104_v6 }
 0x745   :  { %v1141_v2 = vsub.f32 %v1114_v50, %v1137_v1  ;;  %v3736_v50 = vperm.slane %v3690_v41, 2  ;;  %v103_v1 = vld [vmem:[%s4233_s4 + $0x20] sm:$0xff] }
 0x746   :  { %1296 = vmatpush.msrb.mxu1 %v103_v1 }
 0x747   :  { %v1145_v3 = vmul.f32 %v1141_v2, %v1141_v2 }
 0x749   :  { %v1149_v5 = vsel %vm113_vm0, %v1145_v3, 0.0 }
 0x74a   :  { %1150 = vadd.xlane.f32.xlu1 %v1149_v5  ;;  %v1123_v7 = vpop.xlane.xlu1 %1122 }
 0x74b   :  { %v1138_v8 = vmul.f32 %v3701_v0, %v1123_v7 }
 0x74d   :  { %v3706_v9 = vsub.f32 %v1115_v55, %v1138_v8 }
 0x74f   :  { %v1146_v10 = vmul.f32 %v3706_v9, %v3706_v9 }
 0x751   :  { %v1152_v12 = vsel %vm113_vm0, %v1146_v10, 0.0 }
 0x752   :  { %1153 = vadd.xlane.f32.xlu0 %v1152_v12 }
 0x790   :  { %v1099_v20 = vpop.f32.mrf.mxu3 }
 0x791   :  { %v1107_v21 = vadd.f32 %v1099_v20, %v866_v19  ;;  %v101_v20 = vld [vmem:[%s4233_s4 + $0x10] sm:$0xff] }
 0x793   :  { %v1112_v22 = vadd.f32 %v1109_v44, %v1107_v21  ;;  %v100_v21 = vld [vmem:[%s4233_s4 + $0x8] sm:$0xff] }
 0x795   :  { %v3713_v26 = vadd.f32 %v3264_v25, %v1112_v22  ;;  %v99_v22 = vld [vmem:[%s4233_s4] sm:$0xff] }
 0x797   :  { %v1124_v28 = vsel %vm113_vm0, %v3713_v26, 0.0 }
 0x798   :  { %v1102_v29 = vpop.f32.mrf.mxu3  ;;  %1125 = vadd.xlane.f32.xlu1 %v1124_v28 }
 0x799   :  { %v1108_v30 = vadd.f32 %v1102_v29, %v867_v27 }
 0x79b   :  { %v1113_v31 = vadd.f32 %v1109_v44, %v1108_v30 }
 0x79d   :  { %v3717_v11 = vadd.f32 %v3265_v32, %v1113_v31 }
 0x79f   :  { %v1127_v33 = vsel %vm113_vm0, %v3717_v11, 0.0 }
 0x7a0   :  { %1128 = vadd.xlane.f32.xlu0 %v1127_v33 }
 0x7bd   :  { %v1151_v15 = vpop.xlane.xlu1 %1150 }
 0x7be   :  { %v1161_v36 = vmul.f32 %v1151_v15, %v3701_v0 }
 0x7c0   :  { %v1165_v37 = vadd.f32 1e-05, %v1161_v36 }
 0x7c2   :  { %3168 = vrsqrt.f32 %v1165_v37  ;;  %vm1175_vm5 = vweird.f32 %v1165_v37 }
 0x7c5   :  { %v1154_v38 = vpop.xlane.xlu0 %1153 }
 0x7c6   :  { %v1162_v39 = vmul.f32 %v1154_v38, %v3701_v0 }
 0x7c8   :  { %v3169_v40 = vpop.eup %3168  ;;  %v1166_v42 = vadd.f32 1e-05, %v1162_v39 }
 0x7c9   :  { %v1170_v43 = vmul.f32 %v3169_v40, %v1165_v37  ;;  %vm1176_vm4 = vweird.f32 %v3169_v40 }
 0x7ca   :  { %3170 = vrsqrt.f32 %v1166_v42  ;;  %vm1177_vm6 = vmor %vm1175_vm5, %vm1176_vm4  ;;  %vm1185_vm8 = vweird.f32 %v1166_v42 }
 0x7cb   :  { %v1171_v44 = vmul.f32 %v3169_v40, %v1170_v43 }
 0x7cd   :  { %v1172_v45 = vmul.f32 0.5, %v1171_v44 }
 0x7cf   :  { %v1173_v46 = vsub.f32 1.5, %v1172_v45 }
 0x7d0   :  { %v3171_v47 = vpop.eup %3170 }
 0x7d1   :  { %v1174_v48 = vmul.f32 %v3169_v40, %v1173_v46  ;;  %v1180_v49 = vmul.f32 %v3171_v47, %v1166_v42  ;;  %vm1186_vm7 = vweird.f32 %v3171_v47 }
 0x7d2   :  { %vm1187_vm9 = vmor %vm1185_vm8, %vm1186_vm7 }
 0x7d3   :  { %v1178_v51 = vsel %vm1177_vm6, %v3169_v40, %v1174_v48  ;;  %v1181_v52 = vmul.f32 %v3171_v47, %v1180_v49 }
 0x7d4   :  { %v1209_v53 = vmul.f32 %v1178_v51, %v1141_v2  ;;  %v102_v2 = vld [vmem:[%s4233_s4 + $0x18] sm:$0xff] }
 0x7d5   :  { %v1182_v56 = vmul.f32 0.5, %v1181_v52  ;;  %1297 = vmatpush.msrb.mxu1 %v102_v2 }
 0x7d6   :  { %v1214_v55 = vmul.f32 %v3736_v50, %v1209_v53 }
 0x7d7   :  { %v1183_v58 = vsub.f32 1.5, %v1182_v56  ;;  %1298 = vmatpush.msrb.mxu1 %v101_v20  ;;  %v1271_v56 = vperm.slane %v3690_v41, 1 }
 0x7d8   :  { %v3743_v17 = vadd.f32 %v3739_v54, %v1214_v55 }
 0x7d9   :  { %v1184_v59 = vmul.f32 %v3171_v47, %v1183_v58  ;;  %1299 = vmatpush.msrb.mxu1 %v100_v21 }
 0x7da   :  { %2882 = vmatmul.msk.f32.vlgmr.msrb.gmra.mxu0 %vm113_vm0, %v3743_v17 }
 0x7db   :  { %v1188_v57 = vsel %vm1187_vm9, %v3171_v47, %v1184_v59  ;;  %1300 = vmatpush.msrb.mxu1 %v99_v22 }
 0x7dc   :  { %v1210_v4 = vmul.f32 %v1188_v57, %v3706_v9 }
 0x7de   :  { %v1215_v61 = vmul.f32 %v3736_v50, %v1210_v4 }
 0x7e0   :  { %v3750_v60 = vadd.f32 %v3739_v54, %v1215_v61 }
 0x7e2   :  { %2883 = vmatmul.msk.f32.gmra.mxu0 %vm113_vm0, %v3750_v60 }
 0x80b   :  { %v1126_v3 = vpop.xlane.xlu1 %1125 }
 0x80c   :  { %v1139_v5 = vmul.f32 %v3701_v0, %v1126_v3 }
 0x80e   :  { %v1143_v7 = vsub.f32 %v3713_v26, %v1139_v5 }
 0x810   :  { %v1147_v8 = vmul.f32 %v1143_v7, %v1143_v7 }
 0x812   :  { %v1155_v9 = vsel %vm113_vm0, %v1147_v8, 0.0 }
 0x813   :  { %1156 = vadd.xlane.f32.xlu1 %v1155_v9  ;;  %v1129_v10 = vpop.xlane.xlu0 %1128 }
 0x814   :  { %v1140_v12 = vmul.f32 %v3701_v0, %v1129_v10 }
 0x816   :  { %v1144_v14 = vsub.f32 %v3717_v11, %v1140_v12 }
 0x818   :  { %v1148_v18 = vmul.f32 %v1144_v14, %v1144_v14 }
 0x81a   :  { %v1158_v19 = vsel %vm113_vm0, %v1148_v18, 0.0 }
 0x81b   :  { %1159 = vadd.xlane.f32.xlu0 %v1158_v19 }
 0x857   :  { %v1255_v24 = vpop.f32.mrf.mxu0 }
 0x858   :  { %v1256_v25 = vadd.f32 %v3098_v23, %v1255_v24 }
 0x85a   :  { %v1267_v26 = vmax.f32 %v1256_v25, 0.0 }
 0x85c   :  { %2886 = vmatmul.msk.f32.vlgmr.msrb.gmra.mxu1 %vm1272_vm10, %v1267_v26 }
 0x85f   :  { %v1258_v27 = vpop.f32.mrf.mxu0 }
 0x860   :  { %v1259_v28 = vadd.f32 %v3098_v23, %v1258_v27  ;;  %v2893_v27 = vld [vmem:[%s4230_s1 + $0x38] sm:$0xff] }
 0x861   :  { %1473 = vmatpush.msra.mxu2 %v2893_v27 }
 0x862   :  { %v1268_v29 = vmax.f32 %v1259_v28, 0.0  ;;  %v2892_v28 = vld [vmem:[%s4230_s1 + $0x30] sm:$0xff] }
 0x863   :  { %1474 = vmatpush.msra.mxu2 %v2892_v28 }
 0x864   :  { %2887 = vmatmul.msk.f32.gmra.mxu1 %vm1272_vm10, %v1268_v29  ;;  %v2891_v29 = vld [vmem:[%s4230_s1 + $0x28] sm:$0xff] }
 0x865   :  { %1475 = vmatpush.msra.mxu2 %v2891_v29 }
 0x886   :  { %v1157_v30 = vpop.xlane.xlu1 %1156 }
 0x887   :  { %v1163_v31 = vmul.f32 %v1157_v30, %v3701_v0  ;;  %v2890_v30 = vld [vmem:[%s4230_s1 + $0x20] sm:$0xff] }
 0x888   :  { %1476 = vmatpush.msra.mxu2 %v2890_v30 }
 0x889   :  { %v1167_v32 = vadd.f32 1e-05, %v1163_v31 }
 0x88b   :  { %3172 = vrsqrt.f32 %v1167_v32  ;;  %vm1195_vm12 = vweird.f32 %v1167_v32 }
 0x88e   :  { %v1160_v11 = vpop.xlane.xlu0 %1159 }
 0x88f   :  { %v1164_v33 = vmul.f32 %v1160_v11, %v3701_v0 }
 0x891   :  { %v3173_v63 = vpop.eup %3172  ;;  %v1168_v13 = vadd.f32 1e-05, %v1164_v33 }
 0x892   :  { %v1190_v34 = vmul.f32 %v3173_v63, %v1167_v32  ;;  %vm1196_vm11 = vweird.f32 %v3173_v63 }
 0x893   :  { %3174 = vrsqrt.f32 %v1168_v13  ;;  %vm1197_vm13 = vmor %vm1195_vm12, %vm1196_vm11  ;;  %vm1205_vm15 = vweird.f32 %v1168_v13 }
 0x894   :  { %v1191_v35 = vmul.f32 %v3173_v63, %v1190_v34 }
 0x896   :  { %v1192_v15 = vmul.f32 0.5, %v1191_v35 }
 0x898   :  { %v1193_v36 = vsub.f32 1.5, %v1192_v15 }
 0x899   :  { %v3175_v37 = vpop.eup %3174 }
 0x89a   :  { %v1194_v38 = vmul.f32 %v3173_v63, %v1193_v36  ;;  %v1200_v39 = vmul.f32 %v3175_v37, %v1168_v13  ;;  %vm1206_vm14 = vweird.f32 %v3175_v37 }
 0x89b   :  { %vm1207_vm3 = vmor %vm1205_vm15, %vm1206_vm14 }
 0x89c   :  { %v1198_v40 = vsel %vm1197_vm13, %v3173_v63, %v1194_v38  ;;  %v1201_v42 = vmul.f32 %v3175_v37, %v1200_v39 }
 0x89d   :  { %v1211_v43 = vmul.f32 %v1198_v40, %v1143_v7 }
 0x89e   :  { %v1202_v44 = vmul.f32 0.5, %v1201_v42  ;;  %v3822_v42 = vperm.slane %v3690_v41, 4 }
 0x89f   :  { %v1216_v45 = vmul.f32 %v3736_v50, %v1211_v43 }
 0x8a0   :  { %v1203_v46 = vsub.f32 1.5, %v1202_v44 }
 0x8a1   :  { %v1221_v47 = vadd.f32 %v3739_v54, %v1216_v45 }
 0x8a2   :  { %v1204_v48 = vmul.f32 %v3175_v37, %v1203_v46  ;;  %v3825_v46 = vperm.slane %v3690_v41, 5 }
 0x8a3   :  { %2884 = vmatmul.msk.f32.gmra.mxu0 %vm113_vm0, %v1221_v47 }
 0x8a4   :  { %v1208_v49 = vsel %vm1207_vm3, %v3175_v37, %v1204_v48 }
 0x8a5   :  { %v1212_v51 = vmul.f32 %v1208_v49, %v1144_v14 }
 0x8a7   :  { %v1217_v52 = vmul.f32 %v3736_v50, %v1212_v51 }
 0x8a9   :  { %v1222_v53 = vadd.f32 %v3739_v54, %v1217_v52 }
 0x8ab   :  { %2885 = vmatmul.msk.f32.gmra.mxu0 %vm113_vm0, %v1222_v53 }
 0x8d9   :  { %v1302_v55 = vpop.f32.mrf.mxu1 }
 0x8da   :  { %v1303_v58 = vadd.f32 %v1302_v55, %v1271_v56 }
 0x8dc   :  { %v1314_v59 = vadd.f32 %v1303_v58, %v3743_v17 }
 0x8de   :  { %v1318_v57 = vsel %vm113_vm0, %v1314_v59, 0.0 }
 0x8df   :  { %1319 = vadd.xlane.f32.xlu1 %v1318_v57 }
 0x8e1   :  { %v1305_v4 = vpop.f32.mrf.mxu1 }
 0x8e2   :  { %v1306_v61 = vadd.f32 %v1305_v4, %v1271_v56 }
 0x8e4   :  { %v1315_v62 = vadd.f32 %v1306_v61, %v3750_v60 }
 0x8e6   :  { %v1321_v16 = vsel %vm113_vm0, %v1315_v62, 0.0 }
 0x8e7   :  { %1322 = vadd.xlane.f32.xlu2 %v1321_v16 }
 0x920   :  { %v1261_v50 = vpop.f32.mrf.mxu0 }
 0x921   :  { %v1262_v54 = vadd.f32 %v3098_v23, %v1261_v50 }
 0x923   :  { %v1269_v6 = vmax.f32 %v1262_v54, 0.0 }
 0x925   :  { %2888 = vmatmul.msk.f32.gmra.mxu1 %vm1272_vm10, %v1269_v6 }
 0x928   :  { %v1264_v1 = vpop.f32.mrf.mxu0 }
 0x929   :  { %v1265_v2 = vadd.f32 %v3098_v23, %v1264_v1  ;;  %v3843_v1 = vld [vmem:[#allocation5 + $0x1] ss:$0 sm:$0xff] }
 0x92b   :  { %v1270_v3 = vmax.f32 %v1265_v2, 0.0 }
 0x92d   :  { %2889 = vmatmul.msk.f32.gmra.mxu1 %vm1272_vm10, %v1270_v3 }
 0x952   :  { %v1320_v17 = vpop.xlane.xlu1 %1319 }
 0x953   :  { %v1330_v5 = vmul.f32 %v1320_v17, %v3701_v0 }
 0x955   :  { %v1334_v7 = vsub.f32 %v1314_v59, %v1330_v5 }
 0x957   :  { %v1338_v8 = vmul.f32 %v1334_v7, %v1334_v7 }
 0x959   :  { %v1342_v60 = vsel %vm113_vm0, %v1338_v8, 0.0 }
 0x95a   :  { %v1323_v9 = vpop.xlane.xlu2 %1322  ;;  %1343 = vadd.xlane.f32.xlu0 %v1342_v60 }
 0x95b   :  { %v1331_v10 = vmul.f32 %v1323_v9, %v3701_v0 }
 0x95d   :  { %v1335_v12 = vsub.f32 %v1315_v62, %v1331_v10 }
 0x95f   :  { %v1339_v14 = vmul.f32 %v1335_v12, %v1335_v12 }
 0x961   :  { %v1345_v18 = vsel %vm113_vm0, %v1339_v14, 0.0 }
 0x962   :  { %1346 = vadd.xlane.f32.xlu1 %v1345_v18 }
 0x9a2   :  { %v1308_v19 = vpop.f32.mrf.mxu1 }
 0x9a3   :  { %v1309_v20 = vadd.f32 %v1308_v19, %v1271_v56 }
 0x9a5   :  { %v1316_v21 = vadd.f32 %v1309_v20, %v1221_v47 }
 0x9a7   :  { %v1324_v22 = vsel %vm113_vm0, %v1316_v21, 0.0 }
 0x9a8   :  { %1325 = vadd.xlane.f32.xlu2 %v1324_v22 }
 0x9aa   :  { %v1311_v23 = vpop.f32.mrf.mxu1 }
 0x9ab   :  { %v1312_v24 = vadd.f32 %v1311_v23, %v1271_v56 }
 0x9ad   :  { %v1317_v25 = vadd.f32 %v1312_v24, %v1222_v53 }
 0x9af   :  { %v1327_v26 = vsel %vm113_vm0, %v1317_v25, 0.0 }
 0x9b0   :  { %1328 = vadd.xlane.f32.xlu0 %v1327_v26 }
 0x9cd   :  { %v1344_v31 = vpop.xlane.xlu0 %1343 }
 0x9ce   :  { %v1354_v32 = vmul.f32 %v1344_v31, %v3701_v0 }
 0x9d0   :  { %v1358_v11 = vadd.f32 1e-05, %v1354_v32 }
 0x9d2   :  { %3176 = vrsqrt.f32 %v1358_v11  ;;  %vm1368_vm5 = vweird.f32 %v1358_v11 }
 0x9d5   :  { %v1347_v33 = vpop.xlane.xlu1 %1346 }
 0x9d6   :  { %v1355_v63 = vmul.f32 %v1347_v33, %v3701_v0 }
 0x9d8   :  { %v3177_v13 = vpop.eup %3176  ;;  %v1359_v34 = vadd.f32 1e-05, %v1355_v63 }
 0x9d9   :  { %v1363_v35 = vmul.f32 %v3177_v13, %v1358_v11  ;;  %vm1369_vm4 = vweird.f32 %v3177_v13 }
 0x9da   :  { %3178 = vrsqrt.f32 %v1359_v34  ;;  %vm1370_vm6 = vmor %vm1368_vm5, %vm1369_vm4  ;;  %vm1378_vm8 = vweird.f32 %v1359_v34 }
 0x9db   :  { %v1364_v15 = vmul.f32 %v3177_v13, %v1363_v35 }
 0x9dd   :  { %v1365_v36 = vmul.f32 0.5, %v1364_v15 }
 0x9df   :  { %v1366_v37 = vsub.f32 1.5, %v1365_v36 }
 0x9e0   :  { %v3179_v38 = vpop.eup %3178 }
 0x9e1   :  { %v1367_v39 = vmul.f32 %v3177_v13, %v1366_v37  ;;  %v1373_v40 = vmul.f32 %v3179_v38, %v1359_v34  ;;  %vm1379_vm7 = vweird.f32 %v3179_v38 }
 0x9e2   :  { %vm1380_vm9 = vmor %vm1378_vm8, %vm1379_vm7 }
 0x9e3   :  { %v1371_v43 = vsel %vm1370_vm6, %v3177_v13, %v1367_v39  ;;  %v1374_v44 = vmul.f32 %v3179_v38, %v1373_v40 }
 0x9e4   :  { %v1402_v45 = vmul.f32 %v1371_v43, %v1334_v7 }
 0x9e5   :  { %v1375_v47 = vmul.f32 0.5, %v1374_v44 }
 0x9e6   :  { %v1407_v48 = vmul.f32 %v3822_v42, %v1402_v45 }
 0x9e7   :  { %v1376_v49 = vsub.f32 1.5, %v1375_v47 }
 0x9e8   :  { %v3829_v51 = vadd.f32 %v3825_v46, %v1407_v48 }
 0x9e9   :  { %v1377_v52 = vmul.f32 %v3179_v38, %v1376_v49 }
 0x9ea   :  { %2911 = vmatmul.msk.f32.vlgmr.msra.gmra.mxu2 %vm113_vm0, %v3829_v51 }
 0x9eb   :  { %v1381_v53 = vsel %vm1380_vm9, %v3179_v38, %v1377_v52 }
 0x9ec   :  { %v1403_v56 = vmul.f32 %v1381_v53, %v1335_v12 }
 0x9ee   :  { %v1408_v55 = vmul.f32 %v3822_v42, %v1403_v56 }
 0x9f0   :  { %v3835_v41 = vadd.f32 %v3825_v46, %v1408_v55 }
 0x9f2   :  { %2912 = vmatmul.msk.f32.gmra.mxu2 %vm113_vm0, %v3835_v41 }
 0xa1b   :  { %v1326_v58 = vpop.xlane.xlu2 %1325 }
 0xa1c   :  { %v1332_v59 = vmul.f32 %v1326_v58, %v3701_v0 }
 0xa1e   :  { %v1336_v57 = vsub.f32 %v1316_v21, %v1332_v59 }
 0xa20   :  { %v1340_v4 = vmul.f32 %v1336_v57, %v1336_v57 }
 0xa22   :  { %v1348_v61 = vsel %vm113_vm0, %v1340_v4, 0.0 }
 0xa23   :  { %1349 = vadd.xlane.f32.xlu1 %v1348_v61  ;;  %v1329_v62 = vpop.xlane.xlu0 %1328 }
 0xa24   :  { %v1333_v16 = vmul.f32 %v1329_v62, %v3701_v0 }
 0xa26   :  { %v1337_v50 = vsub.f32 %v1317_v25, %v1333_v16 }
 0xa28   :  { %v1341_v54 = vmul.f32 %v1337_v50, %v1337_v50 }
 0xa2a   :  { %v1351_v6 = vsel %vm113_vm0, %v1341_v54, 0.0 }
 0xa2b   :  { %1352 = vadd.xlane.f32.xlu2 %v1351_v6 }
 0xa6d   :  { %v1478_v2 = vpop.f32.mrf.mxu2 }
 0xa6e   :  { %v3846_v3 = vadd.f32 %v3843_v1, %v1478_v2 }
 0xa70   :  { %1492 = vrot.lane.b32.xlu1 %v3846_v3, %s3375_s17 }
 0xa75   :  { %v1481_v17 = vpop.f32.mrf.mxu2 }
 0xa76   :  { %v3851_v5 = vadd.f32 %v3843_v1, %v1481_v17 }
 0xa78   :  { %1494 = vrot.lane.b32.xlu0 %v3851_v5, %s3375_s17  ;;  %1682 = vrot.lane.b32.xlu1 %v3846_v3, %s3377_s19 }
 0xa79   :  { %1688 = vrot.lane.b32.xlu2 %v3851_v5, %s3376_s18 }
 0xa80   :  { %1686 = vrot.lane.b32.xlu0 %v3846_v3, %s3376_s18 }
 0xa81   :  { %1684 = vrot.lane.b32.xlu2 %v3851_v5, %s3377_s19 }
 0xa96   :  { %v1350_v7 = vpop.xlane.xlu1 %1349 }
 0xa97   :  { %v1356_v8 = vmul.f32 %v1350_v7, %v3701_v0 }
 0xa99   :  { %v1360_v60 = vadd.f32 1e-05, %v1356_v8 }
 0xa9b   :  { %3180 = vrsqrt.f32 %v1360_v60  ;;  %vm1388_vm12 = vweird.f32 %v1360_v60 }
 0xa9e   :  { %v1353_v9 = vpop.xlane.xlu2 %1352 }
 0xa9f   :  { %v1357_v10 = vmul.f32 %v1353_v9, %v3701_v0 }
 0xaa1   :  { %v3181_v12 = vpop.eup %3180  ;;  %v1361_v14 = vadd.f32 1e-05, %v1357_v10 }
 0xaa2   :  { %v1383_v18 = vmul.f32 %v3181_v12, %v1360_v60  ;;  %vm1389_vm11 = vweird.f32 %v3181_v12 }
 0xaa3   :  { %3182 = vrsqrt.f32 %v1361_v14  ;;  %vm1390_vm13 = vmor %vm1388_vm12, %vm1389_vm11  ;;  %vm1398_vm15 = vweird.f32 %v1361_v14 }
 0xaa4   :  { %v1384_v19 = vmul.f32 %v3181_v12, %v1383_v18 }
 0xaa6   :  { %v1385_v20 = vmul.f32 0.5, %v1384_v19 }
 0xaa8   :  { %v1386_v21 = vsub.f32 1.5, %v1385_v20 }
 0xaa9   :  { %v3183_v22 = vpop.eup %3182 }
 0xaaa   :  { %v1387_v23 = vmul.f32 %v3181_v12, %v1386_v21  ;;  %v1393_v24 = vmul.f32 %v3183_v22, %v1361_v14  ;;  %vm1399_vm14 = vweird.f32 %v3183_v22 }
 0xaab   :  { %vm1400_vm3 = vmor %vm1398_vm15, %vm1399_vm14 }
 0xaac   :  { %v1391_v25 = vsel %vm1390_vm13, %v3181_v12, %v1387_v23  ;;  %v1394_v26 = vmul.f32 %v3183_v22, %v1393_v24 }
 0xaad   :  { %v1404_v27 = vmul.f32 %v1391_v25, %v1336_v57  ;;  %v3909_v57 = vpack.i.bf16 %v3846_v3, %v3851_v5 }
 0xaae   :  { %v1395_v28 = vmul.f32 0.5, %v1394_v26 }
 0xaaf   :  { %v1409_v29 = vmul.f32 %v3822_v42, %v1404_v27 }
 0xab0   :  { %v1396_v30 = vsub.f32 1.5, %v1395_v28 }
 0xab1   :  { %v3867_v31 = vadd.f32 %v3825_v46, %v1409_v29 }
 0xab2   :  { %v1397_v32 = vmul.f32 %v3183_v22, %v1396_v30 }
 0xab3   :  { %2913 = vmatmul.msk.f32.gmra.mxu2 %vm113_vm0, %v3867_v31 }
 0xab4   :  { %v1401_v11 = vsel %vm1400_vm3, %v3183_v22, %v1397_v32 }
 0xab5   :  { %v1405_v33 = vmul.f32 %v1401_v11, %v1337_v50 }
 0xab7   :  { %v1410_v63 = vmul.f32 %v3822_v42, %v1405_v33 }
 0xab9   :  { %v3873_v13 = vadd.f32 %v3825_v46, %v1410_v63 }
 0xabb   :  { %2914 = vmatmul.msk.f32.gmra.mxu2 %vm113_vm0, %v3873_v13 }
 0xad3   :  { %v1689_v15 = vpop.permute.xlu2 %1688 }
 0xadb   :  { %v1685_v38 = vpop.permute.xlu2 %1684 }
 0xae2   :  { %v1493_v35 = vpop.permute.xlu1 %1492 }
 0xaea   :  { %v1495_v34 = vpop.permute.xlu0 %1494  ;;  %v1683_v37 = vpop.permute.xlu1 %1682 }
 0xaeb   :  { %2915 = vmatpush.xpose.msk.msrb.mxu3 %vm161_vm1, %v1495_v34 }
 0xaef   :  { %2916 = vmatpush.xpose.msk.msrb.mxu3 %vm161_vm1, %v1493_v35 }
 0xaf2   :  { %2917 = vmatmul.msk.f32.vlgmr.msrb.gmra.mxu3 %vm161_vm1, %v3846_v3  ;;  %v1687_v36 = vpop.permute.xlu0 %1686 }
 0xaf3   :  { %2927 = vmatpush.xpose.msk.msra.mxu3 %vm161_vm1, %v1689_v15 }
 0xaf7   :  { %2928 = vmatpush.xpose.msk.msra.mxu3 %vm161_vm1, %v1687_v36 }
 0xafa   :  { %2918 = vmatmul.msk.f32.gmra.mxu3 %vm161_vm1, %v3851_v5 }
 0xb02   :  { %2929 = vmatmul.msk.f32.vlgmr.msra.gmra.mxu3 %vm161_vm1, %v1683_v37 }
 0xb0a   :  { %2930 = vmatmul.msk.f32.gmra.mxu3 %vm161_vm1, %v1685_v38 }
 0xb36   :  { %v1484_v39 = vpop.f32.mrf.mxu2 }
 0xb37   :  { %v3888_v40 = vadd.f32 %v3843_v1, %v1484_v39 }
 0xb39   :  { %1529 = vrot.lane.b32.xlu1 %v3888_v40, %s3375_s17  ;;  %1721 = vrot.lane.b32.xlu2 %v3888_v40, %s3377_s19 }
 0xb3e   :  { %v1487_v42 = vpop.f32.mrf.mxu2 }
 0xb3f   :  { %v3895_v43 = vadd.f32 %v3843_v1, %v1487_v42 }
 0xb41   :  { %1725 = vrot.lane.b32.xlu1 %v3888_v40, %s3376_s18  ;;  %1531 = vrot.lane.b32.xlu0 %v3895_v43, %s3375_s17  ;;  %v3943_v37 = vpack.i.bf16 %v3888_v40, %v3895_v43 }
 0xb49   :  { %1727 = vrot.lane.b32.xlu0 %v3895_v43, %s3376_s18 }
 0xb75   :  { %v1521_v44 = vpop.f32.mrf.mxu3 }
 0xb76   :  { %v1564_v45 = vmul.f32 0.35355338, %v1521_v44 }
 0xb78   :  { %v1568_v46 = vsel %vm234_vm2, %v1564_v45, -inf }
 0xb79   :  { %1569 = vmax.xlane.f32.xlu2 %v1568_v46 }
 0xb7d   :  { %v1524_v47 = vpop.f32.mrf.mxu3 }
 0xb7e   :  { %v1565_v48 = vmul.f32 0.35355338, %v1524_v47 }
 0xb80   :  { %v1571_v49 = vsel %vm234_vm2, %v1565_v48, -inf }
 0xb81   :  { %1572 = vmax.xlane.f32.xlu0 %v1571_v49 }
 0xb85   :  { %v1715_v52 = vpop.f32.mrf.mxu3 }
 0xb86   :  { %v1760_v53 = vmul.f32 0.35355338, %v1715_v52 }
 0xb88   :  { %v1764_v56 = vsel %vm234_vm2, %v1760_v53, -inf }
 0xb89   :  { %1765 = vmax.xlane.f32.xlu1 %v1764_v56 }
 0xb8d   :  { %v1718_v55 = vpop.f32.mrf.mxu3 }
 0xb8e   :  { %v1761_v58 = vmul.f32 0.35355338, %v1718_v55 }
 0xb90   :  { %v1767_v59 = vsel %vm234_vm2, %v1761_v58, -inf }
 0xb91   :  { %1768 = vmax.xlane.f32.xlu2 %v1767_v59 }
 0xb93   :  { %v1722_v50 = vpop.permute.xlu2 %1721 }
 0xb95   :  { %3063 = vrot.lane.b32.xlu0 %v3909_v57, %s3380_s22 }
 0xba2   :  { %3058 = vrot.lane.b32.xlu1 %v3909_v57, %s3378_s20 }
 0xba9   :  { %1723 = vrot.lane.b32.xlu2 %v3895_v43, %s3377_s19 }
 0xbab   :  { %v1530_v61 = vpop.permute.xlu1 %1529 }
 0xbb3   :  { %v1532_v4 = vpop.permute.xlu0 %1531  ;;  %v1726_v16 = vpop.permute.xlu1 %1725 }
 0xbb4   :  { %2919 = vmatpush.xpose.msk.msra.mxu0 %vm161_vm1, %v1532_v4 }
 0xbb8   :  { %2920 = vmatpush.xpose.msk.msra.mxu0 %vm161_vm1, %v1530_v61 }
 0xbbb   :  { %2921 = vmatmul.msk.f32.vlgmr.msra.gmra.mxu0 %vm161_vm1, %v3888_v40  ;;  %v1728_v62 = vpop.permute.xlu0 %1727 }
 0xbbc   :  { %2931 = vmatpush.xpose.msk.msrb.mxu0 %vm161_vm1, %v1728_v62 }
 0xbc0   :  { %2932 = vmatpush.xpose.msk.msrb.mxu0 %vm161_vm1, %v1726_v16 }
 0xbc3   :  { %2922 = vmatmul.msk.f32.gmra.mxu0 %vm161_vm1, %v3895_v43 }
 0xbcb   :  { %2933 = vmatmul.msk.f32.vlgmr.msrb.gmra.mxu0 %vm161_vm1, %v1722_v50 }
 0xbec   :  { %v1570_v54 = vpop.xlane.xlu2 %1569 }
 0xbed   :  { %v1580_v6 = vsub.f32 %v1564_v45, %v1570_v54 }
 0xbef   :  { %v1584_v1 = vmul.f32 1.442695, %v1580_v6 }
 0xbf1   :  { %3184 = vpow2.f32 %v1584_v1 }
 0xbf4   :  { %v1573_v2 = vpop.xlane.xlu0 %1572 }
 0xbf5   :  { %v1581_v17 = vsub.f32 %v1565_v48, %v1573_v2 }
 0xbf7   :  { %v3185_v7 = vpop.eup %3184  ;;  %v1586_v8 = vmul.f32 1.442695, %v1581_v17 }
 0xbf8   :  { %v1592_v60 = vsel %vm234_vm2, %v3185_v7, 0.0 }
 0xbf9   :  { %3186 = vpow2.f32 %v1586_v8  ;;  %1593 = vadd.xlane.f32.xlu0 %v1592_v60 }
 0xbfc   :  { %v1766_v9 = vpop.xlane.xlu1 %1765 }
 0xbfd   :  { %v1776_v10 = vsub.f32 %v1760_v53, %v1766_v9 }
 0xbff   :  { %v3187_v12 = vpop.eup %3186  ;;  %v1780_v14 = vmul.f32 1.442695, %v1776_v10 }
 0xc00   :  { %v1595_v18 = vsel %vm234_vm2, %v3187_v12, 0.0 }
 0xc01   :  { %3188 = vpow2.f32 %v1780_v14  ;;  %1596 = vadd.xlane.f32.xlu2 %v1595_v18 }
 0xc04   :  { %v1769_v19 = vpop.xlane.xlu2 %1768 }
 0xc05   :  { %v1777_v20 = vsub.f32 %v1761_v58, %v1769_v19 }
 0xc07   :  { %v3189_v21 = vpop.eup %3188  ;;  %v1782_v22 = vmul.f32 1.442695, %v1777_v20  ;;  %v3064_v28 = vpop.permute.xlu0 %3063 }
 0xc08   :  { %v1788_v23 = vsel %vm234_vm2, %v3189_v21, 0.0  ;;  %v3065_v32 = vunpack.i.l.bf16 %v3064_v28  ;;  %v3066_v11 = vunpack.i.h.bf16 %v3064_v28 }
 0xc09   :  { %3190 = vpow2.f32 %v1782_v22  ;;  %1789 = vadd.xlane.f32.xlu1 %v1788_v23  ;;  %v2895_v22 = vld [vmem:[%s4231_s2 + $0x28] sm:$0xff] }
 0xc0a   :  { %1905 = vmatpush.msrb.mxu3 %v2895_v22 }
 0xc0c   :  { %v1724_v24 = vpop.permute.xlu2 %1723 }
 0xc0d   :  { %1964 = vrot.lane.b32.xlu0 %v3846_v3, %s3379_s21  ;;  %2934 = vmatmul.msk.f32.gmra.mxu0 %vm161_vm1, %v1724_v24 }
 0xc0f   :  { %v3191_v25 = vpop.eup %3190 }
 0xc10   :  { %v1791_v26 = vsel %vm234_vm2, %v3191_v25, 0.0 }
 0xc11   :  { %1792 = vadd.xlane.f32.xlu2 %v1791_v26 }
 0xc14   :  { %v3059_v27 = vpop.permute.xlu1 %3058 }
 0xc15   :  { %v3060_v29 = vunpack.i.l.bf16 %v3059_v27  ;;  %1962 = vrot.lane.b32.xlu0 %v3851_v5, %s3381_s23  ;;  %v3061_v30 = vunpack.i.h.bf16 %v3059_v27 }
 0xc17   :  { %1638 = vmatpush.msra.mxu1 %v3060_v29 }
 0xc19   :  { %1639 = vmatpush.msra.mxu1 %v3061_v30 }
 0xc1b   :  { %1834 = vmatpush.msrb.mxu1 %v3065_v32 }
 0xc1d   :  { %1835 = vmatpush.msrb.mxu1 %v3066_v11 }
 0xc22   :  { %1966 = vrot.lane.b32.xlu1 %v3851_v5, %s3379_s21 }
 0xc29   :  { %1960 = vrot.lane.b32.xlu2 %v3846_v3, %s3381_s23 }
 0xc38   :  { %v1558_v33 = vpop.f32.mrf.mxu0 }
 0xc39   :  { %v1566_v63 = vmul.f32 0.35355338, %v1558_v33 }
 0xc3b   :  { %v1574_v34 = vsel %vm234_vm2, %v1566_v63, -inf }
 0xc3f   :  { %1575 = vmax.xlane.f32.xlu0 %v1574_v34 }
 0xc40   :  { %v1561_v35 = vpop.f32.mrf.mxu0 }
 0xc41   :  { %v1567_v15 = vmul.f32 0.35355338, %v1561_v35 }
 0xc43   :  { %v1577_v36 = vsel %vm234_vm2, %v1567_v15, -inf }
 0xc48   :  { %v1754_v48 = vpop.f32.mrf.mxu0 }
 0xc49   :  { %v1762_v60 = vmul.f32 0.35355338, %v1754_v48 }
 0xc4b   :  { %v1770_v14 = vsel %vm234_vm2, %v1762_v60, -inf }
 0xc4c   :  { %1578 = vmax.xlane.f32.xlu1 %v1577_v36 }
 0xc53   :  { %3068 = vrot.lane.b32.xlu0 %v3943_v37, %s3378_s20 }
 0xc6c   :  { %v1594_v38 = vpop.xlane.xlu0 %1593 }
 0xc6d   :  { %3192 = vrcp.f32 %v1594_v38 }
 0xc73   :  { %v3193_v39 = vpop.eup %3192 }
 0xc74   :  { %v1608_v42 = vmul.f32 %v3193_v39, %v3185_v7  ;;  %v1597_v44 = vpop.xlane.xlu2 %1596 }
 0xc75   :  { %3194 = vrcp.f32 %v1597_v44 }
 0xc76   :  { %2923 = vmatmul.msk.f32.vlgmr.msra.gmra.mxu1 %vm234_vm2, %v1608_v42 }
 0xc7b   :  { %v3195_v45 = vpop.eup %3194 }
 0xc7c   :  { %v1790_v46 = vpop.xlane.xlu1 %1789  ;;  %v1609_v47 = vmul.f32 %v3195_v45, %v3187_v12 }
 0xc7d   :  { %3196 = vrcp.f32 %v1790_v46 }
 0xc7e   :  { %2924 = vmatmul.msk.f32.gmra.mxu1 %vm234_vm2, %v1609_v47 }
 0xc7f   :  { %v1965_v62 = vpop.permute.xlu0 %1964 }
 0xc83   :  { %v3197_v49 = vpop.eup %3196 }
 0xc84   :  { %v1804_v52 = vmul.f32 %v3197_v49, %v3189_v21  ;;  %v1793_v53 = vpop.xlane.xlu2 %1792  ;;  %v2894_v21 = vld [vmem:[%s4231_s2 + $0x20] sm:$0xff] }
 0xc85   :  { %3198 = vrcp.f32 %v1793_v53  ;;  %1946 = vmatpush.msra.mxu0 %v2894_v21 }
 0xc86   :  { %2935 = vmatmul.msk.f32.vlgmr.msrb.gmra.mxu1 %vm234_vm2, %v1804_v52 }
 0xc87   :  { %v1963_v50 = vpop.permute.xlu0 %1962 }
 0xc8a   :  { %v1757_v56 = vpop.f32.mrf.mxu0 }
 0xc8b   :  { %v3199_v55 = vpop.eup %3198  ;;  %v1763_v58 = vmul.f32 0.35355338, %v1757_v56 }
 0xc8c   :  { %v1805_v59 = vmul.f32 %v3199_v55, %v3191_v25  ;;  %v1961_v16 = vpop.permute.xlu2 %1960 }
 0xc8d   :  { %v1773_v4 = vsel %vm234_vm2, %v1763_v58, -inf }
 0xc8e   :  { %1774 = vmax.xlane.f32.xlu1 %v1773_v4  ;;  %2936 = vmatmul.msk.f32.gmra.mxu1 %vm234_vm2, %v1805_v59 }
 0xc94   :  { %v1967_v61 = vpop.permute.xlu1 %1966 }
 0xc95   :  { %2947 = vmatpush.xpose.msk.msra.mxu1 %vm161_vm1, %v1967_v61 }
 0xc99   :  { %2948 = vmatpush.xpose.msk.msra.mxu1 %vm161_vm1, %v1965_v62 }
 0xc9c   :  { %2949 = vmatmul.msk.f32.vlgmr.msra.gmra.mxu1 %vm161_vm1, %v1961_v16 }
 0xca4   :  { %2950 = vmatmul.msk.f32.gmra.mxu1 %vm161_vm1, %v1963_v50 }
 0xcb2   :  { %v1576_v54 = vpop.xlane.xlu0 %1575 }
 0xcb3   :  { %v1582_v6 = vsub.f32 %v1566_v63, %v1576_v54 }
 0xcb5   :  { %v1588_v1 = vmul.f32 1.442695, %v1582_v6 }
 0xcb7   :  { %3200 = vpow2.f32 %v1588_v1 }
 0xcbd   :  { %v3201_v2 = vpop.eup %3200 }
 0xcbe   :  { %v1598_v17 = vsel %vm234_vm2, %v3201_v2, 0.0 }
 0xcbf   :  { %v1579_v7 = vpop.xlane.xlu1 %1578  ;;  %1599 = vadd.xlane.f32.xlu2 %v1598_v17 }
 0xcc0   :  { %v1583_v8 = vsub.f32 %v1567_v15, %v1579_v7 }
 0xcc2   :  { %v1590_v9 = vmul.f32 1.442695, %v1583_v8 }
 0xcc4   :  { %3202 = vpow2.f32 %v1590_v9 }
 0xcc5   :  { %v3069_v10 = vpop.permute.xlu0 %3068 }
 0xcc6   :  { %v3070_v12 = vunpack.i.l.bf16 %v3069_v10  ;;  %v3071_v18 = vunpack.i.h.bf16 %v3069_v10 }
 0xcc7   :  { %1771 = vmax.xlane.f32.xlu2 %v1770_v14 }
 0xcc8   :  { %1673 = vmatpush.msrb.mxu2 %v3070_v12 }
 0xcca   :  { %v3203_v19 = vpop.eup %3202  ;;  %1674 = vmatpush.msrb.mxu2 %v3071_v18 }
 0xccb   :  { %v1601_v20 = vsel %vm234_vm2, %v3203_v19, 0.0 }
 0xccc   :  { %1602 = vadd.xlane.f32.xlu1 %v1601_v20 }
 0xcdf   :  { %3073 = vrot.lane.b32.xlu2 %v3943_v37, %s3380_s22 }
 0xce5   :  { %2005 = vrot.lane.b32.xlu1 %v3895_v43, %s3379_s21 }
 0xce7   :  { %2003 = vrot.lane.b32.xlu2 %v3888_v40, %s3379_s21 }
 0xcf3   :  { %v1641_v23 = vpop.f32.mrf.mxu1 }
 0xcf4   :  { %2943 = vmatmul.msk.f32.vlgmr.msra.gmra.mxu0 %vm161_vm1, %v1641_v23 }
 0xcfb   :  { %v1644_v24 = vpop.f32.mrf.mxu1 }
 0xcfc   :  { %2944 = vmatmul.msk.f32.gmra.mxu0 %vm161_vm1, %v1644_v24 }
 0xd01   :  { %v1775_v25 = vpop.xlane.xlu1 %1774 }
 0xd02   :  { %v1779_v26 = vsub.f32 %v1763_v58, %v1775_v25 }
 0xd03   :  { %v1837_v27 = vpop.f32.mrf.mxu1 }
 0xd04   :  { %v1786_v28 = vmul.f32 1.442695, %v1779_v26  ;;  %2939 = vmatmul.msk.f32.vlgmr.msrb.gmra.mxu3 %vm161_vm1, %v1837_v27 }
 0xd06   :  { %3204 = vpow2.f32 %v1786_v28 }
 0xd0b   :  { %v1840_v29 = vpop.f32.mrf.mxu1 }
 0xd0c   :  { %v3974_v30 = vpop.eup %3204  ;;  %2940 = vmatmul.msk.f32.gmra.mxu3 %vm161_vm1, %v1840_v29 }
 0xd0d   :  { %v1797_v32 = vsel %vm234_vm2, %v3974_v30, 0.0 }
 0xd0f   :  { %1798 = vadd.xlane.f32.xlu1 %v1797_v32 }
 0xd19   :  { %v1993_v11 = vpop.f32.mrf.mxu1 }
 0xd1a   :  { %v2038_v33 = vmul.f32 0.35355338, %v1993_v11 }
 0xd1c   :  { %v2042_v63 = vsel %vm234_vm2, %v2038_v33, -inf }
 0xd1d   :  { %2043 = vmax.xlane.f32.xlu0 %v2042_v63 }
 0xd28   :  { %2207 = vrot.lane.b32.xlu1 %v3851_v5, %s3382_s27 }
 0xd30   :  { %2205 = vrot.lane.b32.xlu1 %v3846_v3, %s3382_s27 }
 0xd31   :  { %2001 = vrot.lane.b32.xlu0 %v3895_v43, %s3381_s23 }
 0xd32   :  { %v1600_v34 = vpop.xlane.xlu2 %1599 }
 0xd33   :  { %3206 = vrcp.f32 %v1600_v34 }
 0xd39   :  { %v3207_v35 = vpop.eup %3206  ;;  %3078 = vrot.lane.b32.xlu0 %v3909_v57, %s3384_s30 }
 0xd3a   :  { %v1610_v15 = vmul.f32 %v3207_v35, %v3201_v2  ;;  %v1772_v36 = vpop.xlane.xlu2 %1771 }
 0xd3b   :  { %v1778_v38 = vsub.f32 %v1762_v60, %v1772_v36 }
 0xd3c   :  { %2925 = vmatmul.msk.f32.vlgmr.msrb.gmra.mxu2 %vm234_vm2, %v1610_v15 }
 0xd3d   :  { %v1784_v39 = vmul.f32 1.442695, %v1778_v38 }
 0xd3f   :  { %3208 = vpow2.f32 %v1784_v39  ;;  %v1603_v42 = vpop.xlane.xlu1 %1602 }
 0xd40   :  { %3210 = vrcp.f32 %v1603_v42 }
 0xd41   :  { %2203 = vrot.lane.b32.xlu0 %v3851_v5, %s3383_s0  ;;  %v1996_v5 = vpop.f32.mrf.mxu1 }
 0xd42   :  { %v3074_v44 = vpop.permute.xlu2 %3073  ;;  %v2039_v53 = vmul.f32 0.35355338, %v1996_v5 }
 0xd43   :  { %v3075_v45 = vunpack.i.l.bf16 %v3074_v44  ;;  %v3076_v47 = vunpack.i.h.bf16 %v3074_v44 }
 0xd44   :  { %v2045_v55 = vsel %vm234_vm2, %v2039_v53, -inf }
 0xd45   :  { %v3209_v46 = vpop.eup %3208  ;;  %1869 = vmatpush.msra.mxu2 %v3075_v45 }
 0xd46   :  { %v3211_v48 = vpop.eup %3210  ;;  %v1794_v49 = vsel %vm234_vm2, %v3209_v46, 0.0 }
 0xd47   :  { %1795 = vadd.xlane.f32.xlu2 %v1794_v49  ;;  %1870 = vmatpush.msra.mxu2 %v3076_v47  ;;  %v1611_v52 = vmul.f32 %v3211_v48, %v3203_v19 }
 0xd49   :  { %2926 = vmatmul.msk.f32.gmra.mxu2 %vm234_vm2, %v1611_v52  ;;  %2246 = vrot.lane.b32.xlu0 %v3895_v43, %s3382_s27 }
 0xd4a   :  { %v2004_v58 = vpop.permute.xlu2 %2003 }
 0xd51   :  { %2244 = vrot.lane.b32.xlu0 %v3888_v40, %s3382_s27 }
 0xd57   :  { %v2006_v56 = vpop.permute.xlu1 %2005 }
 0xd58   :  { %2951 = vmatpush.xpose.msk.msrb.mxu2 %vm161_vm1, %v2006_v56 }
 0xd59   :  { %2242 = vrot.lane.b32.xlu0 %v3895_v43, %s3383_s0 }
 0xd5a   :  { %2046 = vmax.xlane.f32.xlu1 %v2045_v55  ;;  %v2896_v55 = vld [vmem:[%s4231_s2 + $0x30] sm:$0xff] }
 0xd5b   :  { %2183 = vmatpush.msra.mxu3 %v2896_v55 }
 0xd5c   :  { %2952 = vmatpush.xpose.msk.msrb.mxu2 %vm161_vm1, %v2004_v58 }
 0xd5f   :  { %1999 = vrot.lane.b32.xlu2 %v3888_v40, %s3381_s23 }
 0xd71   :  { %v4024_v29 = vpop.f32.mrf.mxu0 }
 0xd73   :  { %2201 = vrot.lane.b32.xlu1 %v3846_v3, %s3383_s0 }
 0xd79   :  { %v4027_v32 = vpop.f32.mrf.mxu0 }
 0xd82   :  { %v1799_v61 = vpop.xlane.xlu1 %1798 }
 0xd90   :  { %v2044_v59 = vpop.xlane.xlu0 %2043 }
 0xd91   :  { %v2054_v4 = vsub.f32 %v2038_v33, %v2044_v59 }
 0xd93   :  { %v2058_v62 = vmul.f32 1.442695, %v2054_v4 }
 0xd95   :  { %3212 = vpow2.f32 %v2058_v62 }
 0xd9a   :  { %v2208_v16 = vpop.permute.xlu1 %2207 }
 0xd9b   :  { %v3213_v50 = vpop.eup %3212  ;;  %2963 = vmatpush.xpose.msk.msrb.mxu0 %vm161_vm1, %v2208_v16 }
 0xd9c   :  { %v2066_v43 = vsel %vm234_vm2, %v3213_v50, 0.0 }
 0xd9d   :  { %2067 = vadd.xlane.f32.xlu2 %v2066_v43 }
 0xda2   :  { %v2206_v54 = vpop.permute.xlu1 %2205 }
 0xda3   :  { %2964 = vmatpush.xpose.msk.msrb.mxu0 %vm161_vm1, %v2206_v54  ;;  %v2002_v6 = vpop.permute.xlu0 %2001 }
 0xdab   :  { %v3079_v1 = vpop.permute.xlu0 %3078 }
 0xdac   :  { %v3080_v2 = vunpack.i.l.bf16 %v3079_v1  ;;  %v3081_v17 = vunpack.i.h.bf16 %v3079_v1 }
 0xdae   :  { %2112 = vmatpush.msrb.mxu1 %v3080_v2 }
 0xdb0   :  { %2113 = vmatpush.msrb.mxu1 %v3081_v17 }
 0xdb3   :  { %v2204_v3 = vpop.permute.xlu0 %2203 }
 0xdb5   :  { %2240 = vrot.lane.b32.xlu2 %v3888_v40, %s3383_s0 }
 0xdba   :  { %v1796_v7 = vpop.xlane.xlu2 %1795 }
 0xdbb   :  { %3214 = vrcp.f32 %v1796_v7  ;;  %v2247_v8 = vpop.permute.xlu0 %2246 }
 0xdbc   :  { %2967 = vmatpush.xpose.msk.msra.mxu1 %vm161_vm1, %v2247_v8  ;;  %3216 = vrcp.f32 %v1799_v61 }
 0xdbf   :  { %v1676_v60 = vpop.f32.mrf.mxu2 }
 0xdc0   :  { %2945 = vmatmul.msk.f32.gmra.mxu0 %vm161_vm1, %v1676_v60 }
 0xdc1   :  { %v3215_v9 = vpop.eup %3214 }
 0xdc2   :  { %v1806_v10 = vmul.f32 %v3215_v9, %v3209_v46  ;;  %v3217_v14 = vpop.eup %3216  ;;  %v2000_v22 = vpop.permute.xlu2 %1999 }
 0xdc3   :  { %v2245_v12 = vpop.permute.xlu0 %2244  ;;  %v1807_v18 = vmul.f32 %v3217_v14, %v3974_v30 }
 0xdc4   :  { %2937 = vmatmul.msk.f32.vlgmr.msra.gmra.mxu2 %vm234_vm2, %v1806_v10  ;;  %2968 = vmatpush.xpose.msk.msra.mxu1 %vm161_vm1, %v2245_v12 }
 0xdcb   :  { %v2243_v49 = vpop.permute.xlu0 %2242 }
 0xdcc   :  { %v1679_v40 = vpop.f32.mrf.mxu2  ;;  %2938 = vmatmul.msk.f32.gmra.mxu2 %vm234_vm2, %v1807_v18 }
 0xdcd   :  { %2946 = vmatmul.msk.f32.gmra.mxu0 %vm161_vm1, %v1679_v40  ;;  %v2047_v19 = vpop.xlane.xlu1 %2046 }
 0xdce   :  { %v2055_v20 = vsub.f32 %v2039_v53, %v2047_v19 }
 0xdd0   :  { %v2060_v21 = vmul.f32 1.442695, %v2055_v20 }
 0xdd2   :  { %3218 = vpow2.f32 %v2060_v21 }
 0xdd4   :  { %2953 = vmatmul.msk.f32.vlgmr.msrb.gmra.mxu2 %vm161_vm1, %v2000_v22 }
 0xdd8   :  { %v3219_v23 = vpop.eup %3218 }
 0xdd9   :  { %v2069_v24 = vsel %vm234_vm2, %v3219_v23, 0.0 }
 0xdda   :  { %2070 = vadd.xlane.f32.xlu1 %v2069_v24 }
 0xddc   :  { %2954 = vmatmul.msk.f32.gmra.mxu2 %vm161_vm1, %v2002_v6 }
 0xde5   :  { %v2202_v25 = vpop.permute.xlu1 %2201 }
 0xde6   :  { %2965 = vmatmul.msk.f32.vlgmr.msrb.gmra.mxu0 %vm161_vm1, %v2202_v25 }
 0xdee   :  { %2966 = vmatmul.msk.f32.gmra.mxu0 %vm161_vm1, %v2204_v3 }
 0xe10   :  { %v2068_v26 = vpop.xlane.xlu2 %2067 }
 0xe11   :  { %3220 = vrcp.f32 %v2068_v26 }
 0xe17   :  { %v3221_v27 = vpop.eup %3220 }
 0xe18   :  { %v2082_v28 = vmul.f32 %v3221_v27, %v3213_v50  ;;  %v2241_v42 = vpop.permute.xlu2 %2240 }
 0xe1a   :  { %2955 = vmatmul.msk.f32.vlgmr.msrb.gmra.mxu1 %vm234_vm2, %v2082_v28 }
 0xe3d   :  { %v4030_v63 = vpop.f32.mrf.mxu0 }
 0xe47   :  { %v1872_v30 = vpop.f32.mrf.mxu2 }
 0xe48   :  { %2941 = vmatmul.msk.f32.gmra.mxu3 %vm161_vm1, %v1872_v30 }
 0xe4a   :  { %v4034_v39 = vpop.f32.mrf.mxu0 }
 0xe4d   :  { %v2071_v11 = vpop.xlane.xlu1 %2070 }
 0xe4e   :  { %3222 = vrcp.f32 %v2071_v11 }
 0xe4f   :  { %v1875_v33 = vpop.f32.mrf.mxu2 }
 0xe50   :  { %2942 = vmatmul.msk.f32.gmra.mxu3 %vm161_vm1, %v1875_v33 }
 0xe54   :  { %v3223_v34 = vpop.eup %3222 }
 0xe55   :  { %v2083_v35 = vmul.f32 %v3223_v34, %v3219_v23 }
 0xe57   :  { %v2032_v15 = vpop.f32.mrf.mxu2  ;;  %2956 = vmatmul.msk.f32.gmra.mxu1 %vm234_vm2, %v2083_v35 }
 0xe58   :  { %v2040_v36 = vmul.f32 0.35355338, %v2032_v15 }
 0xe5a   :  { %v2048_v38 = vsel %vm234_vm2, %v2040_v36, -inf }
 0xe5b   :  { %2049 = vmax.xlane.f32.xlu0 %v2048_v38 }
 0xe5f   :  { %v2035_v44 = vpop.f32.mrf.mxu2  ;;  %2969 = vmatmul.msk.f32.vlgmr.msra.gmra.mxu1 %vm161_vm1, %v2241_v42 }
 0xe60   :  { %v2041_v45 = vmul.f32 0.35355338, %v2035_v44 }
 0xe62   :  { %v2051_v46 = vsel %vm234_vm2, %v2041_v45, -inf }
 0xe63   :  { %2052 = vmax.xlane.f32.xlu1 %v2051_v46  ;;  %v2234_v47 = vpop.f32.mrf.mxu0 }
 0xe64   :  { %v2279_v48 = vmul.f32 0.35355338, %v2234_v47 }
 0xe66   :  { %v2283_v52 = vsel %vm234_vm2, %v2279_v48, -inf }
 0xe67   :  { %2284 = vmax.xlane.f32.xlu2 %v2283_v52  ;;  %2970 = vmatmul.msk.f32.gmra.mxu1 %vm161_vm1, %v2243_v49 }
 0xe6b   :  { %v2237_v5 = vpop.f32.mrf.mxu0 }
 0xe6c   :  { %v2280_v53 = vmul.f32 0.35355338, %v2237_v5 }
 0xe6e   :  { %v2286_v56 = vsel %vm234_vm2, %v2280_v53, -inf }
 0xe6f   :  { %3083 = vrot.lane.b32.xlu0 %v3943_v37, %s3384_s30  ;;  %2287 = vmax.xlane.f32.xlu1 %v2286_v56 }
 0xe97   :  { %v2115_v58 = vpop.f32.mrf.mxu1 }
 0xe98   :  { %2959 = vmatmul.msk.f32.vlgmr.msra.gmra.mxu3 %vm161_vm1, %v2115_v58 }
 0xece   :  { %v2050_v59 = vpop.xlane.xlu0 %2049 }
 0xecf   :  { %v2056_v4 = vsub.f32 %v2040_v36, %v2050_v59 }
 0xed1   :  { %v2062_v61 = vmul.f32 1.442695, %v2056_v4 }
 0xed3   :  { %3224 = vpow2.f32 %v2062_v61 }
 0xed4   :  { %v2118_v62 = vpop.f32.mrf.mxu1 }
 0xed5   :  { %2960 = vmatmul.msk.f32.gmra.mxu3 %vm161_vm1, %v2118_v62 }
 0xed6   :  { %v2053_v16 = vpop.xlane.xlu1 %2052 }
 0xed7   :  { %v2057_v50 = vsub.f32 %v2041_v45, %v2053_v16 }
 0xed9   :  { %v3225_v43 = vpop.eup %3224  ;;  %v2064_v54 = vmul.f32 1.442695, %v2057_v50 }
 0xeda   :  { %v2285_v6 = vpop.xlane.xlu2 %2284  ;;  %v2072_v1 = vsel %vm234_vm2, %v3225_v43, 0.0 }
 0xedb   :  { %3226 = vpow2.f32 %v2064_v54  ;;  %v2295_v2 = vsub.f32 %v2279_v48, %v2285_v6  ;;  %2073 = vadd.xlane.f32.xlu1 %v2072_v1  ;;  %v2897_v1 = vld [vmem:[%s4231_s2 + $0x38] sm:$0xff] }
 0xedc   :  { %v2273_v7 = vpop.f32.mrf.mxu1  ;;  %2424 = vmatpush.msrb.mxu1 %v2897_v1 }
 0xedd   :  { %v2299_v17 = vmul.f32 1.442695, %v2295_v2  ;;  %v2281_v19 = vmul.f32 0.35355338, %v2273_v7 }
 0xedf   :  { %3228 = vpow2.f32 %v2299_v17  ;;  %v2289_v21 = vsel %vm234_vm2, %v2281_v19, -inf }
 0xee1   :  { %v3227_v3 = vpop.eup %3226  ;;  %v3084_v8 = vpop.permute.xlu0 %3083 }
 0xee2   :  { %v3085_v60 = vunpack.i.l.bf16 %v3084_v8  ;;  %v2288_v9 = vpop.xlane.xlu1 %2287  ;;  %v2075_v10 = vsel %vm234_vm2, %v3227_v3, 0.0  ;;  %v3086_v14 = vunpack.i.h.bf16 %v3084_v8  ;;  %v1907_v8 = vpop.f32.mrf.mxu3 }
 0xee3   :  { %v2296_v12 = vsub.f32 %v2280_v53, %v2288_v9  ;;  %2076 = vadd.xlane.f32.xlu1 %v2075_v10 }
 0xee4   :  { %2147 = vmatpush.msra.mxu2 %v3085_v60  ;;  %v2276_v22 = vpop.f32.mrf.mxu1 }
 0xee5   :  { %v3229_v18 = vpop.eup %3228  ;;  %v2301_v40 = vmul.f32 1.442695, %v2296_v12  ;;  %v2282_v24 = vmul.f32 0.35355338, %v2276_v22 }
 0xee6   :  { %2148 = vmatpush.msra.mxu2 %v3086_v14  ;;  %v2307_v20 = vsel %vm234_vm2, %v3229_v18, 0.0 }
 0xee7   :  { %3230 = vpow2.f32 %v2301_v40  ;;  %2308 = vadd.xlane.f32.xlu2 %v2307_v20  ;;  %v2292_v26 = vsel %vm234_vm2, %v2282_v24, -inf  ;;  %v4078_v40 = vld [vmem:[%s4236_s7 + $0x8] sm:$0x3f] }
 0xeea   :  { %v1910_v9 = vpop.f32.mrf.mxu3 }
 0xeeb   :  { %2290 = vmax.xlane.f32.xlu1 %v2289_v21  ;;  %v2442_v21 = vperm.slane %v4078_v40, 0 }
 0xeed   :  { %v3231_v23 = vpop.eup %3230 }
 0xeee   :  { %v2310_v25 = vsel %vm234_vm2, %v3231_v23, 0.0 }
 0xeef   :  { %2311 = vadd.xlane.f32.xlu2 %v2310_v25 }
 0xef2   :  { %v1913_v12 = vpop.f32.mrf.mxu3 }
 0xef3   :  { %2293 = vmax.xlane.f32.xlu1 %v2292_v26  ;;  %v1952_v26 = vadd.f32 %v4027_v32, %v1910_v9 }
 0xefa   :  { %v1916_v14 = vpop.f32.mrf.mxu3 }
 0xf07   :  { %3093 = vrot.lane.b32.xlu2 %v3943_v37, %s3385_s13 }
 0xf0c   :  { %3088 = vrot.lane.b32.xlu1 %v3909_v57, %s3385_s13 }
 0xf4e   :  { %v2074_v27 = vpop.xlane.xlu1 %2073 }
 0xf4f   :  { %3232 = vrcp.f32 %v2074_v27 }
 0xf55   :  { %v3233_v28 = vpop.eup %3232 }
 0xf56   :  { %v2084_v30 = vmul.f32 %v3233_v28, %v3225_v43  ;;  %v2077_v11 = vpop.xlane.xlu1 %2076 }
 0xf57   :  { %3234 = vrcp.f32 %v2077_v11 }
 0xf58   :  { %2957 = vmatmul.msk.f32.vlgmr.msra.gmra.mxu2 %vm234_vm2, %v2084_v30 }
 0xf5a   :  { %v2309_v33 = vpop.xlane.xlu2 %2308 }
 0xf5d   :  { %v3235_v34 = vpop.eup %3234 }
 0xf5e   :  { %v2291_v35 = vpop.xlane.xlu1 %2290  ;;  %v2085_v15 = vmul.f32 %v3235_v34, %v3227_v3 }
 0xf5f   :  { %v2297_v36 = vsub.f32 %v2281_v19, %v2291_v35  ;;  %v1949_v19 = vadd.f32 %v4024_v29, %v1907_v8  ;;  %v2898_v8 = vld [vmem:[%s4232_s3 + $0x20] sm:$0xff] }
 0xf60   :  { %2958 = vmatmul.msk.f32.gmra.mxu2 %vm234_vm2, %v2085_v15 }
 0xf61   :  { %v2303_v38 = vmul.f32 1.442695, %v2297_v36  ;;  %v1955_v36 = vadd.f32 %v4030_v63, %v1913_v12 }
 0xf62   :  { %v2312_v37 = vpop.xlane.xlu2 %2311 }
 0xf63   :  { %3236 = vpow2.f32 %v2303_v38 }
 0xf66   :  { %v2294_v42 = vpop.xlane.xlu1 %2293 }
 0xf67   :  { %v2298_v57 = vsub.f32 %v2282_v24, %v2294_v42 }
 0xf69   :  { %v3237_v44 = vpop.eup %3236  ;;  %v2305_v45 = vmul.f32 1.442695, %v2298_v57  ;;  %v1958_v57 = vadd.f32 %v4034_v39, %v1916_v14 }
 0xf6a   :  { %v3094_v46 = vpop.permute.xlu2 %3093  ;;  %v2313_v47 = vsel %vm234_vm2, %v3237_v44, 0.0 }
 0xf6b   :  { %3238 = vpow2.f32 %v2305_v45  ;;  %v3095_v48 = vunpack.i.l.bf16 %v3094_v46  ;;  %2314 = vadd.xlane.f32.xlu0 %v2313_v47  ;;  %v3096_v49 = vunpack.i.h.bf16 %v3094_v46 }
 0xf6c   :  { %3240 = vrcp.f32 %v2309_v33 }
 0xf6d   :  { %2388 = vmatpush.msra.mxu0 %v3095_v48  ;;  %3242 = vrcp.f32 %v2312_v37 }
 0xf6f   :  { %2389 = vmatpush.msra.mxu0 %v3096_v49 }
 0xf71   :  { %v3239_v52 = vpop.eup %3238 }
 0xf72   :  { %v2316_v5 = vsel %vm234_vm2, %v3239_v52, 0.0  ;;  %v3241_v56 = vpop.eup %3240 }
 0xf73   :  { %2317 = vadd.xlane.f32.xlu1 %v2316_v5  ;;  %v2323_v59 = vmul.f32 %v3241_v56, %v3229_v18  ;;  %v3243_v4 = vpop.eup %3242  ;;  %v2185_v18 = vpop.f32.mrf.mxu3 }
 0xf74   :  { %v2324_v61 = vmul.f32 %v3243_v4, %v3231_v23  ;;  %v2197_v20 = vadd.f32 %v2185_v18, %v1949_v19 }
 0xf7b   :  { %v2188_v25 = vpop.f32.mrf.mxu3 }
 0xf7c   :  { %v2198_v28 = vadd.f32 %v2188_v25, %v1952_v26 }
 0xf7e   :  { %v3089_v53 = vpop.permute.xlu1 %3088 }
 0xf7f   :  { %v3090_v55 = vunpack.i.l.bf16 %v3089_v53  ;;  %v3091_v58 = vunpack.i.h.bf16 %v3089_v53 }
 0xf81   :  { %2353 = vmatpush.msrb.mxu2 %v3090_v55 }
 0xf83   :  { %2354 = vmatpush.msrb.mxu2 %v3091_v58 }
 0xf84   :  { %2971 = vmatmul.msk.f32.vlgmr.msrb.gmra.mxu2 %vm234_vm2, %v2323_v59 }
 0xf8c   :  { %2972 = vmatmul.msk.f32.gmra.mxu2 %vm234_vm2, %v2324_v61 }
 0xfdb   :  { %v2150_v62 = vpop.f32.mrf.mxu2 }
 0xfdc   :  { %2961 = vmatmul.msk.f32.gmra.mxu3 %vm161_vm1, %v2150_v62 }
 0xfde   :  { %v2315_v16 = vpop.xlane.xlu0 %2314 }
 0xfdf   :  { %3244 = vrcp.f32 %v2315_v16 }
 0xfe3   :  { %v2153_v50 = vpop.f32.mrf.mxu2 }
 0xfe4   :  { %2962 = vmatmul.msk.f32.gmra.mxu3 %vm161_vm1, %v2153_v50 }
 0xfe5   :  { %v3245_v43 = vpop.eup %3244 }
 0xfe6   :  { %v2325_v54 = vmul.f32 %v3245_v43, %v3237_v44  ;;  %v2318_v6 = vpop.xlane.xlu1 %2317 }
 0xfe7   :  { %3246 = vrcp.f32 %v2318_v6 }
 0xfe8   :  { %2973 = vmatmul.msk.f32.vlgmr.msra.gmra.mxu0 %vm234_vm2, %v2325_v54 }
 0xfed   :  { %v3247_v2 = vpop.eup %3246 }
 0xfee   :  { %v2326_v17 = vmul.f32 %v3247_v2, %v3239_v52 }
 0xff0   :  { %2974 = vmatmul.msk.f32.gmra.mxu0 %vm234_vm2, %v2326_v17  ;;  %v2901_v17 = vld [vmem:[%s4232_s3 + $0x38] sm:$0xff] }
 0xff1   :  { %2576 = vmatpush.msra.mxu2 %v2901_v17 }
0x1007   :  { %v2356_v3 = vpop.f32.mrf.mxu2 }
0x1008   :  { %2975 = vmatmul.msk.f32.vlgmr.msrb.gmra.mxu1 %vm161_vm1, %v2356_v3  ;;  %v2900_v3 = vld [vmem:[%s4232_s3 + $0x30] sm:$0xff] }
0x1009   :  { %2577 = vmatpush.msra.mxu2 %v2900_v3 }
0x100f   :  { %v2359_v7 = vpop.f32.mrf.mxu2 }
0x1010   :  { %2976 = vmatmul.msk.f32.gmra.mxu1 %vm161_vm1, %v2359_v7  ;;  %v2899_v7 = vld [vmem:[%s4232_s3 + $0x28] sm:$0xff]  ;;  %s2798_s3 = sshll.u32 %s3387_s12, 4  ;;  %s2799_s3 = int_to_ptr.vmem [resolvable:$true] %s2798_s3 }
0x1011   :  { %2578 = vmatpush.msra.mxu2 %v2899_v7 }
0x1013   :  { %2579 = vmatpush.msra.mxu2 %v2898_v8  ;;  %v2903_v8 = vld [vmem:[%s4233_s4 + $0x48] sm:$0xff] }
0x105f   :  { %v2191_v15 = vpop.f32.mrf.mxu3 }
0x1060   :  { %v2199_v38 = vadd.f32 %v2191_v15, %v1955_v36 }
0x1065   :  { %v2391_v60 = vpop.f32.mrf.mxu0 }
0x1066   :  { %2977 = vmatmul.msk.f32.gmra.mxu1 %vm161_vm1, %v2391_v60 }
0x106d   :  { %v2394_v10 = vpop.f32.mrf.mxu0 }
0x106e   :  { %2978 = vmatmul.msk.f32.gmra.mxu1 %vm161_vm1, %v2394_v10 }
0x1085   :  { %v2426_v22 = vpop.f32.mrf.mxu1 }
0x1086   :  { %v2438_v23 = vadd.f32 %v2426_v22, %v2197_v20 }
0x1088   :  { %v2443_v24 = vadd.f32 %v2442_v21, %v2438_v23 }
0x108a   :  { %v2447_v27 = vadd.f32 %v2443_v24, %v3829_v51  ;;  %v2194_v51 = vpop.f32.mrf.mxu3 }
0x108b   :  { %v2200_v45 = vadd.f32 %v2194_v51, %v1958_v57 }
0x108c   :  { %v2451_v30 = vsel %vm113_vm0, %v2447_v27, 0.0 }
0x108d   :  { %v2429_v11 = vpop.f32.mrf.mxu1  ;;  %2452 = vadd.xlane.f32.xlu2 %v2451_v30 }
0x108e   :  { %v2439_v33 = vadd.f32 %v2429_v11, %v2198_v28  ;;  %v2544_v11 = vperm.slane %v4078_v40, 3 }
0x1090   :  { %v2444_v34 = vadd.f32 %v2442_v21, %v2439_v33 }
0x1092   :  { %v2448_v29 = vadd.f32 %v2444_v34, %v3835_v41 }
0x1094   :  { %v2454_v35 = vsel %vm113_vm0, %v2448_v29, 0.0 }
0x1095   :  { %2455 = vadd.xlane.f32.xlu0 %v2454_v35 }
0x10e3   :  { %v2432_v37 = vpop.f32.mrf.mxu1 }
0x10e4   :  { %v2440_v32 = vadd.f32 %v2432_v37, %v2199_v38 }
0x10e6   :  { %v2445_v42 = vadd.f32 %v2442_v21, %v2440_v32 }
0x10e8   :  { %v2449_v44 = vadd.f32 %v2445_v42, %v3867_v31 }
0x10ea   :  { %v2457_v46 = vsel %vm113_vm0, %v2449_v44, 0.0 }
0x10eb   :  { %v2435_v47 = vpop.f32.mrf.mxu1  ;;  %2458 = vadd.xlane.f32.xlu0 %v2457_v46  ;;  %v2908_v46 = vld [vmem:[%s4233_s4 + $0x70] sm:$0xff] }
0x10ec   :  { %v2441_v41 = vadd.f32 %v2435_v47, %v2200_v45  ;;  %v2909_v45 = vld [vmem:[%s4233_s4 + $0x78] sm:$0xff]  ;;  %v2907_v47 = vld [vmem:[%s4233_s4 + $0x68] sm:$0xff] }
0x10ed   :  { %2618 = vmatpush.msrb.mxu3 %v2909_v45 }
0x10ee   :  { %v2446_v48 = vadd.f32 %v2442_v21, %v2441_v41 }
0x10ef   :  { %2619 = vmatpush.msrb.mxu3 %v2908_v46 }
0x10f0   :  { %v2450_v49 = vadd.f32 %v2446_v48, %v3873_v13 }
0x10f1   :  { %2620 = vmatpush.msrb.mxu3 %v2907_v47 }
0x10f2   :  { %v2460_v63 = vsel %vm113_vm0, %v2450_v49, 0.0 }
0x10f3   :  { %2461 = vadd.xlane.f32.xlu0 %v2460_v63 }
0x1100   :  { %v2453_v52 = vpop.xlane.xlu2 %2452 }
0x1101   :  { %v2463_v5 = vmul.f32 %v2453_v52, %v3701_v0 }
0x1103   :  { %v2467_v53 = vsub.f32 %v2447_v27, %v2463_v5  ;;  %v4124_v27 = vperm.slane %v4078_v40, 2  ;;  %v2905_v5 = vld [vmem:[%s4233_s4 + $0x58] sm:$0xff] }
0x1105   :  { %v2471_v56 = vmul.f32 %v2467_v53, %v2467_v53 }
0x1107   :  { %v2475_v39 = vsel %vm113_vm0, %v2471_v56, 0.0 }
0x1108   :  { %2476 = vadd.xlane.f32.xlu1 %v2475_v39  ;;  %v2456_v31 = vpop.xlane.xlu0 %2455 }
0x1109   :  { %v2464_v55 = vmul.f32 %v2456_v31, %v3701_v0 }
0x110b   :  { %v2468_v58 = vsub.f32 %v2448_v29, %v2464_v55 }
0x110d   :  { %v2472_v59 = vmul.f32 %v2468_v58, %v2468_v58 }
0x110f   :  { %v2478_v4 = vsel %vm113_vm0, %v2472_v59, 0.0 }
0x1110   :  { %2479 = vadd.xlane.f32.xlu0 %v2478_v4 }
0x115e   :  { %v2459_v13 = vpop.xlane.xlu0 %2458 }
0x115f   :  { %v2465_v61 = vmul.f32 %v2459_v13, %v3701_v0 }
0x1161   :  { %v4098_v62 = vsub.f32 %v2449_v44, %v2465_v61 }
0x1163   :  { %v2473_v16 = vmul.f32 %v4098_v62, %v4098_v62 }
0x1165   :  { %v2481_v50 = vsel %vm113_vm0, %v2473_v16, 0.0 }
0x1166   :  { %2482 = vadd.xlane.f32.xlu1 %v2481_v50  ;;  %v2462_v43 = vpop.xlane.xlu0 %2461 }
0x1167   :  { %v2466_v54 = vmul.f32 %v2462_v43, %v3701_v0 }
0x1169   :  { %v4104_v6 = vsub.f32 %v2450_v49, %v2466_v54  ;;  %v2906_v49 = vld [vmem:[%s4233_s4 + $0x60] sm:$0xff] }
0x116a   :  { %2621 = vmatpush.msrb.mxu3 %v2906_v49 }
0x116b   :  { %v2474_v1 = vmul.f32 %v4104_v6, %v4104_v6 }
0x116c   :  { %2622 = vmatpush.msrb.mxu3 %v2905_v5 }
0x116d   :  { %v2484_v2 = vsel %vm113_vm0, %v2474_v1, 0.0 }
0x116e   :  { %2485 = vadd.xlane.f32.xlu2 %v2484_v2 }
0x117b   :  { %v2477_v60 = vpop.xlane.xlu1 %2476 }
0x117c   :  { %v2487_v9 = vmul.f32 %v2477_v60, %v3701_v0  ;;  %v2902_v60 = vld [vmem:[%s4233_s4 + $0x40] sm:$0xff] }
0x117e   :  { %v2491_v10 = vadd.f32 1e-05, %v2487_v9 }
0x1180   :  { %3248 = vrsqrt.f32 %v2491_v10  ;;  %vm2501_vm2 = vweird.f32 %v2491_v10 }
0x1183   :  { %v2480_v12 = vpop.xlane.xlu0 %2479 }
0x1184   :  { %v2488_v14 = vmul.f32 %v2480_v12, %v3701_v0 }
0x1186   :  { %v3249_v18 = vpop.eup %3248  ;;  %v2492_v19 = vadd.f32 1e-05, %v2488_v14 }
0x1187   :  { %v2496_v20 = vmul.f32 %v3249_v18, %v2491_v10  ;;  %vm2502_vm1 = vweird.f32 %v3249_v18 }
0x1188   :  { %3250 = vrsqrt.f32 %v2492_v19  ;;  %vm2503_vm4 = vmor %vm2501_vm2, %vm2502_vm1  ;;  %vm2511_vm6 = vweird.f32 %v2492_v19 }
0x1189   :  { %v2497_v21 = vmul.f32 %v3249_v18, %v2496_v20 }
0x118b   :  { %v2498_v22 = vmul.f32 0.5, %v2497_v21 }
0x118d   :  { %v2499_v23 = vsub.f32 1.5, %v2498_v22 }
0x118e   :  { %v3251_v24 = vpop.eup %3250 }
0x118f   :  { %v2500_v25 = vmul.f32 %v3249_v18, %v2499_v23  ;;  %v2506_v26 = vmul.f32 %v3251_v24, %v2492_v19  ;;  %vm2512_vm5 = vweird.f32 %v3251_v24 }
0x1190   :  { %vm2513_vm7 = vmor %vm2511_vm6, %vm2512_vm5 }
0x1191   :  { %v2504_v28 = vsel %vm2503_vm4, %v3249_v18, %v2500_v25  ;;  %v2507_v30 = vmul.f32 %v3251_v24, %v2506_v26  ;;  %v2597_v26 = vperm.slane %v4078_v40, 1 }
0x1192   :  { %v2535_v33 = vmul.f32 %v2504_v28, %v2467_v53 }
0x1193   :  { %v2508_v34 = vmul.f32 0.5, %v2507_v30 }
0x1194   :  { %v2540_v29 = vmul.f32 %v4124_v27, %v2535_v33 }
0x1195   :  { %v2509_v35 = vsub.f32 1.5, %v2508_v34 }
0x1196   :  { %v4128_v15 = vadd.f32 %v2544_v11, %v2540_v29 }
0x1197   :  { %v2510_v36 = vmul.f32 %v3251_v24, %v2509_v35 }
0x1198   :  { %2979 = vmatmul.msk.f32.vlgmr.msra.gmra.mxu2 %vm113_vm0, %v4128_v15 }
0x1199   :  { %v2514_v38 = vsel %vm2513_vm7, %v3251_v24, %v2510_v36 }
0x119a   :  { %v2536_v37 = vmul.f32 %v2514_v38, %v2468_v58 }
0x119c   :  { %v2541_v32 = vmul.f32 %v4124_v27, %v2536_v37 }
0x119e   :  { %v4133_v42 = vadd.f32 %v2544_v11, %v2541_v32 }
0x11a0   :  { %2980 = vmatmul.msk.f32.gmra.mxu2 %vm113_vm0, %v4133_v42 }
0x11d9   :  { %v2483_v51 = vpop.xlane.xlu1 %2482 }
0x11da   :  { %v2489_v57 = vmul.f32 %v2483_v51, %v3701_v0 }
0x11dc   :  { %v2493_v44 = vadd.f32 1e-05, %v2489_v57 }
0x11de   :  { %3252 = vrsqrt.f32 %v2493_v44  ;;  %vm2521_vm9 = vweird.f32 %v2493_v44 }
0x11e1   :  { %v2486_v41 = vpop.xlane.xlu2 %2485 }
0x11e2   :  { %v2490_v48 = vmul.f32 %v2486_v41, %v3701_v0 }
0x11e4   :  { %v3253_v63 = vpop.eup %3252  ;;  %v2494_v52 = vadd.f32 1e-05, %v2490_v48 }
0x11e5   :  { %v2516_v53 = vmul.f32 %v3253_v63, %v2493_v44  ;;  %vm2522_vm8 = vweird.f32 %v3253_v63 }
0x11e6   :  { %3254 = vrsqrt.f32 %v2494_v52  ;;  %vm2523_vm11 = vmor %vm2521_vm9, %vm2522_vm8  ;;  %vm2531_vm13 = vweird.f32 %v2494_v52 }
0x11e7   :  { %v2517_v56 = vmul.f32 %v3253_v63, %v2516_v53 }
0x11e9   :  { %v2518_v39 = vmul.f32 0.5, %v2517_v56 }
0x11eb   :  { %v2519_v31 = vsub.f32 1.5, %v2518_v39 }
0x11ec   :  { %v3255_v55 = vpop.eup %3254 }
0x11ed   :  { %v2520_v58 = vmul.f32 %v3253_v63, %v2519_v31  ;;  %v2526_v59 = vmul.f32 %v3255_v55, %v2494_v52  ;;  %vm2532_vm12 = vweird.f32 %v3255_v55 }
0x11ee   :  { %vm2533_vm14 = vmor %vm2531_vm13, %vm2532_vm12 }
0x11ef   :  { %v2524_v4 = vsel %vm2523_vm11, %v3253_v63, %v2520_v58  ;;  %v2527_v13 = vmul.f32 %v3255_v55, %v2526_v59 }
0x11f0   :  { %v2537_v61 = vmul.f32 %v2524_v4, %v4098_v62  ;;  %v2904_v62 = vld [vmem:[%s4233_s4 + $0x50] sm:$0xff] }
0x11f1   :  { %v2528_v16 = vmul.f32 0.5, %v2527_v13  ;;  %2623 = vmatpush.msrb.mxu3 %v2904_v62 }
0x11f2   :  { %v2542_v50 = vmul.f32 %v4124_v27, %v2537_v61 }
0x11f3   :  { %v2529_v43 = vsub.f32 1.5, %v2528_v16  ;;  %2624 = vmatpush.msrb.mxu3 %v2903_v8  ;;  %v2744_v16 = vld [vmem:[%s4237_s8 + $0x18] sm:$0xff] }
0x11f4   :  { %v2547_v54 = vadd.f32 %v2544_v11, %v2542_v50  ;;  %2773 = vmatpush.msrb.mxu0 %v2744_v16  ;;  %v2743_v50 = vld [vmem:[%s4237_s8 + $0x10] sm:$0xff] }
0x11f5   :  { %v2530_v1 = vmul.f32 %v3255_v55, %v2529_v43  ;;  %2625 = vmatpush.msrb.mxu3 %v2902_v60  ;;  %v2742_v43 = vld [vmem:[%s4237_s8 + $0x8] sm:$0xff] }
0x11f6   :  { %2981 = vmatmul.msk.f32.gmra.mxu2 %vm113_vm0, %v2547_v54  ;;  %2774 = vmatpush.msrb.mxu0 %v2743_v50 }
0x11f7   :  { %v2534_v2 = vsel %vm2533_vm14, %v3255_v55, %v2530_v1 }
0x11f8   :  { %v2538_v17 = vmul.f32 %v2534_v2, %v4104_v6  ;;  %v3100_v6 = vld [vmem:[#allocation7 + $0x1] ss:$0 sm:$0xff]  ;;  %2775 = vmatpush.msrb.mxu0 %v2742_v43 }
0x11fa   :  { %v2543_v3 = vmul.f32 %v4124_v27, %v2538_v17 }
0x11fc   :  { %v2548_v7 = vadd.f32 %v2544_v11, %v2543_v3 }
0x11fe   :  { %2982 = vmatmul.msk.f32.gmra.mxu2 %vm113_vm0, %v2548_v7 }
0x121b   :  { %v2581_v9 = vpop.f32.mrf.mxu2 }
0x121c   :  { %v2582_v10 = vadd.f32 %v3100_v6, %v2581_v9 }
0x121e   :  { %v2593_v12 = vmax.f32 %v2582_v10, 0.0 }
0x1220   :  { %2983 = vmatmul.msk.f32.vlgmr.msrb.gmra.mxu3 %vm1272_vm10, %v2593_v12 }
0x1223   :  { %v2584_v14 = vpop.f32.mrf.mxu2 }
0x1224   :  { %v2585_v18 = vadd.f32 %v3100_v6, %v2584_v14 }
0x1226   :  { %v2594_v19 = vmax.f32 %v2585_v18, 0.0 }
0x1228   :  { %2984 = vmatmul.msk.f32.gmra.mxu3 %vm1272_vm10, %v2594_v19  ;;  %v2731_v19 = vperm.slane %v4078_v40, 4 }
0x1279   :  { %v2587_v20 = vpop.f32.mrf.mxu2 }
0x127a   :  { %v2588_v21 = vadd.f32 %v3100_v6, %v2587_v20 }
0x127c   :  { %v2595_v22 = vmax.f32 %v2588_v21, 0.0 }
0x127e   :  { %2985 = vmatmul.msk.f32.gmra.mxu3 %vm1272_vm10, %v2595_v22  ;;  %v2736_v22 = vperm.slane %v4078_v40, 5 }
0x1281   :  { %v2590_v23 = vpop.f32.mrf.mxu2 }
0x1282   :  { %v2591_v24 = vadd.f32 %v3100_v6, %v2590_v23 }
0x1284   :  { %v2596_v25 = vmax.f32 %v2591_v24, 0.0 }
0x1286   :  { %2986 = vmatmul.msk.f32.gmra.mxu3 %vm1272_vm10, %v2596_v25 }
0x12a3   :  { %v2627_v27 = vpop.f32.mrf.mxu3 }
0x12a4   :  { %v2628_v28 = vadd.f32 %v2627_v27, %v2597_v26 }
0x12a6   :  { %v2639_v30 = vadd.f32 %v2628_v28, %v4128_v15 }
0x12a8   :  { %v2643_v11 = vsel %vm113_vm0, %v2639_v30, 0.0 }
0x12a9   :  { %2644 = vadd.xlane.f32.xlu0 %v2643_v11 }
0x12ab   :  { %v2630_v33 = vpop.f32.mrf.mxu3 }
0x12ac   :  { %v2631_v34 = vadd.f32 %v2630_v33, %v2597_v26 }
0x12ae   :  { %v2640_v29 = vadd.f32 %v2631_v34, %v4133_v42 }
0x12b0   :  { %v2646_v35 = vsel %vm113_vm0, %v2640_v29, 0.0 }
0x12b1   :  { %2647 = vadd.xlane.f32.xlu1 %v2646_v35 }
0x1301   :  { %v2633_v36 = vpop.f32.mrf.mxu3 }
0x1302   :  { %v2634_v38 = vadd.f32 %v2633_v36, %v2597_v26 }
0x1304   :  { %v2641_v37 = vadd.f32 %v2634_v38, %v2547_v54  ;;  %v2741_v54 = vld [vmem:[%s4237_s8] sm:$0xff] }
0x1305   :  { %2776 = vmatpush.msrb.mxu0 %v2741_v54 }
0x1306   :  { %v2649_v32 = vsel %vm113_vm0, %v2641_v37, 0.0 }
0x1307   :  { %2650 = vadd.xlane.f32.xlu2 %v2649_v32 }
0x1309   :  { %v2636_v51 = vpop.f32.mrf.mxu3 }
0x130a   :  { %v2637_v57 = vadd.f32 %v2636_v51, %v2597_v26 }
0x130c   :  { %v2642_v44 = vadd.f32 %v2637_v57, %v2548_v7 }
0x130e   :  { %v2652_v15 = vsel %vm113_vm0, %v2642_v44, 0.0 }
0x130f   :  { %2653 = vadd.xlane.f32.xlu0 %v2652_v15 }
0x131c   :  { %v2645_v45 = vpop.xlane.xlu0 %2644 }
0x131d   :  { %v2655_v46 = vmul.f32 %v2645_v45, %v3701_v0 }
0x131f   :  { %v2659_v47 = vsub.f32 %v2639_v30, %v2655_v46 }
0x1321   :  { %v2663_v42 = vmul.f32 %v2659_v47, %v2659_v47 }
0x1323   :  { %v2667_v41 = vsel %vm113_vm0, %v2663_v42, 0.0 }
0x1324   :  { %v2648_v48 = vpop.xlane.xlu1 %2647  ;;  %2668 = vadd.xlane.f32.xlu1 %v2667_v41 }
0x1325   :  { %v2656_v49 = vmul.f32 %v2648_v48, %v3701_v0 }
0x1327   :  { %v2660_v63 = vsub.f32 %v2640_v29, %v2656_v49 }
0x1329   :  { %v2664_v52 = vmul.f32 %v2660_v63, %v2660_v63 }
0x132b   :  { %v2670_v5 = vsel %vm113_vm0, %v2664_v52, 0.0 }
0x132c   :  { %2671 = vadd.xlane.f32.xlu2 %v2670_v5 }
0x137a   :  { %v2651_v53 = vpop.xlane.xlu2 %2650 }
0x137b   :  { %v2657_v56 = vmul.f32 %v2651_v53, %v3701_v0 }
0x137d   :  { %v4185_v39 = vsub.f32 %v2641_v37, %v2657_v56 }
0x137f   :  { %v2665_v31 = vmul.f32 %v4185_v39, %v4185_v39 }
0x1381   :  { %v2673_v55 = vsel %vm113_vm0, %v2665_v31, 0.0 }
0x1382   :  { %2674 = vadd.xlane.f32.xlu0 %v2673_v55  ;;  %v2654_v58 = vpop.xlane.xlu0 %2653 }
0x1383   :  { %v2658_v59 = vmul.f32 %v2654_v58, %v3701_v0 }
0x1385   :  { %v4191_v4 = vsub.f32 %v2642_v44, %v2658_v59 }
0x1387   :  { %v2666_v13 = vmul.f32 %v4191_v4, %v4191_v4 }
0x1389   :  { %v2676_v61 = vsel %vm113_vm0, %v2666_v13, 0.0 }
0x138a   :  { %2677 = vadd.xlane.f32.xlu1 %v2676_v61 }
0x1397   :  { %v2669_v1 = vpop.xlane.xlu1 %2668 }
0x1398   :  { %v2679_v2 = vmul.f32 %v2669_v1, %v3701_v0 }
0x139a   :  { %v2683_v17 = vadd.f32 1e-05, %v2679_v2 }
0x139c   :  { %3256 = vrsqrt.f32 %v2683_v17  ;;  %vm2693_vm15 = vweird.f32 %v2683_v17 }
0x139f   :  { %v2672_v3 = vpop.xlane.xlu2 %2671 }
0x13a0   :  { %v2680_v62 = vmul.f32 %v2672_v3, %v3701_v0 }
0x13a2   :  { %v3257_v7 = vpop.eup %3256  ;;  %v2684_v8 = vadd.f32 1e-05, %v2680_v62 }
0x13a3   :  { %v2688_v60 = vmul.f32 %v3257_v7, %v2683_v17  ;;  %vm2694_vm10 = vweird.f32 %v3257_v7 }
0x13a4   :  { %3258 = vrsqrt.f32 %v2684_v8  ;;  %vm2695_vm3 = vmor %vm2693_vm15, %vm2694_vm10  ;;  %vm2703_vm2 = vweird.f32 %v2684_v8 }
0x13a5   :  { %v2689_v6 = vmul.f32 %v3257_v7, %v2688_v60 }
0x13a7   :  { %v2690_v9 = vmul.f32 0.5, %v2689_v6 }
0x13a9   :  { %v2691_v10 = vsub.f32 1.5, %v2690_v9 }
0x13aa   :  { %v3259_v12 = vpop.eup %3258 }
0x13ab   :  { %v2692_v14 = vmul.f32 %v3257_v7, %v2691_v10  ;;  %v2698_v18 = vmul.f32 %v3259_v12, %v2684_v8  ;;  %vm2704_vm1 = vweird.f32 %v3259_v12 }
0x13ac   :  { %vm2705_vm4 = vmor %vm2703_vm2, %vm2704_vm1 }
0x13ad   :  { %v2696_v20 = vsel %vm2695_vm3, %v3257_v7, %v2692_v14  ;;  %v2699_v21 = vmul.f32 %v3259_v12, %v2698_v18 }
0x13ae   :  { %v2727_v23 = vmul.f32 %v2696_v20, %v2659_v47 }
0x13af   :  { %v2700_v24 = vmul.f32 0.5, %v2699_v21 }
0x13b0   :  { %v2732_v25 = vmul.f32 %v2731_v19, %v2727_v23 }
0x13b1   :  { %v2701_v26 = vsub.f32 1.5, %v2700_v24 }
0x13b2   :  { %v2737_v27 = vadd.f32 %v2736_v22, %v2732_v25 }
0x13b3   :  { %v2702_v28 = vmul.f32 %v3259_v12, %v2701_v26 }
0x13b4   :  { %2987 = vmatmul.msk.f32.vlgmr.msrb.gmra.mxu0 %vm113_vm0, %v2737_v27 }
0x13b5   :  { %v2706_v30 = vsel %vm2705_vm4, %v3259_v12, %v2702_v28 }
0x13b6   :  { %v2728_v11 = vmul.f32 %v2706_v30, %v2660_v63 }
0x13b8   :  { %v2733_v33 = vmul.f32 %v2731_v19, %v2728_v11 }
0x13ba   :  { %v2738_v34 = vadd.f32 %v2736_v22, %v2733_v33 }
0x13bc   :  { %2988 = vmatmul.msk.f32.gmra.mxu0 %vm113_vm0, %v2738_v34 }
0x13f5   :  { %v2675_v29 = vpop.xlane.xlu0 %2674 }
0x13f6   :  { %v2681_v40 = vmul.f32 %v2675_v29, %v3701_v0 }
0x13f8   :  { %v2685_v35 = vadd.f32 1e-05, %v2681_v40 }
0x13fa   :  { %3260 = vrsqrt.f32 %v2685_v35  ;;  %vm2713_vm6 = vweird.f32 %v2685_v35 }
0x13fd   :  { %v2678_v36 = vpop.xlane.xlu1 %2677 }
0x13fe   :  { %v2682_v38 = vmul.f32 %v2678_v36, %v3701_v0 }
0x1400   :  { %v3261_v37 = vpop.eup %3260  ;;  %v2686_v32 = vadd.f32 1e-05, %v2682_v38 }
0x1401   :  { %v2708_v51 = vmul.f32 %v3261_v37, %v2685_v35  ;;  %vm2714_vm5 = vweird.f32 %v3261_v37 }
0x1402   :  { %3262 = vrsqrt.f32 %v2686_v32  ;;  %vm2715_vm7 = vmor %vm2713_vm6, %vm2714_vm5  ;;  %vm2723_vm9 = vweird.f32 %v2686_v32 }
0x1403   :  { %v2709_v57 = vmul.f32 %v3261_v37, %v2708_v51 }
0x1405   :  { %v2710_v44 = vmul.f32 0.5, %v2709_v57 }
0x1407   :  { %v2711_v15 = vsub.f32 1.5, %v2710_v44 }
0x1408   :  { %v3263_v45 = vpop.eup %3262 }
0x1409   :  { %v2712_v46 = vmul.f32 %v3261_v37, %v2711_v15  ;;  %v2718_v47 = vmul.f32 %v3263_v45, %v2686_v32  ;;  %vm2724_vm8 = vweird.f32 %v3263_v45 }
0x140a   :  { %vm2725_vm11 = vmor %vm2723_vm9, %vm2724_vm8 }
0x140b   :  { %v2716_v42 = vsel %vm2715_vm7, %v3261_v37, %v2712_v46  ;;  %v2719_v41 = vmul.f32 %v3263_v45, %v2718_v47 }
0x140c   :  { %v2729_v48 = vmul.f32 %v2716_v42, %v4185_v39  ;;  %v3101_v39 = vld [vmem:[%s4238_s9] ss:$0 sm:$0xff] }
0x140d   :  { %v2720_v49 = vmul.f32 0.5, %v2719_v41 }
0x140e   :  { %v2734_v63 = vmul.f32 %v2731_v19, %v2729_v48 }
0x140f   :  { %v2721_v0 = vsub.f32 1.5, %v2720_v49 }
0x1410   :  { %v2739_v52 = vadd.f32 %v2736_v22, %v2734_v63 }
0x1411   :  { %v2722_v5 = vmul.f32 %v3263_v45, %v2721_v0 }
0x1412   :  { %2989 = vmatmul.msk.f32.gmra.mxu0 %vm113_vm0, %v2739_v52 }
0x1413   :  { %v2726_v53 = vsel %vm2725_vm11, %v3263_v45, %v2722_v5 }
0x1414   :  { %v2730_v56 = vmul.f32 %v2726_v53, %v4191_v4 }
0x1416   :  { %v2735_v31 = vmul.f32 %v2731_v19, %v2730_v56 }
0x1418   :  { %v2740_v55 = vadd.f32 %v2736_v22, %v2735_v31 }
0x141a   :  { %2990 = vmatmul.msk.f32.gmra.mxu0 %vm113_vm0, %v2740_v55 }
0x1431   :  { %v2778_v58 = vpop.f32.mrf.mxu0 }
0x1432   :  { %v2779_v59 = vadd.f32 %v3101_v39, %v2778_v58 }
0x1434   :  { %2790 = vst [vmem:[#allocation8] sm:$0xff] %v2779_v59 }
0x1439   :  { %v2781_v13 = vpop.f32.mrf.mxu0 }
0x143a   :  { %v2782_v61 = vadd.f32 %v3101_v39, %v2781_v13 }
0x143c   :  { %2791 = vst [vmem:[#allocation8 + $0x8] sm:$0xff] %v2782_v61 }
0x148f   :  { %v2784_v16 = vpop.f32.mrf.mxu0 }
0x1490   :  { %v2785_v50 = vadd.f32 %v3101_v39, %v2784_v16 }
0x1492   :  { %2792 = vst [vmem:[#allocation8 + $0x10] sm:$0xff] %v2785_v50 }
0x1497   :  { %v2787_v4 = vpop.f32.mrf.mxu0 }
0x1498   :  { %v2788_v43 = vadd.f32 %v3101_v39, %v2787_v4 }
0x149a   :  { %2793 = vst [vmem:[#allocation8 + $0x18] sm:$0xff] %v2788_v43 }
0x149b   :  { %2806 = dma.vmem_to_hbm [thread:$0]  %s2799_s3, 512, %s2801_s15, [#allocation4], %s3372_s25, %s3372_s25, %s3373_s26  }
0x149c   :  { %3366 = dma.done.wait [#allocation4], 512  }
0x149d   :  { %3367 = vsyncadd [#allocation4], 4294966784 }
0x149e   :  { %2811 = vsyncpa [#allocation3], 1 }
0x149f   :  { %2812 = vsyncpa [#allocation6], 1 }
0x14a0   :  { %2813 = vsyncpa [#allocation4], 1 }

</bundles_post_ra>
